<compile_context>
chip_gen: v7x
topology: tpu7x:2x2x1
jax: 0.10.0
libtpu: 0.0.40
codegen_flags: <defaults>
</compile_context>

<pallas_src>
import jax
import jax.numpy as jnp
from jax.experimental import pallas as pl
from jax.experimental.pallas import tpu as pltpu

KSIZE = 4
STRIDE = 2
PAD = 1
BN_EPS = 1e-5

TM_MAX = 1024                     # pass-1 row tile (v7x-VMEM-safe; fine on v5e/v6e)
PASS2_TM_MAX = 2048               # pass-2 row tile (pure streaming)
MIN_TM = 16                       # bf16 sublane packing alignment
VMEM_LIMIT = 48 * 1024 * 1024     # explicit scoped limit, headroom on v7x (64 MiB)


def _round_up(x, m):
    return ((x + m - 1) // m) * m


def _cdiv(a, b):
    return -(-a // b)


def _pick_m_tiling(m):
    """Balanced M tiles; prefer >= 2 tiles (both v7x TCs) when padding is small."""
    num_m = max(1, _cdiv(m, TM_MAX))
    if num_m == 1:
        tm2 = _round_up(_cdiv(m, 2), MIN_TM)
        if m >= 64 and 2 * tm2 - m <= max(MIN_TM, m // 8):
            num_m = 2
    tm = _round_up(_cdiv(m, num_m), MIN_TM)
    return tm, tm * num_m, num_m


def _pass2_tiling(tm, num_m):
    """Merge M tiles for the streaming BN+ReLU pass (keep >= 2 tiles if possible)."""
    tm2, n2 = tm, num_m
    while n2 % 2 == 0 and n2 > 2 and tm2 * 2 <= PASS2_TM_MAX:
        tm2 *= 2
        n2 //= 2
    return tm2


# ---------------------------------------------------------------------------
# Pass 1: conv-as-matmul (bf16 MXU, f32 accumulation), K-resident weights,
#         fused per-tile BN statistics (sum, sum of squares).
# ---------------------------------------------------------------------------
def _conv_stats_kernel(p_ref, w_ref, y_ref, sum_ref, sq_ref):
    # p_ref:   (tm, K_pad)      bf16 im2col patches tile
    # w_ref:   (K_pad, C_pad)   bf16 full weight (constant block -> loaded once)
    # y_ref:   (tm, C_pad)      f32 conv output tile
    # sum_ref: (1, 1, C_pad)    f32 per-tile column sum
    # sq_ref:  (1, 1, C_pad)    f32 per-tile column sum of squares
    y = jnp.dot(p_ref[...], w_ref[...], preferred_element_type=jnp.float32)
    y_ref[...] = y
    sum_ref[...] = jnp.sum(y, axis=0, keepdims=True)[None]
    sq_ref[...] = jnp.sum(y * y, axis=0, keepdims=True)[None]


def conv_stats_pallas(patches, w_pad, tm):
    m_pad, k_pad = patches.shape
    c_pad = w_pad.shape[1]
    num_m = m_pad // tm
    return pl.pallas_call(
        _conv_stats_kernel,
        out_shape=(
            jax.ShapeDtypeStruct((m_pad, c_pad), jnp.float32),
            jax.ShapeDtypeStruct((num_m, 1, c_pad), jnp.float32),
            jax.ShapeDtypeStruct((num_m, 1, c_pad), jnp.float32),
        ),
        grid=(num_m,),
        in_specs=[
            pl.BlockSpec((tm, k_pad), lambda m: (m, 0)),
            pl.BlockSpec((k_pad, c_pad), lambda m: (0, 0)),   # K-resident weight
        ],
        out_specs=(
            pl.BlockSpec((tm, c_pad), lambda m: (m, 0)),
            pl.BlockSpec((1, 1, c_pad), lambda m: (m, 0, 0)),
            pl.BlockSpec((1, 1, c_pad), lambda m: (m, 0, 0)),
        ),
        compiler_params=pltpu.CompilerParams(
            dimension_semantics=("parallel",),
            vmem_limit_bytes=VMEM_LIMIT),
    )(patches, w_pad)


# ---------------------------------------------------------------------------
# Pass 2: tiled BatchNorm-normalize + ReLU (bf16 output for hidden layers)
# ---------------------------------------------------------------------------
def _bn_relu_kernel(y_ref, scale_ref, shift_ref, o_ref):
    o_ref[...] = jnp.maximum(
        y_ref[...] * scale_ref[...] + shift_ref[...], 0.0).astype(o_ref.dtype)


def bn_relu_pallas(y, scale, shift, tm, out_dtype):
    m_pad, c_pad = y.shape
    num_m = m_pad // tm
    return pl.pallas_call(
        _bn_relu_kernel,
        out_shape=jax.ShapeDtypeStruct((m_pad, c_pad), out_dtype),
        grid=(num_m,),
        in_specs=[
            pl.BlockSpec((tm, c_pad), lambda m: (m, 0)),
            pl.BlockSpec((1, c_pad), lambda m: (0, 0)),
            pl.BlockSpec((1, c_pad), lambda m: (0, 0)),
        ],
        out_specs=pl.BlockSpec((tm, c_pad), lambda m: (m, 0)),
        compiler_params=pltpu.CompilerParams(
            dimension_semantics=("parallel",),
            vmem_limit_bytes=VMEM_LIMIT),
    )(y, scale, shift)


# ---------------------------------------------------------------------------
# Plain-JAX glue: im2col patch extraction (layout plumbing, not the hot path)
# ---------------------------------------------------------------------------
def im2col(x_nhwc):
    """(N,H,W,C) -> ((N*Hout*Wout, C*16), Hout, Wout). K order = (c, kh, kw)."""
    N, H, W, C = x_nhwc.shape
    Hout = (H + 2 * PAD - KSIZE) // STRIDE + 1
    Wout = (W + 2 * PAD - KSIZE) // STRIDE + 1
    xp = jnp.pad(x_nhwc, ((0, 0), (PAD, PAD), (PAD, PAD), (0, 0)))
    cols = []
    for kh in range(KSIZE):
        for kw in range(KSIZE):
            cols.append(
                xp[:, kh:kh + STRIDE * (Hout - 1) + 1:STRIDE,
                       kw:kw + STRIDE * (Wout - 1) + 1:STRIDE, :])
    patches = jnp.stack(cols, axis=-1)                       # (N,Ho,Wo,C,16)
    patches = patches.reshape(N, Hout, Wout, C * KSIZE * KSIZE)
    return patches.reshape(N * Hout * Wout, C * KSIZE * KSIZE), Hout, Wout


# ---------------------------------------------------------------------------
# Parameters (PyTorch-default-like) and one-time kernel-layout preparation
# ---------------------------------------------------------------------------
def init_params(key, in_channels, out_channels):
    filters = [in_channels, 64, 128, 256, out_channels]
    params = []
    for i in range(1, len(filters)):
        cin, cout = filters[i - 1], filters[i]
        key, kw_, kb_ = jax.random.split(key, 3)
        fan_in = cin * KSIZE * KSIZE
        bound = 1.0 / jnp.sqrt(fan_in)
        w = jax.random.uniform(kw_, (cout, cin, KSIZE, KSIZE),
                               jnp.float32, -bound, bound)   # PyTorch OIHW
        b = jax.random.uniform(kb_, (cout,), jnp.float32, -bound, bound)
        gamma = jnp.ones((cout,), jnp.float32)
        beta = jnp.zeros((cout,), jnp.float32)
        params.append(dict(w=w, b=b, gamma=gamma, beta=beta))
    return params


def prepare_params(params):
    """Pre-reshape/pad/bf16-cast weights once (conv bias is dropped: it is a
    mathematical no-op under training-mode BatchNorm's mean subtraction)."""
    prepared = []
    for p in params:
        cout, cin = p["w"].shape[0], p["w"].shape[1]
        K = cin * KSIZE * KSIZE
        K_pad = _round_up(K, 128)
        C_pad = _round_up(cout, 128)
        w_t = p["w"].reshape(cout, K).T                       # (K, Cout)
        w_pad = jnp.pad(w_t, ((0, K_pad - K), (0, C_pad - cout)))
        prepared.append(dict(w=w_pad.astype(jnp.bfloat16),
                             gamma=p["gamma"], beta=p["beta"]))
    return prepared


# ---------------------------------------------------------------------------
# Full EncoderCNN forward (Pallas)
# ---------------------------------------------------------------------------
def _layer_forward(x_nhwc, w_pad, gamma, beta, is_last):
    N = x_nhwc.shape[0]
    K_pad, C_pad = w_pad.shape
    Cout = gamma.shape[0]

    patches, Hout, Wout = im2col(x_nhwc)                      # (M, K)
    M, K = patches.shape
    tm, M_pad, num_m = _pick_m_tiling(M)

    patches = jnp.pad(patches, ((0, M_pad - M), (0, K_pad - K)))
    patches = patches.astype(jnp.bfloat16)                    # bf16 MXU inputs

    y, tile_sum, tile_sq = conv_stats_pallas(patches, w_pad, tm)

    # Tiny per-channel reduction over the M tiles; BN stats over real M only
    # (zero-padded rows contribute 0 to both sums, so they are harmless).
    col_sum = jnp.sum(tile_sum[:, 0, :], axis=0)              # (C_pad,)
    col_sq = jnp.sum(tile_sq[:, 0, :], axis=0)
    inv_m = 1.0 / M
    mean = col_sum * inv_m
    var = jnp.maximum(col_sq * inv_m - mean * mean, 0.0)
    inv_std = jax.lax.rsqrt(var + BN_EPS)
    gamma_p = jnp.pad(gamma, (0, C_pad - Cout))
    beta_p = jnp.pad(beta, (0, C_pad - Cout))
    scale = (gamma_p * inv_std).reshape(1, C_pad)
    shift = (beta_p - mean * gamma_p * inv_std).reshape(1, C_pad)

    tm2 = _pass2_tiling(tm, num_m)
    out_dtype = jnp.float32 if is_last else jnp.bfloat16       # bf16 hidden acts
    out = bn_relu_pallas(y, scale, shift, tm2, out_dtype)
    # Crop is a no-op when M == M_pad and Cout == C_pad (layers 2/3); for the
    # Cout=64 layer, cropping halves the next layer's im2col/matmul traffic.
    return out[:M, :Cout].reshape(N, Hout, Wout, Cout)


@jax.jit
def encoder_cnn_forward(x_nchw, prepared):
    x = jnp.transpose(x_nchw, (0, 2, 3, 1)).astype(jnp.float32)   # -> NHWC
    n_layers = len(prepared)
    for i, layer in enumerate(prepared):
        x = _layer_forward(x, layer["w"], layer["gamma"], layer["beta"],
                           is_last=(i == n_layers - 1))
    return jnp.transpose(x, (0, 3, 1, 2))                          # -> NCHW


# ---------------------------------------------------------------------------
# Reference (bf16 conv inputs / f32 accumulation, mirroring the kernel's MXU
# precision; keeps the conv bias to demonstrate it cancels under train-BN)
# ---------------------------------------------------------------------------
def encoder_cnn_reference(x_nchw, params):
    x = jnp.transpose(x_nchw, (0, 2, 3, 1)).astype(jnp.float32)
    for p in params:
        w_hwio = jnp.transpose(p["w"], (2, 3, 1, 0))
        y = jax.lax.conv_general_dilated(
            x.astype(jnp.bfloat16), w_hwio.astype(jnp.bfloat16),
            window_strides=(STRIDE, STRIDE),
            padding=((PAD, PAD), (PAD, PAD)),
            dimension_numbers=("NHWC", "HWIO", "NHWC"),
            preferred_element_type=jnp.float32)
        y = y + p["b"]
        mean = jnp.mean(y, axis=(0, 1, 2), keepdims=True)
        var = jnp.mean((y - mean) ** 2, axis=(0, 1, 2), keepdims=True)
        y = p["gamma"] * (y - mean) * jax.lax.rsqrt(var + BN_EPS) + p["beta"]
        x = jnp.maximum(y, 0.0)
    return jnp.transpose(x, (0, 3, 1, 2))


if __name__ == "__main__":
    key = jax.random.PRNGKey(0)
    k_param, k_x = jax.random.split(key)

    N, IN_CH, OUT_CH, H, W = 2, 4, 8, 16, 16
    params = init_params(k_param, IN_CH, OUT_CH)
    prepared = prepare_params(params)
    x = jax.random.normal(k_x, (N, IN_CH, H, W), jnp.float32)

    out = jax.block_until_ready(encoder_cnn_forward(x, prepared))
    assert out.shape == (N, OUT_CH, 1, 1), out.shape

    ref = jax.block_until_ready(encoder_cnn_reference(x, params))
    max_err = float(jnp.max(jnp.abs(out - ref)))
    assert jnp.allclose(out, ref, atol=2e-2, rtol=2e-2), max_err

    print("KERNEL_OK")
</pallas_src>

<mosaic_0001>
module attributes {stable_mosaic.version = 11 : i64} {
  func.func @_conv_stats_kernel(%arg0: i32, %arg1: memref<64x128xbf16, #tpu.memory_space<vmem>>, %arg2: memref<128x128xbf16, #tpu.memory_space<vmem>>, %arg3: memref<64x128xf32, #tpu.memory_space<vmem>>, %arg4: memref<1x1x128xf32, #tpu.memory_space<vmem>>, %arg5: memref<1x1x128xf32, #tpu.memory_space<vmem>>) attributes {dimension_semantics = [#tpu.dimension_semantics<parallel>], iteration_bounds = array<i64: 2>, scalar_prefetch = 0 : i64, scratch_operands = 0 : i64, tpu.core_type = #tpu.core_type<tc>, window_params = [{transform_indices = @transform_0, window_bounds = array<i64: 64, 128>}, {pipeline_mode = #tpu.pipeline_mode<synchronous>, transform_indices = @transform_1, window_bounds = array<i64: 128, 128>}, {transform_indices = @transform_2, window_bounds = array<i64: 64, 128>}, {transform_indices = @transform_3, window_bounds = array<i64: 1, 1, 128>}, {transform_indices = @transform_4, window_bounds = array<i64: 1, 1, 128>}]} {
    %c0 = arith.constant 0 : index
    %c0_0 = arith.constant 0 : index
    %0 = vector.load %arg1[%c0, %c0_0] : memref<64x128xbf16, #tpu.memory_space<vmem>>, vector<64x128xbf16>
    %c0_1 = arith.constant 0 : index
    %c0_2 = arith.constant 0 : index
    %1 = vector.load %arg2[%c0_1, %c0_2] : memref<128x128xbf16, #tpu.memory_space<vmem>>, vector<128x128xbf16>
    %cst = arith.constant dense<0.000000e+00> : vector<64x128xf32>
    %2 = tpu.matmul %0, %1, %cst {dimension_numbers = #tpu.dot_dimension_numbers<[1], [0], [0], [1], [0, 0, 1, 1], [], []>} : vector<64x128xbf16>, vector<128x128xbf16>, vector<64x128xf32> -> vector<64x128xf32>
    %c0_3 = arith.constant 0 : index
    %c0_4 = arith.constant 0 : index
    %3 = vector.load %arg3[%c0_3, %c0_4] : memref<64x128xf32, #tpu.memory_space<vmem>>, vector<64x128xf32>
    tpu.vector_store %arg3[%c0_3, %c0_4], %2 {strides = array<i32>} : memref<64x128xf32, #tpu.memory_space<vmem>>, vector<64x128xf32>,
    %cst_5 = arith.constant dense<0.000000e+00> : vector<128xf32>
    %4 = vector.multi_reduction <add>, %2, %cst_5 [0] : vector<64x128xf32> to vector<128xf32>
    %5 = vector.shape_cast %4 : vector<128xf32> to vector<1x128xf32>
    %6 = vector.shape_cast %5 : vector<1x128xf32> to vector<1x1x128xf32>
    %c0_6 = arith.constant 0 : index
    %c0_7 = arith.constant 0 : index
    %c0_8 = arith.constant 0 : index
    %7 = vector.load %arg4[%c0_6, %c0_7, %c0_8] : memref<1x1x128xf32, #tpu.memory_space<vmem>>, vector<1x1x128xf32>
    tpu.vector_store %arg4[%c0_6, %c0_7, %c0_8], %6 {strides = array<i32>} : memref<1x1x128xf32, #tpu.memory_space<vmem>>, vector<1x1x128xf32>,
    %8 = arith.mulf %2, %2 : vector<64x128xf32>
    %cst_9 = arith.constant dense<0.000000e+00> : vector<128xf32>
    %9 = vector.multi_reduction <add>, %8, %cst_9 [0] : vector<64x128xf32> to vector<128xf32>
    %10 = vector.shape_cast %9 : vector<128xf32> to vector<1x128xf32>
    %11 = vector.shape_cast %10 : vector<1x128xf32> to vector<1x1x128xf32>
    %c0_10 = arith.constant 0 : index
    %c0_11 = arith.constant 0 : index
    %c0_12 = arith.constant 0 : index
    %12 = vector.load %arg5[%c0_10, %c0_11, %c0_12] : memref<1x1x128xf32, #tpu.memory_space<vmem>>, vector<1x1x128xf32>
    tpu.vector_store %arg5[%c0_10, %c0_11, %c0_12], %11 {strides = array<i32>} : memref<1x1x128xf32, #tpu.memory_space<vmem>>, vector<1x1x128xf32>,
    return
  }
  func.func @transform_0(%arg0: i32) -> (i32, i32) {
    %c0_i32 = arith.constant 0 : i32
    %c0_i32_0 = arith.constant 0 : i32
    return %arg0, %c0_i32 : i32, i32
  }
  func.func @transform_1(%arg0: i32) -> (i32, i32) {
    %c0_i32 = arith.constant 0 : i32
    %c0_i32_0 = arith.constant 0 : i32
    %c0_i32_1 = arith.constant 0 : i32
    return %c0_i32, %c0_i32_0 : i32, i32
  }
  func.func @transform_2(%arg0: i32) -> (i32, i32) {
    %c0_i32 = arith.constant 0 : i32
    %c0_i32_0 = arith.constant 0 : i32
    return %arg0, %c0_i32 : i32, i32
  }
  func.func @transform_3(%arg0: i32) -> (i32, i32, i32) {
    %c0_i32 = arith.constant 0 : i32
    %c0_i32_0 = arith.constant 0 : i32
    %c0_i32_1 = arith.constant 0 : i32
    return %arg0, %c0_i32, %c0_i32_0 : i32, i32, i32
  }
  func.func @transform_4(%arg0: i32) -> (i32, i32, i32) {
    %c0_i32 = arith.constant 0 : i32
    %c0_i32_0 = arith.constant 0 : i32
    %c0_i32_1 = arith.constant 0 : i32
    return %arg0, %c0_i32, %c0_i32_0 : i32, i32, i32
  }
}

module attributes {stable_mosaic.version = 11 : i64} {
  func.func @_bn_relu_kernel(%arg0: i32, %arg1: memref<64x128xf32, #tpu.memory_space<vmem>>, %arg2: memref<1x128xf32, #tpu.memory_space<vmem>>, %arg3: memref<1x128xf32, #tpu.memory_space<vmem>>, %arg4: memref<64x128xbf16, #tpu.memory_space<vmem>>) attributes {dimension_semantics = [#tpu.dimension_semantics<parallel>], iteration_bounds = array<i64: 2>, scalar_prefetch = 0 : i64, scratch_operands = 0 : i64, tpu.core_type = #tpu.core_type<tc>, window_params = [{transform_indices = @transform_0, window_bounds = array<i64: 64, 128>}, {pipeline_mode = #tpu.pipeline_mode<synchronous>, transform_indices = @transform_1, window_bounds = array<i64: 1, 128>}, {pipeline_mode = #tpu.pipeline_mode<synchronous>, transform_indices = @transform_2, window_bounds = array<i64: 1, 128>}, {transform_indices = @transform_3, window_bounds = array<i64: 64, 128>}]} {
    %c0 = arith.constant 0 : index
    %c0_0 = arith.constant 0 : index
    %0 = vector.load %arg1[%c0, %c0_0] : memref<64x128xf32, #tpu.memory_space<vmem>>, vector<64x128xf32>
    %c0_1 = arith.constant 0 : index
    %c0_2 = arith.constant 0 : index
    %1 = vector.load %arg2[%c0_1, %c0_2] : memref<1x128xf32, #tpu.memory_space<vmem>>, vector<1x128xf32>
    %2 = vector.broadcast %1 : vector<1x128xf32> to vector<64x128xf32>
    %3 = arith.mulf %0, %2 : vector<64x128xf32>
    %c0_3 = arith.constant 0 : index
    %c0_4 = arith.constant 0 : index
    %4 = vector.load %arg3[%c0_3, %c0_4] : memref<1x128xf32, #tpu.memory_space<vmem>>, vector<1x128xf32>
    %5 = vector.broadcast %4 : vector<1x128xf32> to vector<64x128xf32>
    %6 = arith.addf %3, %5 : vector<64x128xf32>
    %cst = arith.constant 0.000000e+00 : f32
    %7 = vector.broadcast %cst : f32 to vector<64x128xf32>
    %8 = arith.maximumf %6, %7 : vector<64x128xf32>
    %9 = arith.truncf %8 : vector<64x128xf32> to vector<64x128xbf16>
    %c0_5 = arith.constant 0 : index
    %c0_6 = arith.constant 0 : index
    %10 = vector.load %arg4[%c0_5, %c0_6] : memref<64x128xbf16, #tpu.memory_space<vmem>>, vector<64x128xbf16>
    tpu.vector_store %arg4[%c0_5, %c0_6], %9 {strides = array<i32>} : memref<64x128xbf16, #tpu.memory_space<vmem>>, vector<64x128xbf16>,
    return
  }
  func.func @transform_0(%arg0: i32) -> (i32, i32) {
    %c0_i32 = arith.constant 0 : i32
    %c0_i32_0 = arith.constant 0 : i32
    return %arg0, %c0_i32 : i32, i32
  }
  func.func @transform_1(%arg0: i32) -> (i32, i32) {
    %c0_i32 = arith.constant 0 : i32
    %c0_i32_0 = arith.constant 0 : i32
    %c0_i32_1 = arith.constant 0 : i32
    return %c0_i32, %c0_i32_0 : i32, i32
  }
  func.func @transform_2(%arg0: i32) -> (i32, i32) {
    %c0_i32 = arith.constant 0 : i32
    %c0_i32_0 = arith.constant 0 : i32
    %c0_i32_1 = arith.constant 0 : i32
    return %c0_i32, %c0_i32_0 : i32, i32
  }
  func.func @transform_3(%arg0: i32) -> (i32, i32) {
    %c0_i32 = arith.constant 0 : i32
    %c0_i32_0 = arith.constant 0 : i32
    return %arg0, %c0_i32 : i32, i32
  }
}

module attributes {stable_mosaic.version = 11 : i64} {
  func.func @_conv_stats_kernel(%arg0: i32, %arg1: memref<32x1024xbf16, #tpu.memory_space<vmem>>, %arg2: memref<1024x128xbf16, #tpu.memory_space<vmem>>, %arg3: memref<32x128xf32, #tpu.memory_space<vmem>>, %arg4: memref<1x1x128xf32, #tpu.memory_space<vmem>>, %arg5: memref<1x1x128xf32, #tpu.memory_space<vmem>>) attributes {dimension_semantics = [#tpu.dimension_semantics<parallel>], iteration_bounds = array<i64: 1>, scalar_prefetch = 0 : i64, scratch_operands = 0 : i64, tpu.core_type = #tpu.core_type<tc>, window_params = [{transform_indices = @transform_0, window_bounds = array<i64: 32, 1024>}, {pipeline_mode = #tpu.pipeline_mode<synchronous>, transform_indices = @transform_1, window_bounds = array<i64: 1024, 128>}, {transform_indices = @transform_2, window_bounds = array<i64: 32, 128>}, {transform_indices = @transform_3, window_bounds = array<i64: 1, 1, 128>}, {transform_indices = @transform_4, window_bounds = array<i64: 1, 1, 128>}]} {
    %c0 = arith.constant 0 : index
    %c0_0 = arith.constant 0 : index
    %0 = vector.load %arg1[%c0, %c0_0] : memref<32x1024xbf16, #tpu.memory_space<vmem>>, vector<32x1024xbf16>
    %c0_1 = arith.constant 0 : index
    %c0_2 = arith.constant 0 : index
    %1 = vector.load %arg2[%c0_1, %c0_2] : memref<1024x128xbf16, #tpu.memory_space<vmem>>, vector<1024x128xbf16>
    %cst = arith.constant dense<0.000000e+00> : vector<32x128xf32>
    %2 = tpu.matmul %0, %1, %cst {dimension_numbers = #tpu.dot_dimension_numbers<[1], [0], [0], [1], [0, 0, 1, 1], [], []>} : vector<32x1024xbf16>, vector<1024x128xbf16>, vector<32x128xf32> -> vector<32x128xf32>
    %c0_3 = arith.constant 0 : index
    %c0_4 = arith.constant 0 : index
    %3 = vector.load %arg3[%c0_3, %c0_4] : memref<32x128xf32, #tpu.memory_space<vmem>>, vector<32x128xf32>
    tpu.vector_store %arg3[%c0_3, %c0_4], %2 {strides = array<i32>} : memref<32x128xf32, #tpu.memory_space<vmem>>, vector<32x128xf32>,
    %cst_5 = arith.constant dense<0.000000e+00> : vector<128xf32>
    %4 = vector.multi_reduction <add>, %2, %cst_5 [0] : vector<32x128xf32> to vector<128xf32>
    %5 = vector.shape_cast %4 : vector<128xf32> to vector<1x128xf32>
    %6 = vector.shape_cast %5 : vector<1x128xf32> to vector<1x1x128xf32>
    %c0_6 = arith.constant 0 : index
    %c0_7 = arith.constant 0 : index
    %c0_8 = arith.constant 0 : index
    %7 = vector.load %arg4[%c0_6, %c0_7, %c0_8] : memref<1x1x128xf32, #tpu.memory_space<vmem>>, vector<1x1x128xf32>
    tpu.vector_store %arg4[%c0_6, %c0_7, %c0_8], %6 {strides = array<i32>} : memref<1x1x128xf32, #tpu.memory_space<vmem>>, vector<1x1x128xf32>,
    %8 = arith.mulf %2, %2 : vector<32x128xf32>
    %cst_9 = arith.constant dense<0.000000e+00> : vector<128xf32>
    %9 = vector.multi_reduction <add>, %8, %cst_9 [0] : vector<32x128xf32> to vector<128xf32>
    %10 = vector.shape_cast %9 : vector<128xf32> to vector<1x128xf32>
    %11 = vector.shape_cast %10 : vector<1x128xf32> to vector<1x1x128xf32>
    %c0_10 = arith.constant 0 : index
    %c0_11 = arith.constant 0 : index
    %c0_12 = arith.constant 0 : index
    %12 = vector.load %arg5[%c0_10, %c0_11, %c0_12] : memref<1x1x128xf32, #tpu.memory_space<vmem>>, vector<1x1x128xf32>
    tpu.vector_store %arg5[%c0_10, %c0_11, %c0_12], %11 {strides = array<i32>} : memref<1x1x128xf32, #tpu.memory_space<vmem>>, vector<1x1x128xf32>,
    return
  }
  func.func @transform_0(%arg0: i32) -> (i32, i32) {
    %c0_i32 = arith.constant 0 : i32
    %c0_i32_0 = arith.constant 0 : i32
    return %arg0, %c0_i32 : i32, i32
  }
  func.func @transform_1(%arg0: i32) -> (i32, i32) {
    %c0_i32 = arith.constant 0 : i32
    %c0_i32_0 = arith.constant 0 : i32
    %c0_i32_1 = arith.constant 0 : i32
    return %c0_i32, %c0_i32_0 : i32, i32
  }
  func.func @transform_2(%arg0: i32) -> (i32, i32) {
    %c0_i32 = arith.constant 0 : i32
    %c0_i32_0 = arith.constant 0 : i32
    return %arg0, %c0_i32 : i32, i32
  }
  func.func @transform_3(%arg0: i32) -> (i32, i32, i32) {
    %c0_i32 = arith.constant 0 : i32
    %c0_i32_0 = arith.constant 0 : i32
    %c0_i32_1 = arith.constant 0 : i32
    return %arg0, %c0_i32, %c0_i32_0 : i32, i32, i32
  }
  func.func @transform_4(%arg0: i32) -> (i32, i32, i32) {
    %c0_i32 = arith.constant 0 : i32
    %c0_i32_0 = arith.constant 0 : i32
    %c0_i32_1 = arith.constant 0 : i32
    return %arg0, %c0_i32, %c0_i32_0 : i32, i32, i32
  }
}

module attributes {stable_mosaic.version = 11 : i64} {
  func.func @_bn_relu_kernel(%arg0: i32, %arg1: memref<32x128xf32, #tpu.memory_space<vmem>>, %arg2: memref<1x128xf32, #tpu.memory_space<vmem>>, %arg3: memref<1x128xf32, #tpu.memory_space<vmem>>, %arg4: memref<32x128xbf16, #tpu.memory_space<vmem>>) attributes {dimension_semantics = [#tpu.dimension_semantics<parallel>], iteration_bounds = array<i64: 1>, scalar_prefetch = 0 : i64, scratch_operands = 0 : i64, tpu.core_type = #tpu.core_type<tc>, window_params = [{transform_indices = @transform_0, window_bounds = array<i64: 32, 128>}, {pipeline_mode = #tpu.pipeline_mode<synchronous>, transform_indices = @transform_1, window_bounds = array<i64: 1, 128>}, {pipeline_mode = #tpu.pipeline_mode<synchronous>, transform_indices = @transform_2, window_bounds = array<i64: 1, 128>}, {transform_indices = @transform_3, window_bounds = array<i64: 32, 128>}]} {
    %c0 = arith.constant 0 : index
    %c0_0 = arith.constant 0 : index
    %0 = vector.load %arg1[%c0, %c0_0] : memref<32x128xf32, #tpu.memory_space<vmem>>, vector<32x128xf32>
    %c0_1 = arith.constant 0 : index
    %c0_2 = arith.constant 0 : index
    %1 = vector.load %arg2[%c0_1, %c0_2] : memref<1x128xf32, #tpu.memory_space<vmem>>, vector<1x128xf32>
    %2 = vector.broadcast %1 : vector<1x128xf32> to vector<32x128xf32>
    %3 = arith.mulf %0, %2 : vector<32x128xf32>
    %c0_3 = arith.constant 0 : index
    %c0_4 = arith.constant 0 : index
    %4 = vector.load %arg3[%c0_3, %c0_4] : memref<1x128xf32, #tpu.memory_space<vmem>>, vector<1x128xf32>
    %5 = vector.broadcast %4 : vector<1x128xf32> to vector<32x128xf32>
    %6 = arith.addf %3, %5 : vector<32x128xf32>
    %cst = arith.constant 0.000000e+00 : f32
    %7 = vector.broadcast %cst : f32 to vector<32x128xf32>
    %8 = arith.maximumf %6, %7 : vector<32x128xf32>
    %9 = arith.truncf %8 : vector<32x128xf32> to vector<32x128xbf16>
    %c0_5 = arith.constant 0 : index
    %c0_6 = arith.constant 0 : index
    %10 = vector.load %arg4[%c0_5, %c0_6] : memref<32x128xbf16, #tpu.memory_space<vmem>>, vector<32x128xbf16>
    tpu.vector_store %arg4[%c0_5, %c0_6], %9 {strides = array<i32>} : memref<32x128xbf16, #tpu.memory_space<vmem>>, vector<32x128xbf16>,
    return
  }
  func.func @transform_0(%arg0: i32) -> (i32, i32) {
    %c0_i32 = arith.constant 0 : i32
    %c0_i32_0 = arith.constant 0 : i32
    return %arg0, %c0_i32 : i32, i32
  }
  func.func @transform_1(%arg0: i32) -> (i32, i32) {
    %c0_i32 = arith.constant 0 : i32
    %c0_i32_0 = arith.constant 0 : i32
    %c0_i32_1 = arith.constant 0 : i32
    return %c0_i32, %c0_i32_0 : i32, i32
  }
  func.func @transform_2(%arg0: i32) -> (i32, i32) {
    %c0_i32 = arith.constant 0 : i32
    %c0_i32_0 = arith.constant 0 : i32
    %c0_i32_1 = arith.constant 0 : i32
    return %c0_i32, %c0_i32_0 : i32, i32
  }
  func.func @transform_3(%arg0: i32) -> (i32, i32) {
    %c0_i32 = arith.constant 0 : i32
    %c0_i32_0 = arith.constant 0 : i32
    return %arg0, %c0_i32 : i32, i32
  }
}

module attributes {stable_mosaic.version = 11 : i64} {
  func.func @_conv_stats_kernel(%arg0: i32, %arg1: memref<16x2048xbf16, #tpu.memory_space<vmem>>, %arg2: memref<2048x256xbf16, #tpu.memory_space<vmem>>, %arg3: memref<16x256xf32, #tpu.memory_space<vmem>>, %arg4: memref<1x1x256xf32, #tpu.memory_space<vmem>>, %arg5: memref<1x1x256xf32, #tpu.memory_space<vmem>>) attributes {dimension_semantics = [#tpu.dimension_semantics<parallel>], iteration_bounds = array<i64: 1>, scalar_prefetch = 0 : i64, scratch_operands = 0 : i64, tpu.core_type = #tpu.core_type<tc>, window_params = [{transform_indices = @transform_0, window_bounds = array<i64: 16, 2048>}, {pipeline_mode = #tpu.pipeline_mode<synchronous>, transform_indices = @transform_1, window_bounds = array<i64: 2048, 256>}, {transform_indices = @transform_2, window_bounds = array<i64: 16, 256>}, {transform_indices = @transform_3, window_bounds = array<i64: 1, 1, 256>}, {transform_indices = @transform_4, window_bounds = array<i64: 1, 1, 256>}]} {
    %c0 = arith.constant 0 : index
    %c0_0 = arith.constant 0 : index
    %0 = vector.load %arg1[%c0, %c0_0] : memref<16x2048xbf16, #tpu.memory_space<vmem>>, vector<16x2048xbf16>
    %c0_1 = arith.constant 0 : index
    %c0_2 = arith.constant 0 : index
    %1 = vector.load %arg2[%c0_1, %c0_2] : memref<2048x256xbf16, #tpu.memory_space<vmem>>, vector<2048x256xbf16>
    %cst = arith.constant dense<0.000000e+00> : vector<16x256xf32>
    %2 = tpu.matmul %0, %1, %cst {dimension_numbers = #tpu.dot_dimension_numbers<[1], [0], [0], [1], [0, 0, 1, 1], [], []>} : vector<16x2048xbf16>, vector<2048x256xbf16>, vector<16x256xf32> -> vector<16x256xf32>
    %c0_3 = arith.constant 0 : index
    %c0_4 = arith.constant 0 : index
    %3 = vector.load %arg3[%c0_3, %c0_4] : memref<16x256xf32, #tpu.memory_space<vmem>>, vector<16x256xf32>
    tpu.vector_store %arg3[%c0_3, %c0_4], %2 {strides = array<i32>} : memref<16x256xf32, #tpu.memory_space<vmem>>, vector<16x256xf32>,
    %cst_5 = arith.constant dense<0.000000e+00> : vector<256xf32>
    %4 = vector.multi_reduction <add>, %2, %cst_5 [0] : vector<16x256xf32> to vector<256xf32>
    %5 = vector.shape_cast %4 : vector<256xf32> to vector<1x256xf32>
    %6 = vector.shape_cast %5 : vector<1x256xf32> to vector<1x1x256xf32>
    %c0_6 = arith.constant 0 : index
    %c0_7 = arith.constant 0 : index
    %c0_8 = arith.constant 0 : index
    %7 = vector.load %arg4[%c0_6, %c0_7, %c0_8] : memref<1x1x256xf32, #tpu.memory_space<vmem>>, vector<1x1x256xf32>
    tpu.vector_store %arg4[%c0_6, %c0_7, %c0_8], %6 {strides = array<i32>} : memref<1x1x256xf32, #tpu.memory_space<vmem>>, vector<1x1x256xf32>,
    %8 = arith.mulf %2, %2 : vector<16x256xf32>
    %cst_9 = arith.constant dense<0.000000e+00> : vector<256xf32>
    %9 = vector.multi_reduction <add>, %8, %cst_9 [0] : vector<16x256xf32> to vector<256xf32>
    %10 = vector.shape_cast %9 : vector<256xf32> to vector<1x256xf32>
    %11 = vector.shape_cast %10 : vector<1x256xf32> to vector<1x1x256xf32>
    %c0_10 = arith.constant 0 : index
    %c0_11 = arith.constant 0 : index
    %c0_12 = arith.constant 0 : index
    %12 = vector.load %arg5[%c0_10, %c0_11, %c0_12] : memref<1x1x256xf32, #tpu.memory_space<vmem>>, vector<1x1x256xf32>
    tpu.vector_store %arg5[%c0_10, %c0_11, %c0_12], %11 {strides = array<i32>} : memref<1x1x256xf32, #tpu.memory_space<vmem>>, vector<1x1x256xf32>,
    return
  }
  func.func @transform_0(%arg0: i32) -> (i32, i32) {
    %c0_i32 = arith.constant 0 : i32
    %c0_i32_0 = arith.constant 0 : i32
    return %arg0, %c0_i32 : i32, i32
  }
  func.func @transform_1(%arg0: i32) -> (i32, i32) {
    %c0_i32 = arith.constant 0 : i32
    %c0_i32_0 = arith.constant 0 : i32
    %c0_i32_1 = arith.constant 0 : i32
    return %c0_i32, %c0_i32_0 : i32, i32
  }
  func.func @transform_2(%arg0: i32) -> (i32, i32) {
    %c0_i32 = arith.constant 0 : i32
    %c0_i32_0 = arith.constant 0 : i32
    return %arg0, %c0_i32 : i32, i32
  }
  func.func @transform_3(%arg0: i32) -> (i32, i32, i32) {
    %c0_i32 = arith.constant 0 : i32
    %c0_i32_0 = arith.constant 0 : i32
    %c0_i32_1 = arith.constant 0 : i32
    return %arg0, %c0_i32, %c0_i32_0 : i32, i32, i32
  }
  func.func @transform_4(%arg0: i32) -> (i32, i32, i32) {
    %c0_i32 = arith.constant 0 : i32
    %c0_i32_0 = arith.constant 0 : i32
    %c0_i32_1 = arith.constant 0 : i32
    return %arg0, %c0_i32, %c0_i32_0 : i32, i32, i32
  }
}

module attributes {stable_mosaic.version = 11 : i64} {
  func.func @_bn_relu_kernel(%arg0: i32, %arg1: memref<16x256xf32, #tpu.memory_space<vmem>>, %arg2: memref<1x256xf32, #tpu.memory_space<vmem>>, %arg3: memref<1x256xf32, #tpu.memory_space<vmem>>, %arg4: memref<16x256xbf16, #tpu.memory_space<vmem>>) attributes {dimension_semantics = [#tpu.dimension_semantics<parallel>], iteration_bounds = array<i64: 1>, scalar_prefetch = 0 : i64, scratch_operands = 0 : i64, tpu.core_type = #tpu.core_type<tc>, window_params = [{transform_indices = @transform_0, window_bounds = array<i64: 16, 256>}, {pipeline_mode = #tpu.pipeline_mode<synchronous>, transform_indices = @transform_1, window_bounds = array<i64: 1, 256>}, {pipeline_mode = #tpu.pipeline_mode<synchronous>, transform_indices = @transform_2, window_bounds = array<i64: 1, 256>}, {transform_indices = @transform_3, window_bounds = array<i64: 16, 256>}]} {
    %c0 = arith.constant 0 : index
    %c0_0 = arith.constant 0 : index
    %0 = vector.load %arg1[%c0, %c0_0] : memref<16x256xf32, #tpu.memory_space<vmem>>, vector<16x256xf32>
    %c0_1 = arith.constant 0 : index
    %c0_2 = arith.constant 0 : index
    %1 = vector.load %arg2[%c0_1, %c0_2] : memref<1x256xf32, #tpu.memory_space<vmem>>, vector<1x256xf32>
    %2 = vector.broadcast %1 : vector<1x256xf32> to vector<16x256xf32>
    %3 = arith.mulf %0, %2 : vector<16x256xf32>
    %c0_3 = arith.constant 0 : index
    %c0_4 = arith.constant 0 : index
    %4 = vector.load %arg3[%c0_3, %c0_4] : memref<1x256xf32, #tpu.memory_space<vmem>>, vector<1x256xf32>
    %5 = vector.broadcast %4 : vector<1x256xf32> to vector<16x256xf32>
    %6 = arith.addf %3, %5 : vector<16x256xf32>
    %cst = arith.constant 0.000000e+00 : f32
    %7 = vector.broadcast %cst : f32 to vector<16x256xf32>
    %8 = arith.maximumf %6, %7 : vector<16x256xf32>
    %9 = arith.truncf %8 : vector<16x256xf32> to vector<16x256xbf16>
    %c0_5 = arith.constant 0 : index
    %c0_6 = arith.constant 0 : index
    %10 = vector.load %arg4[%c0_5, %c0_6] : memref<16x256xbf16, #tpu.memory_space<vmem>>, vector<16x256xbf16>
    tpu.vector_store %arg4[%c0_5, %c0_6], %9 {strides = array<i32>} : memref<16x256xbf16, #tpu.memory_space<vmem>>, vector<16x256xbf16>,
    return
  }
  func.func @transform_0(%arg0: i32) -> (i32, i32) {
    %c0_i32 = arith.constant 0 : i32
    %c0_i32_0 = arith.constant 0 : i32
    return %arg0, %c0_i32 : i32, i32
  }
  func.func @transform_1(%arg0: i32) -> (i32, i32) {
    %c0_i32 = arith.constant 0 : i32
    %c0_i32_0 = arith.constant 0 : i32
    %c0_i32_1 = arith.constant 0 : i32
    return %c0_i32, %c0_i32_0 : i32, i32
  }
  func.func @transform_2(%arg0: i32) -> (i32, i32) {
    %c0_i32 = arith.constant 0 : i32
    %c0_i32_0 = arith.constant 0 : i32
    %c0_i32_1 = arith.constant 0 : i32
    return %c0_i32, %c0_i32_0 : i32, i32
  }
  func.func @transform_3(%arg0: i32) -> (i32, i32) {
    %c0_i32 = arith.constant 0 : i32
    %c0_i32_0 = arith.constant 0 : i32
    return %arg0, %c0_i32 : i32, i32
  }
}

module attributes {stable_mosaic.version = 11 : i64} {
  func.func @_conv_stats_kernel(%arg0: i32, %arg1: memref<16x4096xbf16, #tpu.memory_space<vmem>>, %arg2: memref<4096x128xbf16, #tpu.memory_space<vmem>>, %arg3: memref<16x128xf32, #tpu.memory_space<vmem>>, %arg4: memref<1x1x128xf32, #tpu.memory_space<vmem>>, %arg5: memref<1x1x128xf32, #tpu.memory_space<vmem>>) attributes {dimension_semantics = [#tpu.dimension_semantics<parallel>], iteration_bounds = array<i64: 1>, scalar_prefetch = 0 : i64, scratch_operands = 0 : i64, tpu.core_type = #tpu.core_type<tc>, window_params = [{transform_indices = @transform_0, window_bounds = array<i64: 16, 4096>}, {pipeline_mode = #tpu.pipeline_mode<synchronous>, transform_indices = @transform_1, window_bounds = array<i64: 4096, 128>}, {transform_indices = @transform_2, window_bounds = array<i64: 16, 128>}, {transform_indices = @transform_3, window_bounds = array<i64: 1, 1, 128>}, {transform_indices = @transform_4, window_bounds = array<i64: 1, 1, 128>}]} {
    %c0 = arith.constant 0 : index
    %c0_0 = arith.constant 0 : index
    %0 = vector.load %arg1[%c0, %c0_0] : memref<16x4096xbf16, #tpu.memory_space<vmem>>, vector<16x4096xbf16>
    %c0_1 = arith.constant 0 : index
    %c0_2 = arith.constant 0 : index
    %1 = vector.load %arg2[%c0_1, %c0_2] : memref<4096x128xbf16, #tpu.memory_space<vmem>>, vector<4096x128xbf16>
    %cst = arith.constant dense<0.000000e+00> : vector<16x128xf32>
    %2 = tpu.matmul %0, %1, %cst {dimension_numbers = #tpu.dot_dimension_numbers<[1], [0], [0], [1], [0, 0, 1, 1], [], []>} : vector<16x4096xbf16>, vector<4096x128xbf16>, vector<16x128xf32> -> vector<16x128xf32>
    %c0_3 = arith.constant 0 : index
    %c0_4 = arith.constant 0 : index
    %3 = vector.load %arg3[%c0_3, %c0_4] : memref<16x128xf32, #tpu.memory_space<vmem>>, vector<16x128xf32>
    tpu.vector_store %arg3[%c0_3, %c0_4], %2 {strides = array<i32>} : memref<16x128xf32, #tpu.memory_space<vmem>>, vector<16x128xf32>,
    %cst_5 = arith.constant dense<0.000000e+00> : vector<128xf32>
    %4 = vector.multi_reduction <add>, %2, %cst_5 [0] : vector<16x128xf32> to vector<128xf32>
    %5 = vector.shape_cast %4 : vector<128xf32> to vector<1x128xf32>
    %6 = vector.shape_cast %5 : vector<1x128xf32> to vector<1x1x128xf32>
    %c0_6 = arith.constant 0 : index
    %c0_7 = arith.constant 0 : index
    %c0_8 = arith.constant 0 : index
    %7 = vector.load %arg4[%c0_6, %c0_7, %c0_8] : memref<1x1x128xf32, #tpu.memory_space<vmem>>, vector<1x1x128xf32>
    tpu.vector_store %arg4[%c0_6, %c0_7, %c0_8], %6 {strides = array<i32>} : memref<1x1x128xf32, #tpu.memory_space<vmem>>, vector<1x1x128xf32>,
    %8 = arith.mulf %2, %2 : vector<16x128xf32>
    %cst_9 = arith.constant dense<0.000000e+00> : vector<128xf32>
    %9 = vector.multi_reduction <add>, %8, %cst_9 [0] : vector<16x128xf32> to vector<128xf32>
    %10 = vector.shape_cast %9 : vector<128xf32> to vector<1x128xf32>
    %11 = vector.shape_cast %10 : vector<1x128xf32> to vector<1x1x128xf32>
    %c0_10 = arith.constant 0 : index
    %c0_11 = arith.constant 0 : index
    %c0_12 = arith.constant 0 : index
    %12 = vector.load %arg5[%c0_10, %c0_11, %c0_12] : memref<1x1x128xf32, #tpu.memory_space<vmem>>, vector<1x1x128xf32>
    tpu.vector_store %arg5[%c0_10, %c0_11, %c0_12], %11 {strides = array<i32>} : memref<1x1x128xf32, #tpu.memory_space<vmem>>, vector<1x1x128xf32>,
    return
  }
  func.func @transform_0(%arg0: i32) -> (i32, i32) {
    %c0_i32 = arith.constant 0 : i32
    %c0_i32_0 = arith.constant 0 : i32
    return %arg0, %c0_i32 : i32, i32
  }
  func.func @transform_1(%arg0: i32) -> (i32, i32) {
    %c0_i32 = arith.constant 0 : i32
    %c0_i32_0 = arith.constant 0 : i32
    %c0_i32_1 = arith.constant 0 : i32
    return %c0_i32, %c0_i32_0 : i32, i32
  }
  func.func @transform_2(%arg0: i32) -> (i32, i32) {
    %c0_i32 = arith.constant 0 : i32
    %c0_i32_0 = arith.constant 0 : i32
    return %arg0, %c0_i32 : i32, i32
  }
  func.func @transform_3(%arg0: i32) -> (i32, i32, i32) {
    %c0_i32 = arith.constant 0 : i32
    %c0_i32_0 = arith.constant 0 : i32
    %c0_i32_1 = arith.constant 0 : i32
    return %arg0, %c0_i32, %c0_i32_0 : i32, i32, i32
  }
  func.func @transform_4(%arg0: i32) -> (i32, i32, i32) {
    %c0_i32 = arith.constant 0 : i32
    %c0_i32_0 = arith.constant 0 : i32
    %c0_i32_1 = arith.constant 0 : i32
    return %arg0, %c0_i32, %c0_i32_0 : i32, i32, i32
  }
}

module attributes {stable_mosaic.version = 11 : i64} {
  func.func @_bn_relu_kernel(%arg0: i32, %arg1: memref<16x128xf32, #tpu.memory_space<vmem>>, %arg2: memref<1x128xf32, #tpu.memory_space<vmem>>, %arg3: memref<1x128xf32, #tpu.memory_space<vmem>>, %arg4: memref<16x128xf32, #tpu.memory_space<vmem>>) attributes {dimension_semantics = [#tpu.dimension_semantics<parallel>], iteration_bounds = array<i64: 1>, scalar_prefetch = 0 : i64, scratch_operands = 0 : i64, tpu.core_type = #tpu.core_type<tc>, window_params = [{transform_indices = @transform_0, window_bounds = array<i64: 16, 128>}, {pipeline_mode = #tpu.pipeline_mode<synchronous>, transform_indices = @transform_1, window_bounds = array<i64: 1, 128>}, {pipeline_mode = #tpu.pipeline_mode<synchronous>, transform_indices = @transform_2, window_bounds = array<i64: 1, 128>}, {transform_indices = @transform_3, window_bounds = array<i64: 16, 128>}]} {
    %c0 = arith.constant 0 : index
    %c0_0 = arith.constant 0 : index
    %0 = vector.load %arg1[%c0, %c0_0] : memref<16x128xf32, #tpu.memory_space<vmem>>, vector<16x128xf32>
    %c0_1 = arith.constant 0 : index
    %c0_2 = arith.constant 0 : index
    %1 = vector.load %arg2[%c0_1, %c0_2] : memref<1x128xf32, #tpu.memory_space<vmem>>, vector<1x128xf32>
    %2 = vector.broadcast %1 : vector<1x128xf32> to vector<16x128xf32>
    %3 = arith.mulf %0, %2 : vector<16x128xf32>
    %c0_3 = arith.constant 0 : index
    %c0_4 = arith.constant 0 : index
    %4 = vector.load %arg3[%c0_3, %c0_4] : memref<1x128xf32, #tpu.memory_space<vmem>>, vector<1x128xf32>
    %5 = vector.broadcast %4 : vector<1x128xf32> to vector<16x128xf32>
    %6 = arith.addf %3, %5 : vector<16x128xf32>
    %cst = arith.constant 0.000000e+00 : f32
    %7 = vector.broadcast %cst : f32 to vector<16x128xf32>
    %8 = arith.maximumf %6, %7 : vector<16x128xf32>
    %c0_5 = arith.constant 0 : index
    %c0_6 = arith.constant 0 : index
    %9 = vector.load %arg4[%c0_5, %c0_6] : memref<16x128xf32, #tpu.memory_space<vmem>>, vector<16x128xf32>
    tpu.vector_store %arg4[%c0_5, %c0_6], %8 {strides = array<i32>} : memref<16x128xf32, #tpu.memory_space<vmem>>, vector<16x128xf32>,
    return
  }
  func.func @transform_0(%arg0: i32) -> (i32, i32) {
    %c0_i32 = arith.constant 0 : i32
    %c0_i32_0 = arith.constant 0 : i32
    return %arg0, %c0_i32 : i32, i32
  }
  func.func @transform_1(%arg0: i32) -> (i32, i32) {
    %c0_i32 = arith.constant 0 : i32
    %c0_i32_0 = arith.constant 0 : i32
    %c0_i32_1 = arith.constant 0 : i32
    return %c0_i32, %c0_i32_0 : i32, i32
  }
  func.func @transform_2(%arg0: i32) -> (i32, i32) {
    %c0_i32 = arith.constant 0 : i32
    %c0_i32_0 = arith.constant 0 : i32
    %c0_i32_1 = arith.constant 0 : i32
    return %c0_i32, %c0_i32_0 : i32, i32
  }
  func.func @transform_3(%arg0: i32) -> (i32, i32) {
    %c0_i32 = arith.constant 0 : i32
    %c0_i32_0 = arith.constant 0 : i32
    return %arg0, %c0_i32 : i32, i32
  }
}

</mosaic_0001>

<bundles_post_ra>
// kernel: encoder_cnn_forward.9
= control target key start
LH: loop header
LB: loop body
LE: loop exit
PB: predicated region body
PF: predicated region fallthrough
CT: control target
= control target key end

     0   :  { %s404_s12 = smov 0   ;;  %s431_s0 = inlined_call_operand.vmem [shape: f32[128,128], index: 0, kind: input, shape index: {}]   ;;  %s432_s1 = inlined_call_operand.vmem [shape: f32[1,128], index: 1, kind: input, shape index: {}]   ;;  %s433_s2 = inlined_call_operand.vmem [shape: f32[1,128], index: 2, kind: input, shape index: {}]   ;;  %s434_s3 = inlined_call_operand.vmem [shape: bf16[128,128], index: 3, kind: output, shape index: {}]  }
   0x1 LB: > { %s316_s13 = sadd.s32 4294967295, %s382_s12   ;;  %p320_p0 = scmp.ge.s32.totalorder %s382_s12, 1  ;;  %s382_s12 = sphi %s404_s12, %s13_s12  }
   0x2   : > { %p138_p1 = scmp.lt.s32.totalorder %s382_s12, 3 }
   0x4   : > { %p139_p2 = pnand %p320_p0, %p138_p1 }
   0x5   : > { %s321_s14 = sshll.u32 (!%p139_p2), %s316_s13, 3  ;;  %v325_v0 = vld [vmem:[%s432_s1] ss:$0 sm:$0xff] (!%p139_p2) }
   0x6   : > { %142 = sbr.rel (%p139_p2) target bundleno = 29 (0x1d), region = 32  ;;  %p163_p3 = scmp.lt.s32.totalorder (!%p139_p2), %s321_s14, 15  ;;  %v326_v1 = vld [vmem:[%s433_s2] ss:$0 sm:$0xff] (!%p139_p2) }
   0xd   : > { %s436_s14 = smov (!%p163_p3, %s321_s14), 15 }
   0xe   : > { %s322_s15 = sshll.u32 %s436_s14, 3  ;;  %s324_s23 = sshll.u32 %s436_s14, 2 }
   0xf   : > { %s166_s20 = scalar_lea.vmem %s431_s0, %s322_s15  ;;  %s172_s26 = scalar_lea.vmem %s434_s3, %s324_s23 }
  0x10   : > { %v174_v2 = vld [vmem:[%s166_s20] sm:$0xff]  ;;  %v175_v3 = vld [vmem:[%s166_s20 + $0x8] sm:$0xff]  ;;  %v176_v4 = vld [vmem:[%s166_s20 + $0x10] sm:$0xff] }
  0x11   : > { %v189_v5 = vmul.f32 %v325_v0, %v174_v2  ;;  %v190_v6 = vmul.f32 %v325_v0, %v175_v3  ;;  %v177_v7 = vld [vmem:[%s166_s20 + $0x18] sm:$0xff]  ;;  %v191_v8 = vmul.f32 %v325_v0, %v176_v4  ;;  %v178_v9 = vld [vmem:[%s166_s20 + $0x20] sm:$0xff]  ;;  %v179_v10 = vld [vmem:[%s166_s20 + $0x28] sm:$0xff] }
  0x12   : > { %v192_v11 = vmul.f32 %v325_v0, %v177_v7  ;;  %v193_v12 = vmul.f32 %v325_v0, %v178_v9  ;;  %v194_v13 = vmul.f32 %v325_v0, %v179_v10  ;;  %v180_v14 = vld [vmem:[%s166_s20 + $0x30] sm:$0xff]  ;;  %v181_v15 = vld [vmem:[%s166_s20 + $0x38] sm:$0xff] }
  0x13   : > { %v204_v16 = vadd.f32 %v326_v1, %v189_v5  ;;  %v205_v17 = vadd.f32 %v326_v1, %v190_v6  ;;  %v206_v18 = vadd.f32 %v326_v1, %v191_v8  ;;  %v195_v19 = vmul.f32 %v325_v0, %v180_v14 }
  0x14   : > { %v207_v20 = vadd.f32 %v326_v1, %v192_v11  ;;  %v208_v21 = vadd.f32 %v326_v1, %v193_v12  ;;  %v209_v22 = vadd.f32 %v326_v1, %v194_v13  ;;  %v196_v23 = vmul.f32 %v325_v0, %v181_v15 }
  0x15   : > { %v212_v24 = vmax.f32 %v204_v16, 0.0  ;;  %v213_v25 = vmax.f32 %v205_v17, 0.0  ;;  %v214_v26 = vmax.f32 %v206_v18, 0.0  ;;  %v210_v27 = vadd.f32 %v326_v1, %v195_v19 }
  0x16   : > { %v215_v28 = vmax.f32 %v207_v20, 0.0  ;;  %v216_v29 = vmax.f32 %v208_v21, 0.0  ;;  %v217_v30 = vmax.f32 %v209_v22, 0.0  ;;  %v211_v31 = vadd.f32 %v326_v1, %v196_v23 }
  0x17   : > { %v348_v32 = vpack.c.bf16 %v213_v25, %v212_v24  ;;  %v218_v33 = vmax.f32 %v210_v27, 0.0 }
  0x18   : > { %v353_v34 = vpack.c.bf16 %v215_v28, %v214_v26  ;;  %v358_v35 = vpack.c.bf16 %v217_v30, %v216_v29  ;;  %v219_v36 = vmax.f32 %v211_v31, 0.0 }
  0x19   : > { %349 = vst [vmem:[%s172_s26] sm:$0xff] %v348_v32  }
  0x1a   : > { %365 = vst [vmem:[%s172_s26 + $0x8] sm:$0xff] %v353_v34   ;;  %366 = vst [vmem:[%s172_s26 + $0x10] sm:$0xff] %v358_v35   ;;  %v363_v37 = vpack.c.bf16 %v219_v36, %v218_v33 }
  0x1c   : > { %367 = vst [vmem:[%s172_s26 + $0x18] sm:$0xff] %v363_v37  }
  0x1d PF: > { %s13_s12 = sadd.s32 1, %s382_s12  }
  0x1e   : > { %p10_p4 = scmp.ge.s32.totalorder %s13_s12, 4  }
  0x20   :  { %12 = sbr.rel (!%p10_p4) target bundleno = 1 (0x1), region = 62 }

// kernel: encoder_cnn_forward.8
= control target key start
LH: loop header
LB: loop body
LE: loop exit
PB: predicated region body
PF: predicated region fallthrough
CT: control target
= control target key end

     0   :  { %s658_s15 = smov 0   ;;  %s720_s0 = inlined_call_operand.vmem [shape: bf16[128,128], index: 0, kind: input, shape index: {}]   ;;  %s721_s1 = inlined_call_operand.vmem [shape: bf16[128,128], index: 1, kind: input, shape index: {}]   ;;  %s722_s2 = inlined_call_operand.vmem [shape: f32[128,128], index: 2, kind: output, shape index: {0}]   ;;  %s723_s3 = inlined_call_operand.vmem [shape: f32[2,1,128], index: 3, kind: output, shape index: {1}]   ;;  %s724_s4 = inlined_call_operand.vmem [shape: f32[2,1,128], index: 4, kind: output, shape index: {2}]  }
   0x1 LB: > { %s664_s16 = sadd.s32 4294967295, %s631_s15   ;;  %p534_p0 = scmp.ge.s32.totalorder %s631_s15, 1  ;;  %s631_s15 = sphi %s658_s15, %s15_s15  }
   0x2   : > { %p168_p1 = scmp.lt.s32.totalorder %s631_s15, 3 }
   0x4   : > { %p169_p2 = pnand %p534_p0, %p168_p1 }
   0x5   : > { %v613_v0 = vld [vmem:[%s721_s1] sm:$0xff] (!%p169_p2)   ;;  %s535_s19 = sshll.u32 (!%p169_p2), %s664_s16, 3  ;;  %v614_v1 = vld [vmem:[%s721_s1 + $0x8] sm:$0xff] (!%p169_p2)   ;;  %v615_v2 = vld [vmem:[%s721_s1 + $0x10] sm:$0xff] (!%p169_p2)   ;;  %p212_p4 = scmp.lt.s32.totalorder (!%p169_p2), %s664_s16, 1 }
   0x6   : > { %172 = sbr.rel (%p169_p2) target bundleno = 282 (0x11a), region = 28  ;;  %p201_p3 = scmp.lt.s32.totalorder (!%p169_p2), %s535_s19, 15  ;;  %565 = vmatprep.subr.bf16.mxu0 (!%p169_p2), %v613_v0  ;;  %589 = vmatprep.subr.bf16.mxu1 (!%p169_p2), %v613_v0  ;;  %v616_v3 = vld [vmem:[%s721_s1 + $0x18] sm:$0xff] (!%p169_p2)   ;;  %v617_v6 = vld [vmem:[%s721_s1 + $0x20] sm:$0xff] (!%p169_p2)   ;;  %v618_v7 = vld [vmem:[%s721_s1 + $0x28] sm:$0xff] (!%p169_p2)  }
   0x7   : > { %566 = vmatpush3.bf16.msra.mxu0 (!%p169_p2), %v613_v0  ;;  %597 = vmatpush3.bf16.msra.mxu1 (!%p169_p2), %v613_v0  ;;  %v619_v8 = vld [vmem:[%s721_s1 + $0x30] sm:$0xff] (!%p169_p2)   ;;  %v620_v9 = vld [vmem:[%s721_s1 + $0x38] sm:$0xff] (!%p169_p2)  }
   0x8   : > { %567 = vmatprep.subr.bf16.mxu0 (!%p169_p2), %v614_v1  ;;  %590 = vmatprep.subr.bf16.mxu1 (!%p169_p2), %v614_v1 }
   0xb   : > { %568 = vmatpush3.bf16.msra.mxu0 (!%p169_p2), %v614_v1  ;;  %598 = vmatpush3.bf16.msra.mxu1 (!%p169_p2), %v614_v1 }
   0xc   : > { %569 = vmatprep.subr.bf16.mxu0 (!%p169_p2), %v615_v2  ;;  %591 = vmatprep.subr.bf16.mxu1 (!%p169_p2), %v615_v2 }
   0xd   : > { %s726_s19 = smov (!%p201_p3, %s535_s19), 15  ;;  %s728_s16 = smov (!%p212_p4, %s664_s16), 1 }
   0xe   : > { %s536_s24 = sshll.u32 %s726_s19, 2  ;;  %s538_s12 = sshll.u32 %s726_s19, 3 }
   0xf   : > { %s684_s27 = scalar_lea.vmem %s720_s0, %s536_s24  ;;  %570 = vmatpush3.bf16.msra.mxu0 %v615_v2  ;;  %599 = vmatpush3.bf16.msra.mxu1 %v615_v2  ;;  %s210_s17 = scalar_lea.vmem %s722_s2, %s538_s12 }
  0x10   : > { %v621_v4 = vld [vmem:[%s684_s27] sm:$0xff]   ;;  %v623_v5 = vld [vmem:[%s684_s27 + $0x10] sm:$0xff]   ;;  %571 = vmatprep.subr.bf16.mxu0 %v616_v3  ;;  %592 = vmatprep.subr.bf16.mxu1 %v616_v3  ;;  %v622_v10 = vld [vmem:[%s684_s27 + $0x8] sm:$0xff]   ;;  %s214_s20 = scalar_lea.vmem %s723_s3, %s728_s16  ;;  %s217_s23 = scalar_lea.vmem %s724_s4, %s728_s16 }
  0x11   : > { %581 = vmatprep.mubr.bf16.mxu0 %v621_v4  ;;  %585 = vmatprep.mubr.bf16.mxu1 %v623_v5  ;;  %v624_v11 = vld [vmem:[%s684_s27 + $0x18] sm:$0xff]  }
  0x13   : > { %572 = vmatpush3.bf16.msra.mxu0 %v616_v3  ;;  %600 = vmatpush3.bf16.msra.mxu1 %v616_v3 }
  0x14   : > { %573 = vmatprep.subr.bf16.mxu0 %v617_v6  ;;  %593 = vmatprep.subr.bf16.mxu1 %v617_v6 }
  0x17   : > { %574 = vmatpush3.bf16.msra.mxu0 %v617_v6  ;;  %601 = vmatpush3.bf16.msra.mxu1 %v617_v6 }
  0x18   : > { %575 = vmatprep.subr.bf16.mxu0 %v618_v7  ;;  %594 = vmatprep.subr.bf16.mxu1 %v618_v7 }
  0x1b   : > { %576 = vmatpush3.bf16.msra.mxu0 %v618_v7  ;;  %602 = vmatpush3.bf16.msra.mxu1 %v618_v7 }
  0x1c   : > { %577 = vmatprep.subr.bf16.mxu0 %v619_v8  ;;  %595 = vmatprep.subr.bf16.mxu1 %v619_v8 }
  0x1f   : > { %578 = vmatpush3.bf16.msra.mxu0 %v619_v8  ;;  %603 = vmatpush3.bf16.msra.mxu1 %v619_v8 }
  0x20   : > { %579 = vmatprep.subr.bf16.mxu0 %v620_v9  ;;  %596 = vmatprep.subr.bf16.mxu1 %v620_v9 }
  0x23   : > { %580 = vmatpush3.bf16.msra.mxu0 %v620_v9  ;;  %604 = vmatpush3.bf16.msra.mxu1 %v620_v9 }
  0x26   : > { %582 = vmatmul.mubr.bf16.vlgmr.msra.gmra.mrb[0].mxu0 %v622_v10  ;;  %586 = vmatmul.mubr.bf16.vlgmr.msra.gmra.mrb[0].mxu1 %v624_v11 }
  0xf9   : > { %v583_v12 = vpop.f32.mrb[0].mxu0  ;;  %v587_v13 = vpop.f32.mrb[0].mxu1 }
  0xfa   : > { %382 = vst [vmem:[%s210_s17 + $0x10] sm:$0xff] %v583_v12  ;;  %v349_v14 = vpop.f32.mrb[1].mxu0  ;;  %386 = vst [vmem:[%s210_s17 + $0x30] sm:$0xff] %v587_v13  ;;  %v365_v15 = vpop.f32.mrb[1].mxu1  ;;  %v404_v23 = vmul.f32 %v583_v12, %v583_v12  ;;  %v408_v35 = vmul.f32 %v587_v13, %v587_v13 }
  0xfb   : > { %380 = vst [vmem:[%s210_s17] sm:$0xff] %v349_v14  ;;  %v584_v16 = vpop.f32.mrb[2].mxu0  ;;  %384 = vst [vmem:[%s210_s17 + $0x20] sm:$0xff] %v365_v15  ;;  %v588_v17 = vpop.f32.mrb[2].mxu1  ;;  %v402_v20 = vmul.f32 %v349_v14, %v349_v14  ;;  %v406_v29 = vmul.f32 %v365_v15, %v365_v15 }
  0xfc   : > { %383 = vst [vmem:[%s210_s17 + $0x18] sm:$0xff] %v584_v16  ;;  %v352_v18 = vpop.f32.mrb[3].mxu0  ;;  %387 = vst [vmem:[%s210_s17 + $0x38] sm:$0xff] %v588_v17  ;;  %v368_v19 = vpop.f32.mrb[3].mxu1  ;;  %v405_v26 = vmul.f32 %v584_v16, %v584_v16  ;;  %v409_v38 = vmul.f32 %v588_v17, %v588_v17 }
  0xfd   : > { %381 = vst [vmem:[%s210_s17 + $0x8] sm:$0xff] %v352_v18  ;;  %v388_v21 = vadd.f32 %v352_v18, %v349_v14  ;;  %v403_v22 = vmul.f32 %v352_v18, %v352_v18  ;;  %385 = vst [vmem:[%s210_s17 + $0x28] sm:$0xff] %v368_v19  ;;  %v407_v34 = vmul.f32 %v368_v19, %v368_v19 }
  0xff   : > { %v389_v24 = vadd.f32 %v583_v12, %v388_v21  ;;  %v410_v25 = vadd.f32 %v403_v22, %v402_v20 }
 0x101   : > { %v411_v27 = vadd.f32 %v410_v25, %v404_v23  ;;  %v390_v28 = vadd.f32 %v584_v16, %v389_v24 }
 0x103   : > { %v391_v30 = vadd.f32 %v390_v28, %v365_v15  ;;  %v412_v31 = vadd.f32 %v411_v27, %v405_v26 }
 0x105   : > { %v413_v32 = vadd.f32 %v412_v31, %v406_v29  ;;  %v392_v33 = vadd.f32 %v391_v30, %v368_v19 }
 0x107   : > { %v393_v36 = vadd.f32 %v587_v13, %v392_v33  ;;  %v414_v37 = vadd.f32 %v413_v32, %v407_v34 }
 0x109   : > { %v394_v39 = vadd.f32 %v588_v17, %v393_v36  ;;  %v415_v40 = vadd.f32 %v414_v37, %v408_v35 }
 0x10b   : > { %v395_v41 = vrot.slane %v394_v39, 4  ;;  %v416_v42 = vadd.f32 %v415_v40, %v409_v38 }
 0x10d   : > { %v396_v43 = vadd.f32 %v395_v41, %v394_v39  ;;  %v417_v44 = vrot.slane %v416_v42, 4 }
 0x10f   : > { %v397_v45 = vrot.slane %v396_v43, 2  ;;  %v418_v46 = vadd.f32 %v417_v44, %v416_v42 }
 0x111   : > { %v398_v47 = vadd.f32 %v397_v45, %v396_v43  ;;  %v419_v48 = vrot.slane %v418_v46, 2 }
 0x113   : > { %v399_v49 = vrot.slane %v398_v47, 1  ;;  %v420_v50 = vadd.f32 %v419_v48, %v418_v46 }
 0x115   : > { %v400_v51 = vadd.f32 %v399_v49, %v398_v47  ;;  %v421_v52 = vrot.slane %v420_v50, 1 }
 0x117   : > { %401 = vst [vmem:[%s214_s20] sm:$0x1] %v400_v51  ;;  %v422_v53 = vadd.f32 %v421_v52, %v420_v50 }
 0x119   : > { %423 = vst [vmem:[%s217_s23] sm:$0x1] %v422_v53 }
 0x11a PF: > { %s15_s15 = sadd.s32 1, %s631_s15  }
 0x11b   : > { %p12_p5 = scmp.ge.s32.totalorder %s15_s15, 4  }
 0x11d   :  { %14 = sbr.rel (!%p12_p5) target bundleno = 1 (0x1), region = 82 }

// kernel: encoder_cnn_forward.10
= control target key start
LH: loop header
LB: loop body
LE: loop exit
PB: predicated region body
PF: predicated region fallthrough
CT: control target
= control target key end

     0   :  { %s1398_s1 = inlined_call_operand.vmem [shape: bf16[1024,128], index: 1, kind: input, shape index: {}]   ;;  %s1399_s0 = inlined_call_operand.vmem [shape: bf16[32,1024], index: 0, kind: input, shape index: {}]   ;;  %s1400_s2 = inlined_call_operand.vmem [shape: f32[32,128], index: 2, kind: output, shape index: {0}]   ;;  %s1401_s3 = inlined_call_operand.vmem [shape: f32[1,1,128], index: 3, kind: output, shape index: {1}]   ;;  %s1402_s4 = inlined_call_operand.vmem [shape: f32[1,1,128], index: 4, kind: output, shape index: {2}]  }
   0x1   :  { %v1051_v0 = vld [vmem:[%s1398_s1 + $0x40] sm:$0xff]   ;;  %v1055_v4 = vld [vmem:[%s1398_s1 + $0x48] sm:$0xff]   ;;  %v1059_v8 = vld [vmem:[%s1398_s1 + $0x50] sm:$0xff]  }
   0x2   :  { %v1052_v1 = vld [vmem:[%s1398_s1 + $0xc0] sm:$0xff]   ;;  %939 = vmatprep.subr.bf16.mxu0 %v1051_v0  ;;  %v1056_v5 = vld [vmem:[%s1398_s1 + $0xc8] sm:$0xff]   ;;  %v1060_v9 = vld [vmem:[%s1398_s1 + $0xd0] sm:$0xff]  }
   0x3   :  { %v1053_v2 = vld [vmem:[%s1398_s1] sm:$0xff]   ;;  %967 = vmatprep.subr.bf16.mxu1 %v1052_v1  ;;  %v1057_v6 = vld [vmem:[%s1398_s1 + $0x8] sm:$0xff]   ;;  %v1061_v10 = vld [vmem:[%s1398_s1 + $0x10] sm:$0xff]  }
   0x4   :  { %v1054_v3 = vld [vmem:[%s1398_s1 + $0x80] sm:$0xff]   ;;  %940 = vmatpush3.bf16.msra.mxu0 %v1053_v2  ;;  %v1058_v7 = vld [vmem:[%s1398_s1 + $0x88] sm:$0xff]   ;;  %v1062_v11 = vld [vmem:[%s1398_s1 + $0x90] sm:$0xff]  }
   0x5   :  { %968 = vmatpush3.bf16.msra.mxu1 %v1054_v3  ;;  %941 = vmatprep.subr.bf16.mxu0 %v1055_v4  ;;  %v1063_v12 = vld [vmem:[%s1398_s1 + $0x58] sm:$0xff]   ;;  %v1067_v16 = vld [vmem:[%s1398_s1 + $0x60] sm:$0xff]   ;;  %v1071_v20 = vld [vmem:[%s1398_s1 + $0x68] sm:$0xff]  }
   0x6   :  { %969 = vmatprep.subr.bf16.mxu1 %v1056_v5  ;;  %v1064_v13 = vld [vmem:[%s1398_s1 + $0xd8] sm:$0xff]   ;;  %v1068_v17 = vld [vmem:[%s1398_s1 + $0xe0] sm:$0xff]   ;;  %v1072_v21 = vld [vmem:[%s1398_s1 + $0xe8] sm:$0xff]  }
   0x7   :  { %v1065_v14 = vld [vmem:[%s1398_s1 + $0x18] sm:$0xff]   ;;  %v1069_v18 = vld [vmem:[%s1398_s1 + $0x20] sm:$0xff]   ;;  %v1073_v22 = vld [vmem:[%s1398_s1 + $0x28] sm:$0xff]  }
   0x8   :  { %942 = vmatpush3.bf16.msra.mxu0 %v1057_v6  ;;  %v1066_v15 = vld [vmem:[%s1398_s1 + $0x98] sm:$0xff]   ;;  %v1070_v19 = vld [vmem:[%s1398_s1 + $0xa0] sm:$0xff]   ;;  %v1074_v23 = vld [vmem:[%s1398_s1 + $0xa8] sm:$0xff]  }
   0x9   :  { %970 = vmatpush3.bf16.msra.mxu1 %v1058_v7  ;;  %943 = vmatprep.subr.bf16.mxu0 %v1059_v8  ;;  %v1075_v24 = vld [vmem:[%s1398_s1 + $0x70] sm:$0xff]   ;;  %v1079_v28 = vld [vmem:[%s1398_s1 + $0x78] sm:$0xff]   ;;  %v15_v32 = vld [vmem:[%s1399_s0] sm:$0xff] }
   0xa   :  { %971 = vmatprep.subr.bf16.mxu1 %v1060_v9  ;;  %v1076_v25 = vld [vmem:[%s1398_s1 + $0xf0] sm:$0xff]   ;;  %v1080_v29 = vld [vmem:[%s1398_s1 + $0xf8] sm:$0xff]   ;;  %v19_v33 = vld [vmem:[%s1399_s0 + $0x20] sm:$0xff] }
   0xb   :  { %v1077_v26 = vld [vmem:[%s1398_s1 + $0x30] sm:$0xff]   ;;  %v1081_v30 = vld [vmem:[%s1398_s1 + $0x38] sm:$0xff]   ;;  %v16_v34 = vld [vmem:[%s1399_s0 + $0x8] sm:$0xff]  ;;  %v859_v35 = vcombine.low %v15_v32, %v19_v33  ;;  %v860_v36 = vcombine.high %v15_v32, %v19_v33 }
   0xc   :  { %944 = vmatpush3.bf16.msra.mxu0 %v1061_v10  ;;  %v1078_v27 = vld [vmem:[%s1398_s1 + $0xb0] sm:$0xff]   ;;  %v1082_v31 = vld [vmem:[%s1398_s1 + $0xb8] sm:$0xff]   ;;  %v20_v37 = vld [vmem:[%s1399_s0 + $0x28] sm:$0xff] }
   0xd   :  { %972 = vmatpush3.bf16.msra.mxu1 %v1062_v11  ;;  %945 = vmatprep.subr.bf16.mxu0 %v1063_v12  ;;  %v861_v38 = vcombine.low %v16_v34, %v20_v37  ;;  %v862_v39 = vcombine.high %v16_v34, %v20_v37  ;;  %v1083_v40 = vld [vmem:[%s1398_s1 + $0x140] sm:$0xff]   ;;  %v1087_v44 = vld [vmem:[%s1398_s1 + $0x148] sm:$0xff]   ;;  %v1091_v48 = vld [vmem:[%s1398_s1 + $0x150] sm:$0xff]  }
   0xe   :  { %973 = vmatprep.subr.bf16.mxu1 %v1064_v13  ;;  %655 = vmatprep.mubr.bf16.mxu0 %v860_v36  ;;  %v1084_v41 = vld [vmem:[%s1398_s1 + $0x1c0] sm:$0xff]   ;;  %v1088_v45 = vld [vmem:[%s1398_s1 + $0x1c8] sm:$0xff]   ;;  %v1092_v49 = vld [vmem:[%s1398_s1 + $0x1d0] sm:$0xff]  }
   0xf   :  { %704 = vmatprep.mubr.bf16.mxu1 %v862_v39  ;;  %v1085_v42 = vld [vmem:[%s1398_s1 + $0x100] sm:$0xff]   ;;  %v1089_v46 = vld [vmem:[%s1398_s1 + $0x108] sm:$0xff]   ;;  %v1093_v50 = vld [vmem:[%s1398_s1 + $0x110] sm:$0xff]  }
  0x10   :  { %946 = vmatpush3.bf16.msra.mxu0 %v1065_v14  ;;  %v1086_v43 = vld [vmem:[%s1398_s1 + $0x180] sm:$0xff]   ;;  %v1090_v47 = vld [vmem:[%s1398_s1 + $0x188] sm:$0xff]   ;;  %v1094_v51 = vld [vmem:[%s1398_s1 + $0x190] sm:$0xff]  }
  0x11   :  { %974 = vmatpush3.bf16.msra.mxu1 %v1066_v15  ;;  %947 = vmatprep.subr.bf16.mxu0 %v1067_v16  ;;  %v1095_v52 = vld [vmem:[%s1398_s1 + $0x158] sm:$0xff]   ;;  %v1099_v56 = vld [vmem:[%s1398_s1 + $0x160] sm:$0xff]   ;;  %v24_v63 = vld [vmem:[%s1399_s0 + $0x48] sm:$0xff] }
  0x12   :  { %975 = vmatprep.subr.bf16.mxu1 %v1068_v17  ;;  %v1096_v53 = vld [vmem:[%s1398_s1 + $0x1d8] sm:$0xff]   ;;  %v1100_v57 = vld [vmem:[%s1398_s1 + $0x1e0] sm:$0xff]   ;;  %v28_v0 = vld [vmem:[%s1399_s0 + $0x68] sm:$0xff] }
  0x13   :  { %v1097_v54 = vld [vmem:[%s1398_s1 + $0x118] sm:$0xff]   ;;  %v1101_v58 = vld [vmem:[%s1398_s1 + $0x120] sm:$0xff]   ;;  %v870_v2 = vcombine.high %v24_v63, %v28_v0  ;;  %v1103_v3 = vld [vmem:[%s1398_s1 + $0x168] sm:$0xff]   ;;  %v869_v4 = vcombine.low %v24_v63, %v28_v0 }
  0x14   :  { %948 = vmatpush3.bf16.msra.mxu0 %v1069_v18  ;;  %v1098_v55 = vld [vmem:[%s1398_s1 + $0x198] sm:$0xff]   ;;  %v1102_v59 = vld [vmem:[%s1398_s1 + $0x1a0] sm:$0xff]   ;;  %v1104_v5 = vld [vmem:[%s1398_s1 + $0x1e8] sm:$0xff]  }
  0x15   :  { %976 = vmatpush3.bf16.msra.mxu1 %v1070_v19  ;;  %949 = vmatprep.subr.bf16.mxu0 %v1071_v20  ;;  %v23_v60 = vld [vmem:[%s1399_s0 + $0x40] sm:$0xff]  ;;  %v1105_v6 = vld [vmem:[%s1398_s1 + $0x128] sm:$0xff]   ;;  %v1107_v8 = vld [vmem:[%s1398_s1 + $0x170] sm:$0xff]  }
  0x16   :  { %977 = vmatprep.subr.bf16.mxu1 %v1072_v21  ;;  %v27_v61 = vld [vmem:[%s1399_s0 + $0x60] sm:$0xff]  ;;  %v1106_v7 = vld [vmem:[%s1398_s1 + $0x1a8] sm:$0xff]   ;;  %v1108_v9 = vld [vmem:[%s1398_s1 + $0x1f0] sm:$0xff]  }
  0x17   :  { %v868_v62 = vcombine.high %v23_v60, %v27_v61  ;;  %v867_v1 = vcombine.low %v23_v60, %v27_v61  ;;  %v1109_v10 = vld [vmem:[%s1398_s1 + $0x130] sm:$0xff]   ;;  %v1111_v12 = vld [vmem:[%s1398_s1 + $0x178] sm:$0xff]  }
  0x18   :  { %950 = vmatpush3.bf16.msra.mxu0 %v1073_v22  ;;  %v1110_v11 = vld [vmem:[%s1398_s1 + $0x1b0] sm:$0xff]   ;;  %v1112_v13 = vld [vmem:[%s1398_s1 + $0x1f8] sm:$0xff]  }
  0x19   :  { %978 = vmatpush3.bf16.msra.mxu1 %v1074_v23  ;;  %951 = vmatprep.subr.bf16.mxu0 %v1075_v24  ;;  %v1113_v14 = vld [vmem:[%s1398_s1 + $0x138] sm:$0xff]   ;;  %v17_v16 = vld [vmem:[%s1399_s0 + $0x10] sm:$0xff] }
  0x1a   :  { %979 = vmatprep.subr.bf16.mxu1 %v1076_v25  ;;  %v1114_v15 = vld [vmem:[%s1398_s1 + $0x1b8] sm:$0xff]   ;;  %v21_v17 = vld [vmem:[%s1399_s0 + $0x30] sm:$0xff] }
  0x1b   :  { %v18_v18 = vld [vmem:[%s1399_s0 + $0x18] sm:$0xff]  ;;  %v863_v20 = vcombine.low %v17_v16, %v21_v17  ;;  %v864_v21 = vcombine.high %v17_v16, %v21_v17  ;;  %v25_v24 = vld [vmem:[%s1399_s0 + $0x50] sm:$0xff] }
  0x1c   :  { %952 = vmatpush3.bf16.msra.mxu0 %v1077_v26  ;;  %v22_v19 = vld [vmem:[%s1399_s0 + $0x38] sm:$0xff]  ;;  %v29_v25 = vld [vmem:[%s1399_s0 + $0x70] sm:$0xff] }
  0x1d   :  { %980 = vmatpush3.bf16.msra.mxu1 %v1078_v27  ;;  %953 = vmatprep.subr.bf16.mxu0 %v1079_v28  ;;  %v865_v22 = vcombine.low %v18_v18, %v22_v19  ;;  %v866_v23 = vcombine.high %v18_v18, %v22_v19  ;;  %v26_v26 = vld [vmem:[%s1399_s0 + $0x58] sm:$0xff]  ;;  %v872_v27 = vcombine.high %v25_v24, %v29_v25 }
  0x1e   :  { %981 = vmatprep.subr.bf16.mxu1 %v1080_v29  ;;  %v30_v28 = vld [vmem:[%s1399_s0 + $0x78] sm:$0xff] }
  0x1f   :  { %v874_v29 = vcombine.high %v26_v26, %v30_v28 }
  0x20   :  { %954 = vmatpush3.bf16.msra.mxu0 %v1081_v30  ;;  %v871_v30 = vcombine.low %v25_v24, %v29_v25 }
  0x21   :  { %982 = vmatpush3.bf16.msra.mxu1 %v1082_v31  ;;  %995 = vmatprep.subr.bf16.mxu0 %v1083_v40  ;;  %v873_v31 = vcombine.low %v26_v26, %v30_v28 }
  0x22   :  { %1023 = vmatprep.subr.bf16.mxu1 %v1084_v41 }
  0x23   :  { %656 = vmatmul.mubr.bf16.vlgmr.msra.gmra.mrb[0].mxu0 %v859_v35 }
  0x24   :  { %705 = vmatmul.mubr.bf16.vlgmr.msra.gmra.mrb[0].mxu1 %v861_v38  ;;  %996 = vmatpush3.bf16.msra.mxu0 %v1085_v42 }
  0x25   :  { %1024 = vmatpush3.bf16.msra.mxu1 %v1086_v43  ;;  %997 = vmatprep.subr.bf16.mxu0 %v1087_v44 }
  0x26   :  { %1025 = vmatprep.subr.bf16.mxu1 %v1088_v45  ;;  %663 = vmatprep.mubr.bf16.mxu0 %v868_v62 }
  0x27   :  { %712 = vmatprep.mubr.bf16.mxu1 %v870_v2 }
  0x28   :  { %998 = vmatpush3.bf16.msra.mxu0 %v1089_v46 }
  0x29   :  { %1026 = vmatpush3.bf16.msra.mxu1 %v1090_v47  ;;  %999 = vmatprep.subr.bf16.mxu0 %v1091_v48 }
  0x2a   :  { %1027 = vmatprep.subr.bf16.mxu1 %v1092_v49 }
  0x2b   :  { %664 = vmatmul.mubr.bf16.gmra.mrb[4].mxu0 %v867_v1 }
  0x2c   :  { %1000 = vmatpush3.bf16.msra.mxu0 %v1093_v50  ;;  %713 = vmatmul.mubr.bf16.gmra.mrb[4].mxu1 %v869_v4 }
  0x2d   :  { %1028 = vmatpush3.bf16.msra.mxu1 %v1094_v51  ;;  %1001 = vmatprep.subr.bf16.mxu0 %v1095_v52 }
  0x2e   :  { %1029 = vmatprep.subr.bf16.mxu1 %v1096_v53  ;;  %753 = vmatprep.mubr.bf16.mxu0 %v864_v21 }
  0x2f   :  { %802 = vmatprep.mubr.bf16.mxu1 %v866_v23 }
  0x30   :  { %1002 = vmatpush3.bf16.msra.mxu0 %v1097_v54 }
  0x31   :  { %1030 = vmatpush3.bf16.msra.mxu1 %v1098_v55  ;;  %1003 = vmatprep.subr.bf16.mxu0 %v1099_v56 }
  0x32   :  { %1031 = vmatprep.subr.bf16.mxu1 %v1100_v57 }
  0x34   :  { %1004 = vmatpush3.bf16.msra.mxu0 %v1101_v58 }
  0x35   :  { %1032 = vmatpush3.bf16.msra.mxu1 %v1102_v59  ;;  %1005 = vmatprep.subr.bf16.mxu0 %v1103_v3 }
  0x36   :  { %1033 = vmatprep.subr.bf16.mxu1 %v1104_v5 }
  0x38   :  { %1006 = vmatpush3.bf16.msra.mxu0 %v1105_v6 }
  0x39   :  { %1034 = vmatpush3.bf16.msra.mxu1 %v1106_v7  ;;  %1007 = vmatprep.subr.bf16.mxu0 %v1107_v8 }
  0x3a   :  { %1035 = vmatprep.subr.bf16.mxu1 %v1108_v9 }
  0x3c   :  { %1008 = vmatpush3.bf16.msra.mxu0 %v1109_v10 }
  0x3d   :  { %1036 = vmatpush3.bf16.msra.mxu1 %v1110_v11  ;;  %1009 = vmatprep.subr.bf16.mxu0 %v1111_v12 }
  0x3e   :  { %1037 = vmatprep.subr.bf16.mxu1 %v1112_v13 }
  0x40   :  { %1010 = vmatpush3.bf16.msra.mxu0 %v1113_v14 }
  0x41   :  { %1038 = vmatpush3.bf16.msra.mxu1 %v1114_v15 }
  0x43   :  { %754 = vmatmul.mubr.bf16.vlgmr.msra.gmra.mrb[8].mxu0 %v863_v20 }
  0x44   :  { %803 = vmatmul.mubr.bf16.vlgmr.msra.gmra.mrb[8].mxu1 %v865_v22  ;;  %761 = vmatprep.mubr.bf16.mxu0 %v872_v27 }
  0x45   :  { %810 = vmatprep.mubr.bf16.mxu1 %v874_v29 }
  0x4b   :  { %762 = vmatmul.mubr.bf16.gmra.mrb[12].mxu0 %v871_v30 }
  0x4c   :  { %811 = vmatmul.mubr.bf16.gmra.mrb[12].mxu1 %v873_v31 }
  0xf6   :  { %v955_v32 = vpop.f32.mrb[0].mxu0 }
  0xf7   :  { %v983_v33 = vpop.f32.mrb[0].mxu1  ;;  %v956_v34 = vpop.f32.mrb[1].mxu0 }
  0xf8   :  { %v957_v35 = vadd.f32 %v956_v34, %v955_v32  ;;  %v984_v36 = vpop.f32.mrb[1].mxu1  ;;  %v958_v37 = vpop.f32.mrb[2].mxu0 }
  0xf9   :  { %v985_v38 = vadd.f32 %v984_v36, %v983_v33  ;;  %v986_v39 = vpop.f32.mrb[2].mxu1  ;;  %v959_v40 = vpop.f32.mrb[3].mxu0 }
  0xfa   :  { %v960_v41 = vadd.f32 %v959_v40, %v958_v37  ;;  %v987_v42 = vpop.f32.mrb[3].mxu1 }
  0xfb   :  { %v707_v43 = vadd.f32 %v985_v38, %v957_v35  ;;  %v988_v44 = vadd.f32 %v987_v42, %v986_v39 }
  0xfd   :  { %v710_v45 = vadd.f32 %v988_v44, %v960_v41 }
  0xfe   :  { %v961_v46 = vpop.f32.mrb[4].mxu0 }
  0xff   :  { %v989_v47 = vpop.f32.mrb[4].mxu1  ;;  %v962_v48 = vpop.f32.mrb[5].mxu0 }
 0x100   :  { %v963_v49 = vadd.f32 %v962_v48, %v961_v46  ;;  %v990_v50 = vpop.f32.mrb[5].mxu1  ;;  %v964_v51 = vpop.f32.mrb[6].mxu0 }
 0x101   :  { %v991_v52 = vadd.f32 %v990_v50, %v989_v47  ;;  %v992_v53 = vpop.f32.mrb[6].mxu1  ;;  %v965_v54 = vpop.f32.mrb[7].mxu0 }
 0x102   :  { %v966_v55 = vadd.f32 %v965_v54, %v964_v51  ;;  %v993_v56 = vpop.f32.mrb[7].mxu1 }
 0x103   :  { %v715_v57 = vadd.f32 %v991_v52, %v963_v49  ;;  %v994_v58 = vadd.f32 %v993_v56, %v992_v53 }
 0x105   :  { %v718_v59 = vadd.f32 %v994_v58, %v966_v55 }
 0x116   :  { %v1011_v60 = vpop.f32.mrb[8].mxu0 }
 0x117   :  { %v1039_v61 = vpop.f32.mrb[8].mxu1  ;;  %v1012_v62 = vpop.f32.mrb[9].mxu0 }
 0x118   :  { %v1040_v63 = vpop.f32.mrb[9].mxu1  ;;  %v1013_v0 = vadd.f32 %v1012_v62, %v1011_v60  ;;  %v1014_v2 = vpop.f32.mrb[10].mxu0 }
 0x119   :  { %v1041_v1 = vadd.f32 %v1040_v63, %v1039_v61  ;;  %v1042_v3 = vpop.f32.mrb[10].mxu1  ;;  %v1015_v4 = vpop.f32.mrb[11].mxu0 }
 0x11a   :  { %v1043_v5 = vpop.f32.mrb[11].mxu1  ;;  %v756_v6 = vadd.f32 %v1013_v0, %v707_v43  ;;  %v1016_v7 = vadd.f32 %v1015_v4, %v1014_v2 }
 0x11b   :  { %v1044_v8 = vadd.f32 %v1043_v5, %v1042_v3 }
 0x11c   :  { %v805_v9 = vadd.f32 %v1041_v1, %v756_v6  ;;  %v759_v10 = vadd.f32 %v1016_v7, %v710_v45 }
 0x11e   :  { %819 = vst [vmem:[%s1400_s2] sm:$0xff] %v805_v9  ;;  %v808_v11 = vadd.f32 %v1044_v8, %v759_v10  ;;  %v1017_v12 = vpop.f32.mrb[12].mxu0  ;;  %v833_v14 = vmul.f32 %v805_v9, %v805_v9 }
 0x11f   :  { %v1045_v13 = vpop.f32.mrb[12].mxu1  ;;  %v1018_v15 = vpop.f32.mrb[13].mxu0 }
 0x120   :  { %v1046_v16 = vpop.f32.mrb[13].mxu1  ;;  %820 = vst [vmem:[%s1400_s2 + $0x8] sm:$0xff] %v808_v11  ;;  %v823_v17 = vadd.f32 %v808_v11, %v805_v9  ;;  %v834_v18 = vmul.f32 %v808_v11, %v808_v11  ;;  %v1019_v19 = vadd.f32 %v1018_v15, %v1017_v12  ;;  %v1020_v21 = vpop.f32.mrb[14].mxu0 }
 0x121   :  { %v1047_v20 = vadd.f32 %v1046_v16, %v1045_v13  ;;  %v1048_v22 = vpop.f32.mrb[14].mxu1  ;;  %v1021_v23 = vpop.f32.mrb[15].mxu0 }
 0x122   :  { %v1049_v24 = vpop.f32.mrb[15].mxu1  ;;  %v837_v25 = vadd.f32 %v834_v18, %v833_v14  ;;  %v764_v26 = vadd.f32 %v1019_v19, %v715_v57  ;;  %v1022_v27 = vadd.f32 %v1021_v23, %v1020_v21 }
 0x123   :  { %v1050_v28 = vadd.f32 %v1049_v24, %v1048_v22 }
 0x124   :  { %v813_v29 = vadd.f32 %v1047_v20, %v764_v26  ;;  %v767_v30 = vadd.f32 %v1022_v27, %v718_v59 }
 0x126   :  { %821 = vst [vmem:[%s1400_s2 + $0x10] sm:$0xff] %v813_v29  ;;  %v824_v31 = vadd.f32 %v823_v17, %v813_v29  ;;  %v835_v32 = vmul.f32 %v813_v29, %v813_v29  ;;  %v816_v33 = vadd.f32 %v1050_v28, %v767_v30 }
 0x128   :  { %v838_v34 = vadd.f32 %v837_v25, %v835_v32  ;;  %822 = vst [vmem:[%s1400_s2 + $0x18] sm:$0xff] %v816_v33  ;;  %v825_v35 = vadd.f32 %v824_v31, %v816_v33  ;;  %v836_v36 = vmul.f32 %v816_v33, %v816_v33 }
 0x12a   :  { %v826_v37 = vrot.slane %v825_v35, 4  ;;  %v839_v38 = vadd.f32 %v838_v34, %v836_v36 }
 0x12c   :  { %v827_v39 = vadd.f32 %v826_v37, %v825_v35  ;;  %v840_v40 = vrot.slane %v839_v38, 4 }
 0x12e   :  { %v828_v41 = vrot.slane %v827_v39, 2  ;;  %v841_v42 = vadd.f32 %v840_v40, %v839_v38 }
 0x130   :  { %v829_v43 = vadd.f32 %v828_v41, %v827_v39  ;;  %v842_v44 = vrot.slane %v841_v42, 2 }
 0x132   :  { %v830_v45 = vrot.slane %v829_v43, 1  ;;  %v843_v46 = vadd.f32 %v842_v44, %v841_v42 }
 0x134   :  { %v831_v47 = vadd.f32 %v830_v45, %v829_v43  ;;  %v844_v48 = vrot.slane %v843_v46, 1 }
 0x136   :  { %832 = vst [vmem:[%s1401_s3] sm:$0x1] %v831_v47  ;;  %v845_v49 = vadd.f32 %v844_v48, %v843_v46 }
 0x138   :  { %846 = vst [vmem:[%s1402_s4] sm:$0x1] %v845_v49 }

// kernel: encoder_cnn_forward.11
= control target key start
LH: loop header
LB: loop body
LE: loop exit
PB: predicated region body
PF: predicated region fallthrough
CT: control target
= control target key end

     0   :  { %s133_s0 = inlined_call_operand.vmem [shape: f32[32,128], index: 0, kind: input, shape index: {}]   ;;  %s134_s1 = inlined_call_operand.vmem [shape: f32[1,128], index: 1, kind: input, shape index: {}]   ;;  %s135_s2 = inlined_call_operand.vmem [shape: f32[1,128], index: 2, kind: input, shape index: {}]   ;;  %s136_s3 = inlined_call_operand.vmem [shape: bf16[32,128], index: 3, kind: output, shape index: {}]  }
   0x1   :  { %v14_v0 = vld [vmem:[%s133_s0] sm:$0xff]  ;;  %v15_v1 = vld [vmem:[%s133_s0 + $0x8] sm:$0xff]  ;;  %v16_v6 = vld [vmem:[%s133_s0 + $0x10] sm:$0xff] }
   0x2   :  { %v68_v2 = vld [vmem:[%s134_s1] ss:$0 sm:$0xff]  ;;  %v17_v7 = vld [vmem:[%s133_s0 + $0x18] sm:$0xff] }
   0x3   :  { %v25_v3 = vmul.f32 %v68_v2, %v14_v0  ;;  %v26_v4 = vmul.f32 %v68_v2, %v15_v1  ;;  %v69_v5 = vld [vmem:[%s135_s2] ss:$0 sm:$0xff]  ;;  %v27_v8 = vmul.f32 %v68_v2, %v16_v6  ;;  %v28_v9 = vmul.f32 %v68_v2, %v17_v7 }
   0x5   :  { %v36_v10 = vadd.f32 %v69_v5, %v25_v3  ;;  %v37_v11 = vadd.f32 %v69_v5, %v26_v4  ;;  %v38_v12 = vadd.f32 %v69_v5, %v27_v8  ;;  %v39_v13 = vadd.f32 %v69_v5, %v28_v9 }
   0x7   :  { %v40_v14 = vmax.f32 %v36_v10, 0.0  ;;  %v41_v15 = vmax.f32 %v37_v11, 0.0  ;;  %v42_v16 = vmax.f32 %v38_v12, 0.0  ;;  %v43_v17 = vmax.f32 %v39_v13, 0.0 }
   0x9   :  { %v81_v18 = vpack.c.bf16 %v41_v15, %v40_v14  ;;  %v86_v19 = vpack.c.bf16 %v43_v17, %v42_v16 }
   0xb   :  { %82 = vst [vmem:[%s136_s3] sm:$0xff] %v81_v18   ;;  %88 = vst [vmem:[%s136_s3 + $0x8] sm:$0xff] %v86_v19  }

// kernel: encoder_cnn_forward.13
= control target key start
LH: loop header
LB: loop body
LE: loop exit
PB: predicated region body
PF: predicated region fallthrough
CT: control target
= control target key end

     0   :  { %v20_v0 = vlaneseq  ;;  %s120_s1 = inlined_call_operand.vmem [shape: f32[1,256], index: 1, kind: input, shape index: {}]   ;;  %s121_s2 = inlined_call_operand.vmem [shape: f32[1,256], index: 2, kind: input, shape index: {}]   ;;  %s122_s0 = inlined_call_operand.vmem [shape: f32[16,256], index: 0, kind: input, shape index: {}]   ;;  %s123_s3 = inlined_call_operand.vmem [shape: bf16[16,256], index: 3, kind: output, shape index: {}]  }
   0x1   :  { %v18_v2 = vld [vmem:[%s120_s1] sm:$0x3]  ;;  %v15_v7 = vld [vmem:[%s122_s0 + $0x8] sm:$0xff]  ;;  %v16_v8 = vld [vmem:[%s122_s0 + $0x10] sm:$0xff] }
   0x2   :  { %v21_v1 = vshrl.u32 %v20_v0, 7  ;;  %v34_v3 = vld [vmem:[%s121_s2] sm:$0x3]  ;;  %v17_v9 = vld [vmem:[%s122_s0 + $0x18] sm:$0xff] }
   0x3   :  { %v14_v4 = vld [vmem:[%s122_s0] sm:$0xff] }
   0x4   :  { %v22_v5 = vsub.s32 0, %v21_v1  ;;  %v26_v6 = vsub.s32 1, %v21_v1 }
   0x6   :  { %v23_v10 = vrot.slane %v18_v2, %v22_v5  ;;  %v27_v11 = vrot.slane %v18_v2, %v26_v6  ;;  %v39_v12 = vrot.slane %v34_v3, %v22_v5  ;;  %v43_v13 = vrot.slane %v34_v3, %v26_v6 }
   0x8   :  { %v30_v14 = vmul.f32 %v23_v10, %v14_v4  ;;  %v31_v15 = vmul.f32 %v27_v11, %v15_v7  ;;  %v32_v16 = vmul.f32 %v23_v10, %v16_v8  ;;  %v33_v17 = vmul.f32 %v27_v11, %v17_v9 }
   0xa   :  { %v46_v18 = vadd.f32 %v39_v12, %v30_v14  ;;  %v47_v19 = vadd.f32 %v43_v13, %v31_v15  ;;  %v48_v20 = vadd.f32 %v39_v12, %v32_v16  ;;  %v49_v21 = vadd.f32 %v43_v13, %v33_v17 }
   0xc   :  { %v50_v22 = vmax.f32 %v46_v18, 0.0  ;;  %v51_v23 = vmax.f32 %v47_v19, 0.0  ;;  %v52_v24 = vmax.f32 %v48_v20, 0.0  ;;  %v53_v25 = vmax.f32 %v49_v21, 0.0 }
   0xe   :  { %v74_v26 = vpack.c.bf16 %v51_v23, %v50_v22  ;;  %v75_v27 = vpack.c.bf16 %v53_v25, %v52_v24 }
  0x10   :  { %66 = vst [vmem:[%s123_s3] sm:$0xff] %v74_v26  ;;  %67 = vst [vmem:[%s123_s3 + $0x8] sm:$0xff] %v75_v27 }

// kernel: encoder_cnn_forward.12
= control target key start
LH: loop header
LB: loop body
LE: loop exit
PB: predicated region body
PF: predicated region fallthrough
CT: control target
= control target key end

     0   :  { %s3673_s1 = inlined_call_operand.vmem [shape: bf16[2048,256], index: 1, kind: input, shape index: {}]   ;;  %s3674_s0 = inlined_call_operand.vmem [shape: bf16[16,2048], index: 0, kind: input, shape index: {}]   ;;  %s3675_s2 = inlined_call_operand.vmem [shape: f32[16,256], index: 2, kind: output, shape index: {0}]   ;;  %s3676_s3 = inlined_call_operand.vmem [shape: f32[1,1,256], index: 3, kind: output, shape index: {1}]   ;;  %s3677_s4 = inlined_call_operand.vmem [shape: f32[1,1,256], index: 4, kind: output, shape index: {2}]  }
   0x1   :  { %v2381_v0 = vld [vmem:[%s3673_s1 + $0x4] ss:$8 sps:$4 sm:$0xff]   ;;  %v2385_v2 = vld [vmem:[%s3673_s1] ss:$8 sps:$4 sm:$0xff]   ;;  %v2387_v4 = vld [vmem:[%s3673_s1 + $0x14] ss:$8 sps:$4 sm:$0xff]  }
   0x2   :  { %v2383_v1 = vld [vmem:[%s3673_s1 + $0x404] ss:$8 sps:$4 sm:$0xff]   ;;  %1646 = vmatprep.subr.bf16.mxu1 %v2381_v0  ;;  %v2386_v3 = vld [vmem:[%s3673_s1 + $0x400] ss:$8 sps:$4 sm:$0xff]   ;;  %v2389_v5 = vld [vmem:[%s3673_s1 + $0x414] ss:$8 sps:$4 sm:$0xff]  }
   0x3   :  { %1818 = vmatprep.subr.bf16.mxu0 %v2383_v1  ;;  %1647 = vmatpush1.bf16.msra.mxu1 %v2385_v2  ;;  %v2391_v6 = vld [vmem:[%s3673_s1 + $0x10] ss:$8 sps:$4 sm:$0xff]   ;;  %v2393_v8 = vld [vmem:[%s3673_s1 + $0x24] ss:$8 sps:$4 sm:$0xff]   ;;  %v2397_v10 = vld [vmem:[%s3673_s1 + $0x20] ss:$8 sps:$4 sm:$0xff]  }
   0x4   :  { %1819 = vmatpush1.bf16.msra.mxu0 %v2386_v3  ;;  %1648 = vmatprep.subr.bf16.mxu1 %v2387_v4  ;;  %v2392_v7 = vld [vmem:[%s3673_s1 + $0x410] ss:$8 sps:$4 sm:$0xff]   ;;  %v2395_v9 = vld [vmem:[%s3673_s1 + $0x424] ss:$8 sps:$4 sm:$0xff]   ;;  %v2398_v11 = vld [vmem:[%s3673_s1 + $0x420] ss:$8 sps:$4 sm:$0xff]  }
   0x5   :  { %1820 = vmatprep.subr.bf16.mxu0 %v2389_v5  ;;  %v2399_v12 = vld [vmem:[%s3673_s1 + $0x34] ss:$8 sps:$4 sm:$0xff]   ;;  %v2403_v14 = vld [vmem:[%s3673_s1 + $0x30] ss:$8 sps:$4 sm:$0xff]   ;;  %v2405_v16 = vld [vmem:[%s3673_s1 + $0x44] ss:$8 sps:$4 sm:$0xff]  }
   0x6   :  { %v2401_v13 = vld [vmem:[%s3673_s1 + $0x434] ss:$8 sps:$4 sm:$0xff]   ;;  %v2404_v15 = vld [vmem:[%s3673_s1 + $0x430] ss:$8 sps:$4 sm:$0xff]   ;;  %v2407_v17 = vld [vmem:[%s3673_s1 + $0x444] ss:$8 sps:$4 sm:$0xff]  }
   0x7   :  { %1649 = vmatpush1.bf16.msra.mxu1 %v2391_v6  ;;  %v2409_v18 = vld [vmem:[%s3673_s1 + $0x40] ss:$8 sps:$4 sm:$0xff]   ;;  %v2411_v20 = vld [vmem:[%s3673_s1 + $0x54] ss:$8 sps:$4 sm:$0xff]   ;;  %v2415_v22 = vld [vmem:[%s3673_s1 + $0x50] ss:$8 sps:$4 sm:$0xff]  }
   0x8   :  { %1821 = vmatpush1.bf16.msra.mxu0 %v2392_v7  ;;  %1650 = vmatprep.subr.bf16.mxu1 %v2393_v8  ;;  %v2410_v19 = vld [vmem:[%s3673_s1 + $0x440] ss:$8 sps:$4 sm:$0xff]   ;;  %v2413_v21 = vld [vmem:[%s3673_s1 + $0x454] ss:$8 sps:$4 sm:$0xff]   ;;  %v2416_v23 = vld [vmem:[%s3673_s1 + $0x450] ss:$8 sps:$4 sm:$0xff]  }
   0x9   :  { %1822 = vmatprep.subr.bf16.mxu0 %v2395_v9  ;;  %v2417_v24 = vld [vmem:[%s3673_s1 + $0x64] ss:$8 sps:$4 sm:$0xff]   ;;  %v2421_v26 = vld [vmem:[%s3673_s1 + $0x60] ss:$8 sps:$4 sm:$0xff]   ;;  %v2423_v28 = vld [vmem:[%s3673_s1 + $0x74] ss:$8 sps:$4 sm:$0xff]  }
   0xa   :  { %v2419_v25 = vld [vmem:[%s3673_s1 + $0x464] ss:$8 sps:$4 sm:$0xff]   ;;  %v2422_v27 = vld [vmem:[%s3673_s1 + $0x460] ss:$8 sps:$4 sm:$0xff]   ;;  %v2425_v29 = vld [vmem:[%s3673_s1 + $0x474] ss:$8 sps:$4 sm:$0xff]  }
   0xb   :  { %1651 = vmatpush1.bf16.msra.mxu1 %v2397_v10  ;;  %v2427_v30 = vld [vmem:[%s3673_s1 + $0x70] ss:$8 sps:$4 sm:$0xff]   ;;  %v2429_v32 = vld [vmem:[%s3673_s1 + $0x84] ss:$8 sps:$4 sm:$0xff]   ;;  %v2433_v34 = vld [vmem:[%s3673_s1 + $0x80] ss:$8 sps:$4 sm:$0xff]  }
   0xc   :  { %1823 = vmatpush1.bf16.msra.mxu0 %v2398_v11  ;;  %1652 = vmatprep.subr.bf16.mxu1 %v2399_v12  ;;  %v2428_v31 = vld [vmem:[%s3673_s1 + $0x470] ss:$8 sps:$4 sm:$0xff]   ;;  %v2431_v33 = vld [vmem:[%s3673_s1 + $0x484] ss:$8 sps:$4 sm:$0xff]   ;;  %v2434_v35 = vld [vmem:[%s3673_s1 + $0x480] ss:$8 sps:$4 sm:$0xff]  }
   0xd   :  { %1824 = vmatprep.subr.bf16.mxu0 %v2401_v13  ;;  %v2435_v36 = vld [vmem:[%s3673_s1 + $0x94] ss:$8 sps:$4 sm:$0xff]   ;;  %v2439_v38 = vld [vmem:[%s3673_s1 + $0x90] ss:$8 sps:$4 sm:$0xff]   ;;  %v2441_v40 = vld [vmem:[%s3673_s1 + $0xa4] ss:$8 sps:$4 sm:$0xff]  }
   0xe   :  { %v2437_v37 = vld [vmem:[%s3673_s1 + $0x494] ss:$8 sps:$4 sm:$0xff]   ;;  %v2440_v39 = vld [vmem:[%s3673_s1 + $0x490] ss:$8 sps:$4 sm:$0xff]   ;;  %v2443_v41 = vld [vmem:[%s3673_s1 + $0x4a4] ss:$8 sps:$4 sm:$0xff]  }
   0xf   :  { %1653 = vmatpush1.bf16.msra.mxu1 %v2403_v14  ;;  %v2445_v42 = vld [vmem:[%s3673_s1 + $0xa0] ss:$8 sps:$4 sm:$0xff]   ;;  %v2447_v44 = vld [vmem:[%s3673_s1 + $0xb4] ss:$8 sps:$4 sm:$0xff]   ;;  %v2451_v46 = vld [vmem:[%s3673_s1 + $0xb0] ss:$8 sps:$4 sm:$0xff]  }
  0x10   :  { %1825 = vmatpush1.bf16.msra.mxu0 %v2404_v15  ;;  %1654 = vmatprep.subr.bf16.mxu1 %v2405_v16  ;;  %v2446_v43 = vld [vmem:[%s3673_s1 + $0x4a0] ss:$8 sps:$4 sm:$0xff]   ;;  %v2449_v45 = vld [vmem:[%s3673_s1 + $0x4b4] ss:$8 sps:$4 sm:$0xff]   ;;  %v2452_v47 = vld [vmem:[%s3673_s1 + $0x4b0] ss:$8 sps:$4 sm:$0xff]  }
  0x11   :  { %1826 = vmatprep.subr.bf16.mxu0 %v2407_v17  ;;  %v14_v48 = vld [vmem:[%s3674_s0] sm:$0xff]  ;;  %v2459_v58 = vld [vmem:[%s3673_s1 + $0xd4] ss:$8 sps:$4 sm:$0xff]   ;;  %v2463_v60 = vld [vmem:[%s3673_s1 + $0xd0] ss:$8 sps:$4 sm:$0xff]  }
  0x12   :  { %v22_v49 = vld [vmem:[%s3674_s0 + $0x40] sm:$0xff]  ;;  %v2461_v59 = vld [vmem:[%s3673_s1 + $0x4d4] ss:$8 sps:$4 sm:$0xff]   ;;  %v2464_v61 = vld [vmem:[%s3673_s1 + $0x4d0] ss:$8 sps:$4 sm:$0xff]  }
  0x13   :  { %1655 = vmatpush1.bf16.msra.mxu1 %v2409_v18  ;;  %v2453_v50 = vld [vmem:[%s3673_s1 + $0xc4] ss:$8 sps:$4 sm:$0xff]   ;;  %v2081_v52 = vcombine.high %v14_v48, %v22_v49  ;;  %v2457_v56 = vld [vmem:[%s3673_s1 + $0xc0] ss:$8 sps:$4 sm:$0xff]   ;;  %v2471_v2 = vld [vmem:[%s3673_s1 + $0xf4] ss:$8 sps:$4 sm:$0xff]   ;;  %v2080_v8 = vcombine.low %v14_v48, %v22_v49 }
  0x14   :  { %1827 = vmatpush1.bf16.msra.mxu0 %v2410_v19  ;;  %1656 = vmatprep.subr.bf16.mxu1 %v2411_v20  ;;  %v2455_v51 = vld [vmem:[%s3673_s1 + $0x4c4] ss:$8 sps:$4 sm:$0xff]   ;;  %v2458_v57 = vld [vmem:[%s3673_s1 + $0x4c0] ss:$8 sps:$4 sm:$0xff]   ;;  %v2473_v3 = vld [vmem:[%s3673_s1 + $0x4f4] ss:$8 sps:$4 sm:$0xff]  }
  0x15   :  { %1828 = vmatprep.subr.bf16.mxu0 %v2413_v21  ;;  %v18_v53 = vld [vmem:[%s3674_s0 + $0x20] sm:$0xff]  ;;  %1678 = vmatprep.mubr.bf16.mxu1 %v2081_v52  ;;  %v2475_v4 = vld [vmem:[%s3673_s1 + $0xf0] ss:$8 sps:$4 sm:$0xff]   ;;  %v2485_v12 = vld [vmem:[%s3673_s1 + $0x114] ss:$8 sps:$4 sm:$0xff]  }
  0x16   :  { %v26_v54 = vld [vmem:[%s3674_s0 + $0x60] sm:$0xff]  ;;  %v2476_v5 = vld [vmem:[%s3673_s1 + $0x4f0] ss:$8 sps:$4 sm:$0xff]   ;;  %v2488_v13 = vld [vmem:[%s3673_s1 + $0x514] ss:$8 sps:$4 sm:$0xff]  }
  0x17   :  { %1657 = vmatpush1.bf16.msra.mxu1 %v2415_v22  ;;  %v2089_v55 = vcombine.high %v18_v53, %v26_v54  ;;  %v2465_v62 = vld [vmem:[%s3673_s1 + $0xe4] ss:$8 sps:$4 sm:$0xff]   ;;  %v2469_v0 = vld [vmem:[%s3673_s1 + $0xe0] ss:$8 sps:$4 sm:$0xff]   ;;  %v2088_v10 = vcombine.low %v18_v53, %v26_v54  ;;  %v2483_v14 = vld [vmem:[%s3673_s1 + $0x110] ss:$8 sps:$4 sm:$0xff]  }
  0x18   :  { %1829 = vmatpush1.bf16.msra.mxu0 %v2416_v23  ;;  %1658 = vmatprep.subr.bf16.mxu1 %v2417_v24  ;;  %v2467_v63 = vld [vmem:[%s3673_s1 + $0x4e4] ss:$8 sps:$4 sm:$0xff]   ;;  %v2470_v1 = vld [vmem:[%s3673_s1 + $0x4e0] ss:$8 sps:$4 sm:$0xff]   ;;  %v2486_v15 = vld [vmem:[%s3673_s1 + $0x510] ss:$8 sps:$4 sm:$0xff]  }
  0x19   :  { %1830 = vmatprep.subr.bf16.mxu0 %v2419_v25  ;;  %1850 = vmatprep.mubr.bf16.mxu0 %v2089_v55  ;;  %v2479_v6 = vld [vmem:[%s3673_s1 + $0x104] ss:$8 sps:$4 sm:$0xff]   ;;  %v2477_v9 = vld [vmem:[%s3673_s1 + $0x100] ss:$8 sps:$4 sm:$0xff]   ;;  %v2497_v20 = vld [vmem:[%s3673_s1 + $0x134] ss:$8 sps:$4 sm:$0xff]  }
  0x1a   :  { %v2482_v7 = vld [vmem:[%s3673_s1 + $0x504] ss:$8 sps:$4 sm:$0xff]   ;;  %v2480_v11 = vld [vmem:[%s3673_s1 + $0x500] ss:$8 sps:$4 sm:$0xff]   ;;  %v2500_v21 = vld [vmem:[%s3673_s1 + $0x534] ss:$8 sps:$4 sm:$0xff]  }
  0x1b   :  { %1659 = vmatpush1.bf16.msra.mxu1 %v2421_v26  ;;  %v2491_v16 = vld [vmem:[%s3673_s1 + $0x124] ss:$8 sps:$4 sm:$0xff]   ;;  %v2489_v18 = vld [vmem:[%s3673_s1 + $0x120] ss:$8 sps:$4 sm:$0xff]   ;;  %v2495_v22 = vld [vmem:[%s3673_s1 + $0x130] ss:$8 sps:$4 sm:$0xff]  }
  0x1c   :  { %1831 = vmatpush1.bf16.msra.mxu0 %v2422_v27  ;;  %1660 = vmatprep.subr.bf16.mxu1 %v2423_v28  ;;  %v2494_v17 = vld [vmem:[%s3673_s1 + $0x524] ss:$8 sps:$4 sm:$0xff]   ;;  %v2492_v19 = vld [vmem:[%s3673_s1 + $0x520] ss:$8 sps:$4 sm:$0xff]   ;;  %v2498_v23 = vld [vmem:[%s3673_s1 + $0x530] ss:$8 sps:$4 sm:$0xff]  }
  0x1d   :  { %1832 = vmatprep.subr.bf16.mxu0 %v2425_v29  ;;  %v2503_v24 = vld [vmem:[%s3673_s1 + $0x144] ss:$8 sps:$4 sm:$0xff]   ;;  %v2501_v26 = vld [vmem:[%s3673_s1 + $0x140] ss:$8 sps:$4 sm:$0xff]   ;;  %v2509_v28 = vld [vmem:[%s3673_s1 + $0x154] ss:$8 sps:$4 sm:$0xff]  }
  0x1e   :  { %v2506_v25 = vld [vmem:[%s3673_s1 + $0x544] ss:$8 sps:$4 sm:$0xff]   ;;  %v2504_v27 = vld [vmem:[%s3673_s1 + $0x540] ss:$8 sps:$4 sm:$0xff]   ;;  %v2512_v29 = vld [vmem:[%s3673_s1 + $0x554] ss:$8 sps:$4 sm:$0xff]  }
  0x1f   :  { %1661 = vmatpush1.bf16.msra.mxu1 %v2427_v30  ;;  %v2507_v30 = vld [vmem:[%s3673_s1 + $0x150] ss:$8 sps:$4 sm:$0xff]   ;;  %v2525_v48 = vld [vmem:[%s3673_s1 + $0x180] ss:$8 sps:$4 sm:$0xff]   ;;  %v2539_v54 = vld [vmem:[%s3673_s1 + $0x1a4] ss:$8 sps:$4 sm:$0xff]  }
  0x20   :  { %1833 = vmatpush1.bf16.msra.mxu0 %v2428_v31  ;;  %1662 = vmatprep.subr.bf16.mxu1 %v2429_v32  ;;  %v2510_v31 = vld [vmem:[%s3673_s1 + $0x550] ss:$8 sps:$4 sm:$0xff]   ;;  %v2515_v32 = vld [vmem:[%s3673_s1 + $0x164] ss:$8 sps:$4 sm:$0xff]   ;;  %v2528_v49 = vld [vmem:[%s3673_s1 + $0x580] ss:$8 sps:$4 sm:$0xff]  }
  0x21   :  { %1834 = vmatprep.subr.bf16.mxu0 %v2431_v33  ;;  %v2518_v33 = vld [vmem:[%s3673_s1 + $0x564] ss:$8 sps:$4 sm:$0xff]   ;;  %v2531_v52 = vld [vmem:[%s3673_s1 + $0x190] ss:$8 sps:$4 sm:$0xff]  }
  0x22   :  { %v2534_v53 = vld [vmem:[%s3673_s1 + $0x590] ss:$8 sps:$4 sm:$0xff]   ;;  %v2542_v55 = vld [vmem:[%s3673_s1 + $0x5a4] ss:$8 sps:$4 sm:$0xff]  }
  0x23   :  { %1663 = vmatpush1.bf16.msra.mxu1 %v2433_v34  ;;  %v2513_v34 = vld [vmem:[%s3673_s1 + $0x160] ss:$8 sps:$4 sm:$0xff]  }
  0x24   :  { %1835 = vmatpush1.bf16.msra.mxu0 %v2434_v35  ;;  %1664 = vmatprep.subr.bf16.mxu1 %v2435_v36  ;;  %v2516_v35 = vld [vmem:[%s3673_s1 + $0x560] ss:$8 sps:$4 sm:$0xff]  }
  0x25   :  { %1836 = vmatprep.subr.bf16.mxu0 %v2437_v37  ;;  %v3082_v36 = vld [vmem:[%s3674_s0 + $0x8] sm:$0xff] }
  0x26   :  { %v3087_v37 = vld [vmem:[%s3674_s0 + $0x48] sm:$0xff] }
  0x27   :  { %1665 = vmatpush1.bf16.msra.mxu1 %v2439_v38  ;;  %v2521_v38 = vld [vmem:[%s3673_s1 + $0x174] ss:$8 sps:$4 sm:$0xff]  }
  0x28   :  { %1837 = vmatpush1.bf16.msra.mxu0 %v2440_v39  ;;  %1666 = vmatprep.subr.bf16.mxu1 %v2441_v40  ;;  %v2524_v39 = vld [vmem:[%s3673_s1 + $0x574] ss:$8 sps:$4 sm:$0xff]   ;;  %v2083_v40 = vcombine.high %v3082_v36, %v3087_v37 }
  0x29   :  { %1838 = vmatprep.subr.bf16.mxu0 %v2443_v41  ;;  %v3100_v41 = vld [vmem:[%s3674_s0 + $0x28] sm:$0xff] }
  0x2b   :  { %1667 = vmatpush1.bf16.msra.mxu1 %v2445_v42  ;;  %v3105_v42 = vld [vmem:[%s3674_s0 + $0x68] sm:$0xff] }
  0x2c   :  { %1839 = vmatpush1.bf16.msra.mxu0 %v2446_v43  ;;  %1668 = vmatprep.subr.bf16.mxu1 %v2447_v44  ;;  %v2091_v43 = vcombine.high %v3100_v41, %v3105_v42  ;;  %v2519_v44 = vld [vmem:[%s3673_s1 + $0x170] ss:$8 sps:$4 sm:$0xff]  }
  0x2d   :  { %1840 = vmatprep.subr.bf16.mxu0 %v2449_v45  ;;  %v2522_v45 = vld [vmem:[%s3673_s1 + $0x570] ss:$8 sps:$4 sm:$0xff]  }
  0x2f   :  { %1669 = vmatpush1.bf16.msra.mxu1 %v2451_v46  ;;  %v2527_v46 = vld [vmem:[%s3673_s1 + $0x184] ss:$8 sps:$4 sm:$0xff]  }
  0x30   :  { %1841 = vmatpush1.bf16.msra.mxu0 %v2452_v47  ;;  %1670 = vmatprep.subr.bf16.mxu1 %v2453_v50  ;;  %v2530_v47 = vld [vmem:[%s3673_s1 + $0x584] ss:$8 sps:$4 sm:$0xff]   ;;  %v2533_v50 = vld [vmem:[%s3673_s1 + $0x194] ss:$8 sps:$4 sm:$0xff]  }
  0x31   :  { %1842 = vmatprep.subr.bf16.mxu0 %v2455_v51  ;;  %v2536_v51 = vld [vmem:[%s3673_s1 + $0x594] ss:$8 sps:$4 sm:$0xff]  }
  0x33   :  { %1671 = vmatpush1.bf16.msra.mxu1 %v2457_v56  ;;  %v2537_v56 = vld [vmem:[%s3673_s1 + $0x1a0] ss:$8 sps:$4 sm:$0xff]  }
  0x34   :  { %1843 = vmatpush1.bf16.msra.mxu0 %v2458_v57  ;;  %1672 = vmatprep.subr.bf16.mxu1 %v2459_v58  ;;  %v2540_v57 = vld [vmem:[%s3673_s1 + $0x5a0] ss:$8 sps:$4 sm:$0xff]   ;;  %v2545_v58 = vld [vmem:[%s3673_s1 + $0x1b4] ss:$8 sps:$4 sm:$0xff]  }
  0x35   :  { %1844 = vmatprep.subr.bf16.mxu0 %v2461_v59  ;;  %v2548_v59 = vld [vmem:[%s3673_s1 + $0x5b4] ss:$8 sps:$4 sm:$0xff]  }
  0x37   :  { %1673 = vmatpush1.bf16.msra.mxu1 %v2463_v60  ;;  %v2543_v60 = vld [vmem:[%s3673_s1 + $0x1b0] ss:$8 sps:$4 sm:$0xff]  }
  0x38   :  { %1845 = vmatpush1.bf16.msra.mxu0 %v2464_v61  ;;  %1674 = vmatprep.subr.bf16.mxu1 %v2465_v62  ;;  %v2546_v61 = vld [vmem:[%s3673_s1 + $0x5b0] ss:$8 sps:$4 sm:$0xff]   ;;  %v2551_v62 = vld [vmem:[%s3673_s1 + $0x1c4] ss:$8 sps:$4 sm:$0xff]  }
  0x39   :  { %1846 = vmatprep.subr.bf16.mxu0 %v2467_v63  ;;  %v2554_v63 = vld [vmem:[%s3673_s1 + $0x5c4] ss:$8 sps:$4 sm:$0xff]  }
  0x3b   :  { %1675 = vmatpush1.bf16.msra.mxu1 %v2469_v0  ;;  %v2549_v0 = vld [vmem:[%s3673_s1 + $0x1c0] ss:$8 sps:$4 sm:$0xff]  }
  0x3c   :  { %1847 = vmatpush1.bf16.msra.mxu0 %v2470_v1  ;;  %1676 = vmatprep.subr.bf16.mxu1 %v2471_v2  ;;  %v2552_v1 = vld [vmem:[%s3673_s1 + $0x5c0] ss:$8 sps:$4 sm:$0xff]   ;;  %v2557_v2 = vld [vmem:[%s3673_s1 + $0x1d4] ss:$8 sps:$4 sm:$0xff]  }
  0x3d   :  { %1848 = vmatprep.subr.bf16.mxu0 %v2473_v3  ;;  %v2560_v3 = vld [vmem:[%s3673_s1 + $0x5d4] ss:$8 sps:$4 sm:$0xff]  }
  0x3f   :  { %1677 = vmatpush1.bf16.msra.mxu1 %v2475_v4  ;;  %v2555_v4 = vld [vmem:[%s3673_s1 + $0x1d0] ss:$8 sps:$4 sm:$0xff]  }
  0x40   :  { %1849 = vmatpush1.bf16.msra.mxu0 %v2476_v5  ;;  %1689 = vmatprep.subr.bf16.mxu1 %v2479_v6  ;;  %v2558_v5 = vld [vmem:[%s3673_s1 + $0x5d0] ss:$8 sps:$4 sm:$0xff]   ;;  %v2563_v6 = vld [vmem:[%s3673_s1 + $0x1e4] ss:$8 sps:$4 sm:$0xff]  }
  0x41   :  { %1861 = vmatprep.subr.bf16.mxu0 %v2482_v7  ;;  %v2566_v7 = vld [vmem:[%s3673_s1 + $0x5e4] ss:$8 sps:$4 sm:$0xff]  }
  0x42   :  { %1679 = vmatmul.mubr.bf16.vlgmr.msra.gmra.mrb[0].mxu1 %v2080_v8  ;;  %v2561_v8 = vld [vmem:[%s3673_s1 + $0x1e0] ss:$8 sps:$4 sm:$0xff]  }
  0x43   :  { %1851 = vmatmul.mubr.bf16.vlgmr.msra.gmra.mrb[0].mxu0 %v2088_v10  ;;  %1690 = vmatpush1.bf16.msra.mxu1 %v2477_v9  ;;  %v2564_v9 = vld [vmem:[%s3673_s1 + $0x5e0] ss:$8 sps:$4 sm:$0xff]   ;;  %v2569_v10 = vld [vmem:[%s3673_s1 + $0x1f4] ss:$8 sps:$4 sm:$0xff]  }
  0x44   :  { %1862 = vmatpush1.bf16.msra.mxu0 %v2480_v11  ;;  %1691 = vmatprep.subr.bf16.mxu1 %v2485_v12  ;;  %v2572_v11 = vld [vmem:[%s3673_s1 + $0x5f4] ss:$8 sps:$4 sm:$0xff]   ;;  %v2567_v12 = vld [vmem:[%s3673_s1 + $0x1f0] ss:$8 sps:$4 sm:$0xff]  }
  0x45   :  { %1863 = vmatprep.subr.bf16.mxu0 %v2488_v13  ;;  %1721 = vmatprep.mubr.bf16.mxu1 %v2083_v40  ;;  %v2570_v13 = vld [vmem:[%s3673_s1 + $0x5f0] ss:$8 sps:$4 sm:$0xff]   ;;  %v2597_v40 = vld [vmem:[%s3673_s1 + $0x240] ss:$8 sps:$4 sm:$0xff]  }
  0x46   :  { %1893 = vmatprep.mubr.bf16.mxu0 %v2091_v43  ;;  %v2608_v43 = vld [vmem:[%s3673_s1 + $0x654] ss:$8 sps:$4 sm:$0xff]  }
  0x47   :  { %1692 = vmatpush1.bf16.msra.mxu1 %v2483_v14  ;;  %v2575_v14 = vld [vmem:[%s3673_s1 + $0x204] ss:$8 sps:$4 sm:$0xff]  }
  0x48   :  { %1864 = vmatpush1.bf16.msra.mxu0 %v2486_v15  ;;  %1693 = vmatprep.subr.bf16.mxu1 %v2491_v16  ;;  %v2578_v15 = vld [vmem:[%s3673_s1 + $0x604] ss:$8 sps:$4 sm:$0xff]   ;;  %v2082_v16 = vcombine.low %v3082_v36, %v3087_v37  ;;  %v2591_v36 = vld [vmem:[%s3673_s1 + $0x230] ss:$8 sps:$4 sm:$0xff]  }
  0x49   :  { %1865 = vmatprep.subr.bf16.mxu0 %v2494_v17  ;;  %v2573_v17 = vld [vmem:[%s3673_s1 + $0x200] ss:$8 sps:$4 sm:$0xff]   ;;  %v2594_v37 = vld [vmem:[%s3673_s1 + $0x630] ss:$8 sps:$4 sm:$0xff]  }
  0x4b   :  { %1694 = vmatpush1.bf16.msra.mxu1 %v2489_v18  ;;  %v2090_v18 = vcombine.low %v3100_v41, %v3105_v42  ;;  %v2600_v41 = vld [vmem:[%s3673_s1 + $0x640] ss:$8 sps:$4 sm:$0xff]   ;;  %v2605_v42 = vld [vmem:[%s3673_s1 + $0x254] ss:$8 sps:$4 sm:$0xff]  }
  0x4c   :  { %1866 = vmatpush1.bf16.msra.mxu0 %v2492_v19  ;;  %1695 = vmatprep.subr.bf16.mxu1 %v2497_v20  ;;  %v2576_v19 = vld [vmem:[%s3673_s1 + $0x600] ss:$8 sps:$4 sm:$0xff]   ;;  %v2581_v20 = vld [vmem:[%s3673_s1 + $0x214] ss:$8 sps:$4 sm:$0xff]  }
  0x4d   :  { %1867 = vmatprep.subr.bf16.mxu0 %v2500_v21  ;;  %v2584_v21 = vld [vmem:[%s3673_s1 + $0x614] ss:$8 sps:$4 sm:$0xff]  }
  0x4f   :  { %1696 = vmatpush1.bf16.msra.mxu1 %v2495_v22  ;;  %v2579_v22 = vld [vmem:[%s3673_s1 + $0x210] ss:$8 sps:$4 sm:$0xff]  }
  0x50   :  { %1868 = vmatpush1.bf16.msra.mxu0 %v2498_v23  ;;  %1697 = vmatprep.subr.bf16.mxu1 %v2503_v24  ;;  %v2582_v23 = vld [vmem:[%s3673_s1 + $0x610] ss:$8 sps:$4 sm:$0xff]  }
  0x51   :  { %1869 = vmatprep.subr.bf16.mxu0 %v2506_v25  ;;  %v3242_v24 = vld [vmem:[%s3674_s0 + $0x10] sm:$0xff] }
  0x52   :  { %v3247_v25 = vld [vmem:[%s3674_s0 + $0x50] sm:$0xff] }
  0x53   :  { %1698 = vmatpush1.bf16.msra.mxu1 %v2501_v26  ;;  %v2587_v26 = vld [vmem:[%s3673_s1 + $0x224] ss:$8 sps:$4 sm:$0xff]  }
  0x54   :  { %1870 = vmatpush1.bf16.msra.mxu0 %v2504_v27  ;;  %1699 = vmatprep.subr.bf16.mxu1 %v2509_v28  ;;  %v2590_v27 = vld [vmem:[%s3673_s1 + $0x624] ss:$8 sps:$4 sm:$0xff]   ;;  %v2085_v28 = vcombine.high %v3242_v24, %v3247_v25 }
  0x55   :  { %1871 = vmatprep.subr.bf16.mxu0 %v2512_v29  ;;  %v3260_v29 = vld [vmem:[%s3674_s0 + $0x30] sm:$0xff] }
  0x57   :  { %1700 = vmatpush1.bf16.msra.mxu1 %v2507_v30  ;;  %v3265_v30 = vld [vmem:[%s3674_s0 + $0x70] sm:$0xff] }
  0x58   :  { %1872 = vmatpush1.bf16.msra.mxu0 %v2510_v31  ;;  %1701 = vmatprep.subr.bf16.mxu1 %v2515_v32  ;;  %v2093_v31 = vcombine.high %v3260_v29, %v3265_v30  ;;  %v2585_v32 = vld [vmem:[%s3673_s1 + $0x220] ss:$8 sps:$4 sm:$0xff]  }
  0x59   :  { %1873 = vmatprep.subr.bf16.mxu0 %v2518_v33  ;;  %v2588_v33 = vld [vmem:[%s3673_s1 + $0x620] ss:$8 sps:$4 sm:$0xff]  }
  0x5b   :  { %1702 = vmatpush1.bf16.msra.mxu1 %v2513_v34  ;;  %v2593_v34 = vld [vmem:[%s3673_s1 + $0x234] ss:$8 sps:$4 sm:$0xff]  }
  0x5c   :  { %1874 = vmatpush1.bf16.msra.mxu0 %v2516_v35  ;;  %1703 = vmatprep.subr.bf16.mxu1 %v2521_v38  ;;  %v2596_v35 = vld [vmem:[%s3673_s1 + $0x634] ss:$8 sps:$4 sm:$0xff]   ;;  %v2599_v38 = vld [vmem:[%s3673_s1 + $0x244] ss:$8 sps:$4 sm:$0xff]  }
  0x5d   :  { %1875 = vmatprep.subr.bf16.mxu0 %v2524_v39  ;;  %v2602_v39 = vld [vmem:[%s3673_s1 + $0x644] ss:$8 sps:$4 sm:$0xff]  }
  0x5f   :  { %1704 = vmatpush1.bf16.msra.mxu1 %v2519_v44  ;;  %v2603_v44 = vld [vmem:[%s3673_s1 + $0x250] ss:$8 sps:$4 sm:$0xff]  }
  0x60   :  { %1876 = vmatpush1.bf16.msra.mxu0 %v2522_v45  ;;  %1705 = vmatprep.subr.bf16.mxu1 %v2527_v46  ;;  %v2606_v45 = vld [vmem:[%s3673_s1 + $0x650] ss:$8 sps:$4 sm:$0xff]   ;;  %v2611_v46 = vld [vmem:[%s3673_s1 + $0x264] ss:$8 sps:$4 sm:$0xff]  }
  0x61   :  { %1877 = vmatprep.subr.bf16.mxu0 %v2530_v47  ;;  %v2614_v47 = vld [vmem:[%s3673_s1 + $0x664] ss:$8 sps:$4 sm:$0xff]  }
  0x63   :  { %1706 = vmatpush1.bf16.msra.mxu1 %v2525_v48  ;;  %v2609_v48 = vld [vmem:[%s3673_s1 + $0x260] ss:$8 sps:$4 sm:$0xff]  }
  0x64   :  { %1878 = vmatpush1.bf16.msra.mxu0 %v2528_v49  ;;  %1707 = vmatprep.subr.bf16.mxu1 %v2533_v50  ;;  %v2612_v49 = vld [vmem:[%s3673_s1 + $0x660] ss:$8 sps:$4 sm:$0xff]   ;;  %v2617_v50 = vld [vmem:[%s3673_s1 + $0x274] ss:$8 sps:$4 sm:$0xff]  }
  0x65   :  { %1879 = vmatprep.subr.bf16.mxu0 %v2536_v51  ;;  %v2620_v51 = vld [vmem:[%s3673_s1 + $0x674] ss:$8 sps:$4 sm:$0xff]  }
  0x67   :  { %1708 = vmatpush1.bf16.msra.mxu1 %v2531_v52  ;;  %v2615_v52 = vld [vmem:[%s3673_s1 + $0x270] ss:$8 sps:$4 sm:$0xff]  }
  0x68   :  { %1880 = vmatpush1.bf16.msra.mxu0 %v2534_v53  ;;  %1709 = vmatprep.subr.bf16.mxu1 %v2539_v54  ;;  %v2618_v53 = vld [vmem:[%s3673_s1 + $0x670] ss:$8 sps:$4 sm:$0xff]   ;;  %v2623_v54 = vld [vmem:[%s3673_s1 + $0x284] ss:$8 sps:$4 sm:$0xff]  }
  0x69   :  { %1881 = vmatprep.subr.bf16.mxu0 %v2542_v55  ;;  %v2626_v55 = vld [vmem:[%s3673_s1 + $0x684] ss:$8 sps:$4 sm:$0xff]  }
  0x6b   :  { %1710 = vmatpush1.bf16.msra.mxu1 %v2537_v56  ;;  %v2621_v56 = vld [vmem:[%s3673_s1 + $0x280] ss:$8 sps:$4 sm:$0xff]  }
  0x6c   :  { %1882 = vmatpush1.bf16.msra.mxu0 %v2540_v57  ;;  %1711 = vmatprep.subr.bf16.mxu1 %v2545_v58  ;;  %v2624_v57 = vld [vmem:[%s3673_s1 + $0x680] ss:$8 sps:$4 sm:$0xff]   ;;  %v2629_v58 = vld [vmem:[%s3673_s1 + $0x294] ss:$8 sps:$4 sm:$0xff]  }
  0x6d   :  { %1883 = vmatprep.subr.bf16.mxu0 %v2548_v59  ;;  %v2632_v59 = vld [vmem:[%s3673_s1 + $0x694] ss:$8 sps:$4 sm:$0xff]  }
  0x6f   :  { %1712 = vmatpush1.bf16.msra.mxu1 %v2543_v60  ;;  %v2627_v60 = vld [vmem:[%s3673_s1 + $0x290] ss:$8 sps:$4 sm:$0xff]  }
  0x70   :  { %1884 = vmatpush1.bf16.msra.mxu0 %v2546_v61  ;;  %1713 = vmatprep.subr.bf16.mxu1 %v2551_v62  ;;  %v2630_v61 = vld [vmem:[%s3673_s1 + $0x690] ss:$8 sps:$4 sm:$0xff]   ;;  %v2635_v62 = vld [vmem:[%s3673_s1 + $0x2a4] ss:$8 sps:$4 sm:$0xff]  }
  0x71   :  { %1885 = vmatprep.subr.bf16.mxu0 %v2554_v63  ;;  %v2638_v63 = vld [vmem:[%s3673_s1 + $0x6a4] ss:$8 sps:$4 sm:$0xff]  }
  0x73   :  { %1714 = vmatpush1.bf16.msra.mxu1 %v2549_v0  ;;  %v2633_v0 = vld [vmem:[%s3673_s1 + $0x2a0] ss:$8 sps:$4 sm:$0xff]  }
  0x74   :  { %1886 = vmatpush1.bf16.msra.mxu0 %v2552_v1  ;;  %1715 = vmatprep.subr.bf16.mxu1 %v2557_v2  ;;  %v2636_v1 = vld [vmem:[%s3673_s1 + $0x6a0] ss:$8 sps:$4 sm:$0xff]   ;;  %v2641_v2 = vld [vmem:[%s3673_s1 + $0x2b4] ss:$8 sps:$4 sm:$0xff]  }
  0x75   :  { %1887 = vmatprep.subr.bf16.mxu0 %v2560_v3  ;;  %v2644_v3 = vld [vmem:[%s3673_s1 + $0x6b4] ss:$8 sps:$4 sm:$0xff]  }
  0x77   :  { %1716 = vmatpush1.bf16.msra.mxu1 %v2555_v4  ;;  %v2639_v4 = vld [vmem:[%s3673_s1 + $0x2b0] ss:$8 sps:$4 sm:$0xff]  }
  0x78   :  { %1888 = vmatpush1.bf16.msra.mxu0 %v2558_v5  ;;  %1717 = vmatprep.subr.bf16.mxu1 %v2563_v6  ;;  %v2642_v5 = vld [vmem:[%s3673_s1 + $0x6b0] ss:$8 sps:$4 sm:$0xff]   ;;  %v2647_v6 = vld [vmem:[%s3673_s1 + $0x2c4] ss:$8 sps:$4 sm:$0xff]  }
  0x79   :  { %1889 = vmatprep.subr.bf16.mxu0 %v2566_v7  ;;  %v2650_v7 = vld [vmem:[%s3673_s1 + $0x6c4] ss:$8 sps:$4 sm:$0xff]  }
  0x7b   :  { %1718 = vmatpush1.bf16.msra.mxu1 %v2561_v8  ;;  %v2645_v8 = vld [vmem:[%s3673_s1 + $0x2c0] ss:$8 sps:$4 sm:$0xff]  }
  0x7c   :  { %1890 = vmatpush1.bf16.msra.mxu0 %v2564_v9  ;;  %1719 = vmatprep.subr.bf16.mxu1 %v2569_v10  ;;  %v2648_v9 = vld [vmem:[%s3673_s1 + $0x6c0] ss:$8 sps:$4 sm:$0xff]   ;;  %v2653_v10 = vld [vmem:[%s3673_s1 + $0x2d4] ss:$8 sps:$4 sm:$0xff]  }
  0x7d   :  { %1891 = vmatprep.subr.bf16.mxu0 %v2572_v11  ;;  %v2656_v11 = vld [vmem:[%s3673_s1 + $0x6d4] ss:$8 sps:$4 sm:$0xff]  }
  0x7f   :  { %1720 = vmatpush1.bf16.msra.mxu1 %v2567_v12  ;;  %v2651_v12 = vld [vmem:[%s3673_s1 + $0x2d0] ss:$8 sps:$4 sm:$0xff]  }
  0x80   :  { %1892 = vmatpush1.bf16.msra.mxu0 %v2570_v13  ;;  %1732 = vmatprep.subr.bf16.mxu1 %v2575_v14  ;;  %v2654_v13 = vld [vmem:[%s3673_s1 + $0x6d0] ss:$8 sps:$4 sm:$0xff]   ;;  %v2659_v14 = vld [vmem:[%s3673_s1 + $0x2e4] ss:$8 sps:$4 sm:$0xff]  }
  0x81   :  { %1904 = vmatprep.subr.bf16.mxu0 %v2578_v15  ;;  %v2662_v15 = vld [vmem:[%s3673_s1 + $0x6e4] ss:$8 sps:$4 sm:$0xff]  }
  0x82   :  { %1722 = vmatmul.mubr.bf16.vlgmr.msra.gmra.mrb[0].mxu1 %v2082_v16  ;;  %v2657_v16 = vld [vmem:[%s3673_s1 + $0x2e0] ss:$8 sps:$4 sm:$0xff]  }
  0x83   :  { %1894 = vmatmul.mubr.bf16.vlgmr.msra.gmra.mrb[0].mxu0 %v2090_v18  ;;  %1733 = vmatpush1.bf16.msra.mxu1 %v2573_v17  ;;  %v2660_v17 = vld [vmem:[%s3673_s1 + $0x6e0] ss:$8 sps:$4 sm:$0xff]   ;;  %v2665_v18 = vld [vmem:[%s3673_s1 + $0x2f4] ss:$8 sps:$4 sm:$0xff]  }
  0x84   :  { %1905 = vmatpush1.bf16.msra.mxu0 %v2576_v19  ;;  %1734 = vmatprep.subr.bf16.mxu1 %v2581_v20  ;;  %v2668_v19 = vld [vmem:[%s3673_s1 + $0x6f4] ss:$8 sps:$4 sm:$0xff]   ;;  %v2663_v20 = vld [vmem:[%s3673_s1 + $0x2f0] ss:$8 sps:$4 sm:$0xff]  }
  0x85   :  { %1906 = vmatprep.subr.bf16.mxu0 %v2584_v21  ;;  %1764 = vmatprep.mubr.bf16.mxu1 %v2085_v28  ;;  %v2666_v21 = vld [vmem:[%s3673_s1 + $0x6f0] ss:$8 sps:$4 sm:$0xff]   ;;  %v2092_v28 = vcombine.low %v3260_v29, %v3265_v30  ;;  %v2677_v29 = vld [vmem:[%s3673_s1 + $0x314] ss:$8 sps:$4 sm:$0xff]  }
  0x86   :  { %1936 = vmatprep.mubr.bf16.mxu0 %v2093_v31  ;;  %v3449_v31 = vld [vmem:[%s3674_s0 + $0x58] sm:$0xff] }
  0x87   :  { %1735 = vmatpush1.bf16.msra.mxu1 %v2579_v22  ;;  %v2671_v22 = vld [vmem:[%s3673_s1 + $0x304] ss:$8 sps:$4 sm:$0xff]   ;;  %v2680_v30 = vld [vmem:[%s3673_s1 + $0x714] ss:$8 sps:$4 sm:$0xff]  }
  0x88   :  { %1907 = vmatpush1.bf16.msra.mxu0 %v2582_v23  ;;  %1736 = vmatprep.subr.bf16.mxu1 %v2587_v26  ;;  %v2674_v23 = vld [vmem:[%s3673_s1 + $0x704] ss:$8 sps:$4 sm:$0xff]   ;;  %v3440_v26 = vld [vmem:[%s3674_s0 + $0x18] sm:$0xff] }
  0x89   :  { %1908 = vmatprep.subr.bf16.mxu0 %v2590_v27  ;;  %v2084_v27 = vcombine.low %v3242_v24, %v3247_v25  ;;  %v2669_v24 = vld [vmem:[%s3673_s1 + $0x300] ss:$8 sps:$4 sm:$0xff]  }
  0x8a   :  { %v2672_v25 = vld [vmem:[%s3673_s1 + $0x700] ss:$8 sps:$4 sm:$0xff]  }
  0x8b   :  { %1737 = vmatpush1.bf16.msra.mxu1 %v2585_v32  ;;  %v3454_v32 = vld [vmem:[%s3674_s0 + $0x38] sm:$0xff] }
  0x8c   :  { %1909 = vmatpush1.bf16.msra.mxu0 %v2588_v33  ;;  %1738 = vmatprep.subr.bf16.mxu1 %v2593_v34  ;;  %v3459_v33 = vld [vmem:[%s3674_s0 + $0x78] sm:$0xff]  ;;  %v2087_v34 = vcombine.high %v3440_v26, %v3449_v31 }
  0x8d   :  { %1910 = vmatprep.subr.bf16.mxu0 %v2596_v35  ;;  %v2095_v35 = vcombine.high %v3454_v32, %v3459_v33 }
  0x8f   :  { %1739 = vmatpush1.bf16.msra.mxu1 %v2591_v36  ;;  %v2675_v36 = vld [vmem:[%s3673_s1 + $0x310] ss:$8 sps:$4 sm:$0xff]  }
  0x90   :  { %1911 = vmatpush1.bf16.msra.mxu0 %v2594_v37  ;;  %1740 = vmatprep.subr.bf16.mxu1 %v2599_v38  ;;  %v2678_v37 = vld [vmem:[%s3673_s1 + $0x710] ss:$8 sps:$4 sm:$0xff]   ;;  %v2683_v38 = vld [vmem:[%s3673_s1 + $0x324] ss:$8 sps:$4 sm:$0xff]  }
  0x91   :  { %1912 = vmatprep.subr.bf16.mxu0 %v2602_v39  ;;  %v2686_v39 = vld [vmem:[%s3673_s1 + $0x724] ss:$8 sps:$4 sm:$0xff]  }
  0x93   :  { %1741 = vmatpush1.bf16.msra.mxu1 %v2597_v40  ;;  %v2681_v40 = vld [vmem:[%s3673_s1 + $0x320] ss:$8 sps:$4 sm:$0xff]  }
  0x94   :  { %1913 = vmatpush1.bf16.msra.mxu0 %v2600_v41  ;;  %1742 = vmatprep.subr.bf16.mxu1 %v2605_v42  ;;  %v2684_v41 = vld [vmem:[%s3673_s1 + $0x720] ss:$8 sps:$4 sm:$0xff]   ;;  %v2689_v42 = vld [vmem:[%s3673_s1 + $0x334] ss:$8 sps:$4 sm:$0xff]  }
  0x95   :  { %1914 = vmatprep.subr.bf16.mxu0 %v2608_v43  ;;  %v2692_v43 = vld [vmem:[%s3673_s1 + $0x734] ss:$8 sps:$4 sm:$0xff]  }
  0x97   :  { %1743 = vmatpush1.bf16.msra.mxu1 %v2603_v44  ;;  %v2687_v44 = vld [vmem:[%s3673_s1 + $0x330] ss:$8 sps:$4 sm:$0xff]  }
  0x98   :  { %1915 = vmatpush1.bf16.msra.mxu0 %v2606_v45  ;;  %1744 = vmatprep.subr.bf16.mxu1 %v2611_v46  ;;  %v2690_v45 = vld [vmem:[%s3673_s1 + $0x730] ss:$8 sps:$4 sm:$0xff]   ;;  %v2695_v46 = vld [vmem:[%s3673_s1 + $0x344] ss:$8 sps:$4 sm:$0xff]  }
  0x99   :  { %1916 = vmatprep.subr.bf16.mxu0 %v2614_v47  ;;  %v2698_v47 = vld [vmem:[%s3673_s1 + $0x744] ss:$8 sps:$4 sm:$0xff]  }
  0x9b   :  { %1745 = vmatpush1.bf16.msra.mxu1 %v2609_v48  ;;  %v2693_v48 = vld [vmem:[%s3673_s1 + $0x340] ss:$8 sps:$4 sm:$0xff]  }
  0x9c   :  { %1917 = vmatpush1.bf16.msra.mxu0 %v2612_v49  ;;  %1746 = vmatprep.subr.bf16.mxu1 %v2617_v50  ;;  %v2696_v49 = vld [vmem:[%s3673_s1 + $0x740] ss:$8 sps:$4 sm:$0xff]   ;;  %v2701_v50 = vld [vmem:[%s3673_s1 + $0x354] ss:$8 sps:$4 sm:$0xff]  }
  0x9d   :  { %1918 = vmatprep.subr.bf16.mxu0 %v2620_v51  ;;  %v2704_v51 = vld [vmem:[%s3673_s1 + $0x754] ss:$8 sps:$4 sm:$0xff]  }
  0x9f   :  { %1747 = vmatpush1.bf16.msra.mxu1 %v2615_v52  ;;  %v2699_v52 = vld [vmem:[%s3673_s1 + $0x350] ss:$8 sps:$4 sm:$0xff]  }
  0xa0   :  { %1919 = vmatpush1.bf16.msra.mxu0 %v2618_v53  ;;  %1748 = vmatprep.subr.bf16.mxu1 %v2623_v54  ;;  %v2702_v53 = vld [vmem:[%s3673_s1 + $0x750] ss:$8 sps:$4 sm:$0xff]   ;;  %v2707_v54 = vld [vmem:[%s3673_s1 + $0x364] ss:$8 sps:$4 sm:$0xff]  }
  0xa1   :  { %1920 = vmatprep.subr.bf16.mxu0 %v2626_v55  ;;  %v2710_v55 = vld [vmem:[%s3673_s1 + $0x764] ss:$8 sps:$4 sm:$0xff]  }
  0xa3   :  { %1749 = vmatpush1.bf16.msra.mxu1 %v2621_v56  ;;  %v2705_v56 = vld [vmem:[%s3673_s1 + $0x360] ss:$8 sps:$4 sm:$0xff]  }
  0xa4   :  { %1921 = vmatpush1.bf16.msra.mxu0 %v2624_v57  ;;  %1750 = vmatprep.subr.bf16.mxu1 %v2629_v58  ;;  %v2708_v57 = vld [vmem:[%s3673_s1 + $0x760] ss:$8 sps:$4 sm:$0xff]   ;;  %v2713_v58 = vld [vmem:[%s3673_s1 + $0x374] ss:$8 sps:$4 sm:$0xff]  }
  0xa5   :  { %1922 = vmatprep.subr.bf16.mxu0 %v2632_v59  ;;  %v2716_v59 = vld [vmem:[%s3673_s1 + $0x774] ss:$8 sps:$4 sm:$0xff]  }
  0xa7   :  { %1751 = vmatpush1.bf16.msra.mxu1 %v2627_v60  ;;  %v2711_v60 = vld [vmem:[%s3673_s1 + $0x370] ss:$8 sps:$4 sm:$0xff]  }
  0xa8   :  { %1923 = vmatpush1.bf16.msra.mxu0 %v2630_v61  ;;  %1752 = vmatprep.subr.bf16.mxu1 %v2635_v62  ;;  %v2714_v61 = vld [vmem:[%s3673_s1 + $0x770] ss:$8 sps:$4 sm:$0xff]   ;;  %v2719_v62 = vld [vmem:[%s3673_s1 + $0x384] ss:$8 sps:$4 sm:$0xff]  }
  0xa9   :  { %1924 = vmatprep.subr.bf16.mxu0 %v2638_v63  ;;  %v2722_v63 = vld [vmem:[%s3673_s1 + $0x784] ss:$8 sps:$4 sm:$0xff]  }
  0xab   :  { %1753 = vmatpush1.bf16.msra.mxu1 %v2633_v0  ;;  %v2717_v0 = vld [vmem:[%s3673_s1 + $0x380] ss:$8 sps:$4 sm:$0xff]  }
  0xac   :  { %1925 = vmatpush1.bf16.msra.mxu0 %v2636_v1  ;;  %1754 = vmatprep.subr.bf16.mxu1 %v2641_v2  ;;  %v2720_v1 = vld [vmem:[%s3673_s1 + $0x780] ss:$8 sps:$4 sm:$0xff]   ;;  %v2725_v2 = vld [vmem:[%s3673_s1 + $0x394] ss:$8 sps:$4 sm:$0xff]  }
  0xad   :  { %1926 = vmatprep.subr.bf16.mxu0 %v2644_v3  ;;  %v2728_v3 = vld [vmem:[%s3673_s1 + $0x794] ss:$8 sps:$4 sm:$0xff]  }
  0xaf   :  { %1755 = vmatpush1.bf16.msra.mxu1 %v2639_v4  ;;  %v2723_v4 = vld [vmem:[%s3673_s1 + $0x390] ss:$8 sps:$4 sm:$0xff]  }
  0xb0   :  { %1927 = vmatpush1.bf16.msra.mxu0 %v2642_v5  ;;  %1756 = vmatprep.subr.bf16.mxu1 %v2647_v6  ;;  %v2726_v5 = vld [vmem:[%s3673_s1 + $0x790] ss:$8 sps:$4 sm:$0xff]   ;;  %v2731_v6 = vld [vmem:[%s3673_s1 + $0x3a4] ss:$8 sps:$4 sm:$0xff]  }
  0xb1   :  { %1928 = vmatprep.subr.bf16.mxu0 %v2650_v7  ;;  %v2734_v7 = vld [vmem:[%s3673_s1 + $0x7a4] ss:$8 sps:$4 sm:$0xff]  }
  0xb3   :  { %1757 = vmatpush1.bf16.msra.mxu1 %v2645_v8  ;;  %v2729_v8 = vld [vmem:[%s3673_s1 + $0x3a0] ss:$8 sps:$4 sm:$0xff]  }
  0xb4   :  { %1929 = vmatpush1.bf16.msra.mxu0 %v2648_v9  ;;  %1758 = vmatprep.subr.bf16.mxu1 %v2653_v10  ;;  %v2732_v9 = vld [vmem:[%s3673_s1 + $0x7a0] ss:$8 sps:$4 sm:$0xff]   ;;  %v2737_v10 = vld [vmem:[%s3673_s1 + $0x3b4] ss:$8 sps:$4 sm:$0xff]  }
  0xb5   :  { %1930 = vmatprep.subr.bf16.mxu0 %v2656_v11  ;;  %v2740_v11 = vld [vmem:[%s3673_s1 + $0x7b4] ss:$8 sps:$4 sm:$0xff]  }
  0xb7   :  { %1759 = vmatpush1.bf16.msra.mxu1 %v2651_v12  ;;  %v2735_v12 = vld [vmem:[%s3673_s1 + $0x3b0] ss:$8 sps:$4 sm:$0xff]  }
  0xb8   :  { %1931 = vmatpush1.bf16.msra.mxu0 %v2654_v13  ;;  %1760 = vmatprep.subr.bf16.mxu1 %v2659_v14  ;;  %v2738_v13 = vld [vmem:[%s3673_s1 + $0x7b0] ss:$8 sps:$4 sm:$0xff]   ;;  %v2743_v14 = vld [vmem:[%s3673_s1 + $0x3c4] ss:$8 sps:$4 sm:$0xff]  }
  0xb9   :  { %1932 = vmatprep.subr.bf16.mxu0 %v2662_v15  ;;  %v2746_v15 = vld [vmem:[%s3673_s1 + $0x7c4] ss:$8 sps:$4 sm:$0xff]  }
  0xbb   :  { %1761 = vmatpush1.bf16.msra.mxu1 %v2657_v16  ;;  %v2741_v16 = vld [vmem:[%s3673_s1 + $0x3c0] ss:$8 sps:$4 sm:$0xff]  }
  0xbc   :  { %1933 = vmatpush1.bf16.msra.mxu0 %v2660_v17  ;;  %1762 = vmatprep.subr.bf16.mxu1 %v2665_v18  ;;  %v2744_v17 = vld [vmem:[%s3673_s1 + $0x7c0] ss:$8 sps:$4 sm:$0xff]   ;;  %v2749_v18 = vld [vmem:[%s3673_s1 + $0x3d4] ss:$8 sps:$4 sm:$0xff]  }
  0xbd   :  { %1934 = vmatprep.subr.bf16.mxu0 %v2668_v19  ;;  %v2752_v19 = vld [vmem:[%s3673_s1 + $0x7d4] ss:$8 sps:$4 sm:$0xff]  }
  0xbf   :  { %1763 = vmatpush1.bf16.msra.mxu1 %v2663_v20  ;;  %v2747_v20 = vld [vmem:[%s3673_s1 + $0x3d0] ss:$8 sps:$4 sm:$0xff]  }
  0xc0   :  { %1935 = vmatpush1.bf16.msra.mxu0 %v2666_v21  ;;  %1775 = vmatprep.subr.bf16.mxu1 %v2671_v22  ;;  %v2750_v21 = vld [vmem:[%s3673_s1 + $0x7d0] ss:$8 sps:$4 sm:$0xff]   ;;  %v2755_v22 = vld [vmem:[%s3673_s1 + $0x3e4] ss:$8 sps:$4 sm:$0xff]  }
  0xc1   :  { %1947 = vmatprep.subr.bf16.mxu0 %v2674_v23  ;;  %v2758_v23 = vld [vmem:[%s3673_s1 + $0x7e4] ss:$8 sps:$4 sm:$0xff]  }
  0xc2   :  { %1765 = vmatmul.mubr.bf16.vlgmr.msra.gmra.mrb[0].mxu1 %v2084_v27  ;;  %v2753_v27 = vld [vmem:[%s3673_s1 + $0x3e0] ss:$8 sps:$4 sm:$0xff]  }
  0xc3   :  { %1937 = vmatmul.mubr.bf16.vlgmr.msra.gmra.mrb[0].mxu0 %v2092_v28  ;;  %1776 = vmatpush1.bf16.msra.mxu1 %v2669_v24  ;;  %v2756_v28 = vld [vmem:[%s3673_s1 + $0x7e0] ss:$8 sps:$4 sm:$0xff]   ;;  %v2761_v24 = vld [vmem:[%s3673_s1 + $0x3f4] ss:$8 sps:$4 sm:$0xff]  }
  0xc4   :  { %1948 = vmatpush1.bf16.msra.mxu0 %v2672_v25  ;;  %1777 = vmatprep.subr.bf16.mxu1 %v2677_v29  ;;  %v2764_v25 = vld [vmem:[%s3673_s1 + $0x7f4] ss:$8 sps:$4 sm:$0xff]   ;;  %v2759_v29 = vld [vmem:[%s3673_s1 + $0x3f0] ss:$8 sps:$4 sm:$0xff]  }
  0xc5   :  { %1949 = vmatprep.subr.bf16.mxu0 %v2680_v30  ;;  %1807 = vmatprep.mubr.bf16.mxu1 %v2087_v34  ;;  %v2762_v30 = vld [vmem:[%s3673_s1 + $0x7f0] ss:$8 sps:$4 sm:$0xff]   ;;  %v2086_v34 = vcombine.low %v3440_v26, %v3449_v31 }
  0xc6   :  { %1979 = vmatprep.mubr.bf16.mxu0 %v2095_v35  ;;  %v2094_v35 = vcombine.low %v3454_v32, %v3459_v33 }
  0xc7   :  { %1778 = vmatpush1.bf16.msra.mxu1 %v2675_v36 }
  0xc8   :  { %1950 = vmatpush1.bf16.msra.mxu0 %v2678_v37  ;;  %1779 = vmatprep.subr.bf16.mxu1 %v2683_v38 }
  0xc9   :  { %1951 = vmatprep.subr.bf16.mxu0 %v2686_v39 }
  0xcb   :  { %1780 = vmatpush1.bf16.msra.mxu1 %v2681_v40 }
  0xcc   :  { %1952 = vmatpush1.bf16.msra.mxu0 %v2684_v41  ;;  %1781 = vmatprep.subr.bf16.mxu1 %v2689_v42 }
  0xcd   :  { %1953 = vmatprep.subr.bf16.mxu0 %v2692_v43 }
  0xcf   :  { %1782 = vmatpush1.bf16.msra.mxu1 %v2687_v44 }
  0xd0   :  { %1954 = vmatpush1.bf16.msra.mxu0 %v2690_v45  ;;  %1783 = vmatprep.subr.bf16.mxu1 %v2695_v46 }
  0xd1   :  { %1955 = vmatprep.subr.bf16.mxu0 %v2698_v47 }
  0xd3   :  { %1784 = vmatpush1.bf16.msra.mxu1 %v2693_v48 }
  0xd4   :  { %1956 = vmatpush1.bf16.msra.mxu0 %v2696_v49  ;;  %1785 = vmatprep.subr.bf16.mxu1 %v2701_v50 }
  0xd5   :  { %1957 = vmatprep.subr.bf16.mxu0 %v2704_v51 }
  0xd7   :  { %1786 = vmatpush1.bf16.msra.mxu1 %v2699_v52 }
  0xd8   :  { %1958 = vmatpush1.bf16.msra.mxu0 %v2702_v53  ;;  %1787 = vmatprep.subr.bf16.mxu1 %v2707_v54 }
  0xd9   :  { %1959 = vmatprep.subr.bf16.mxu0 %v2710_v55 }
  0xdb   :  { %1788 = vmatpush1.bf16.msra.mxu1 %v2705_v56 }
  0xdc   :  { %1960 = vmatpush1.bf16.msra.mxu0 %v2708_v57  ;;  %1789 = vmatprep.subr.bf16.mxu1 %v2713_v58  ;;  %v2765_v57 = vmov 1966171168  }
  0xdd   :  { %1961 = vmatprep.subr.bf16.mxu0 %v2716_v59  ;;  %v2012_v58 = vunpack.c.l.s4 %v2765_v57  ;;  %v2014_v59 = vlaneseq }
  0xdf   :  { %1790 = vmatpush1.bf16.msra.mxu1 %v2711_v60  ;;  %vm2028_vm0 = vcmp.lt.s32.totalorder %v2014_v59, 256 }
  0xe0   :  { %1962 = vmatpush1.bf16.msra.mxu0 %v2714_v61  ;;  %1791 = vmatprep.subr.bf16.mxu1 %v2719_v62 }
  0xe1   :  { %1963 = vmatprep.subr.bf16.mxu0 %v2722_v63 }
  0xe3   :  { %1792 = vmatpush1.bf16.msra.mxu1 %v2717_v0 }
  0xe4   :  { %1964 = vmatpush1.bf16.msra.mxu0 %v2720_v1  ;;  %1793 = vmatprep.subr.bf16.mxu1 %v2725_v2 }
  0xe5   :  { %1965 = vmatprep.subr.bf16.mxu0 %v2728_v3 }
  0xe7   :  { %1794 = vmatpush1.bf16.msra.mxu1 %v2723_v4  ;;  %v2013_v4 = vunpack.c.0.s8 %v2012_v58 }
  0xe8   :  { %1966 = vmatpush1.bf16.msra.mxu0 %v2726_v5  ;;  %1795 = vmatprep.subr.bf16.mxu1 %v2731_v6  ;;  %v2015_v5 = vshrl.u32 %v2014_v59, 7 }
  0xe9   :  { %1967 = vmatprep.subr.bf16.mxu0 %v2734_v7 }
  0xeb   :  { %1796 = vmatpush1.bf16.msra.mxu1 %v2729_v8 }
  0xec   :  { %1968 = vmatpush1.bf16.msra.mxu0 %v2732_v9  ;;  %1797 = vmatprep.subr.bf16.mxu1 %v2737_v10 }
  0xed   :  { %1969 = vmatprep.subr.bf16.mxu0 %v2740_v11 }
  0xef   :  { %1798 = vmatpush1.bf16.msra.mxu1 %v2735_v12 }
  0xf0   :  { %1970 = vmatpush1.bf16.msra.mxu0 %v2738_v13  ;;  %1799 = vmatprep.subr.bf16.mxu1 %v2743_v14  ;;  %v2016_v14 = vsub.s32 %v2013_v4, %v2015_v5 }
  0xf1   :  { %1971 = vmatprep.subr.bf16.mxu0 %v2746_v15 }
  0xf3   :  { %1800 = vmatpush1.bf16.msra.mxu1 %v2741_v16 }
  0xf4   :  { %1972 = vmatpush1.bf16.msra.mxu0 %v2744_v17  ;;  %1801 = vmatprep.subr.bf16.mxu1 %v2749_v18 }
  0xf5   :  { %1973 = vmatprep.subr.bf16.mxu0 %v2752_v19 }
  0xf7   :  { %1802 = vmatpush1.bf16.msra.mxu1 %v2747_v20 }
  0xf8   :  { %1974 = vmatpush1.bf16.msra.mxu0 %v2750_v21  ;;  %1803 = vmatprep.subr.bf16.mxu1 %v2755_v22 }
  0xf9   :  { %1975 = vmatprep.subr.bf16.mxu0 %v2758_v23 }
  0xfb   :  { %1804 = vmatpush1.bf16.msra.mxu1 %v2753_v27 }
  0xfc   :  { %1976 = vmatpush1.bf16.msra.mxu0 %v2756_v28  ;;  %1805 = vmatprep.subr.bf16.mxu1 %v2761_v24 }
  0xfd   :  { %1977 = vmatprep.subr.bf16.mxu0 %v2764_v25 }
  0xff   :  { %1806 = vmatpush1.bf16.msra.mxu1 %v2759_v29 }
 0x100   :  { %1978 = vmatpush1.bf16.msra.mxu0 %v2762_v30 }
 0x102   :  { %1808 = vmatmul.mubr.bf16.vlgmr.msra.gmra.mrb[0].mxu1 %v2086_v34 }
 0x103   :  { %1980 = vmatmul.mubr.bf16.vlgmr.msra.gmra.mrb[0].mxu0 %v2094_v35 }
 0x1d5   :  { %v1809_v36 = vpop.f32.mrb[0].mxu1 }
 0x1d6   :  { %v1981_v37 = vpop.f32.mrb[0].mxu0  ;;  %v1811_v39 = vpop.f32.mrb[1].mxu1 }
 0x1d7   :  { %v2352_v38 = vadd.f32 %v1981_v37, %v1809_v36  ;;  %v1983_v40 = vpop.f32.mrb[1].mxu0  ;;  %v1813_v42 = vpop.f32.mrb[2].mxu1 }
 0x1d8   :  { %v2353_v41 = vadd.f32 %v1983_v40, %v1811_v39  ;;  %v1985_v43 = vpop.f32.mrb[2].mxu0  ;;  %v1815_v31 = vpop.f32.mrb[3].mxu1 }
 0x1d9   :  { %1990 = vst [vmem:[%s3675_s2] sm:$0xff] %v2352_v38  ;;  %v2354_v26 = vadd.f32 %v1985_v43, %v1813_v42  ;;  %v1987_v44 = vpop.f32.mrb[3].mxu0  ;;  %v2031_v33 = vmul.f32 %v2352_v38, %v2352_v38 }
 0x1da   :  { %1991 = vst [vmem:[%s3675_s2 + $0x8] sm:$0xff] %v2353_v41  ;;  %v2355_v32 = vadd.f32 %v1987_v44, %v1815_v31  ;;  %v2032_v47 = vmul.f32 %v2353_v41, %v2353_v41 }
 0x1db   :  { %1992 = vst [vmem:[%s3675_s2 + $0x10] sm:$0xff] %v2354_v26  ;;  %v1994_v45 = vadd.f32 %v2354_v26, %v2352_v38  ;;  %v2033_v46 = vmul.f32 %v2354_v26, %v2354_v26 }
 0x1dc   :  { %1993 = vst [vmem:[%s3675_s2 + $0x18] sm:$0xff] %v2355_v32  ;;  %v2001_v48 = vadd.f32 %v2355_v32, %v2353_v41  ;;  %v2034_v49 = vmul.f32 %v2355_v32, %v2355_v32 }
 0x1dd   :  { %v1995_v50 = vrot.slane %v1994_v45, 4  ;;  %v2035_v51 = vadd.f32 %v2033_v46, %v2031_v33 }
 0x1de   :  { %v2002_v52 = vrot.slane %v2001_v48, 4  ;;  %v2042_v53 = vadd.f32 %v2034_v49, %v2032_v47 }
 0x1df   :  { %v1996_v54 = vadd.f32 %v1995_v50, %v1994_v45  ;;  %v2036_v55 = vrot.slane %v2035_v51, 4 }
 0x1e0   :  { %v2003_v56 = vadd.f32 %v2002_v52, %v2001_v48  ;;  %v2043_v60 = vrot.slane %v2042_v53, 4 }
 0x1e1   :  { %v1997_v61 = vrot.slane %v1996_v54, 2  ;;  %v2037_v62 = vadd.f32 %v2036_v55, %v2035_v51 }
 0x1e2   :  { %v2004_v63 = vrot.slane %v2003_v56, 2  ;;  %v2044_v0 = vadd.f32 %v2043_v60, %v2042_v53 }
 0x1e3   :  { %v1998_v1 = vadd.f32 %v1997_v61, %v1996_v54  ;;  %v2038_v2 = vrot.slane %v2037_v62, 2 }
 0x1e4   :  { %v2005_v3 = vadd.f32 %v2004_v63, %v2003_v56  ;;  %v2045_v6 = vrot.slane %v2044_v0, 2 }
 0x1e5   :  { %v1999_v7 = vrot.slane %v1998_v1, 1  ;;  %v2039_v8 = vadd.f32 %v2038_v2, %v2037_v62 }
 0x1e6   :  { %v2006_v9 = vrot.slane %v2005_v3, 1  ;;  %v2046_v10 = vadd.f32 %v2045_v6, %v2044_v0 }
 0x1e7   :  { %v2000_v11 = vadd.f32 %v1999_v7, %v1998_v1  ;;  %v2040_v12 = vrot.slane %v2039_v8, 1 }
 0x1e8   :  { %v2007_v13 = vadd.f32 %v2006_v9, %v2005_v3  ;;  %v2047_v15 = vrot.slane %v2046_v10, 1 }
 0x1e9   :  { %v2041_v16 = vadd.f32 %v2040_v12, %v2039_v8 }
 0x1ea   :  { %v2010_v17 = vcombine.low %v2000_v11, %v2007_v13  ;;  %v2048_v18 = vadd.f32 %v2047_v15, %v2046_v10 }
 0x1ec   :  { %v2017_v19 = vrot.slane %v2010_v17, %v2016_v14  ;;  %v2051_v20 = vcombine.low %v2041_v16, %v2048_v18 }
 0x1ee   :  { %v2024_v21 = vrot.slane %v2017_v19, %v2016_v14  ;;  %v2058_v22 = vrot.slane %v2051_v20, %v2016_v14 }
 0x1f0   :  { %2030 = vst.msk [vmem:[%s3676_s3] sm:$0x3] %vm2028_vm0, %v2024_v21  ;;  %v2065_v23 = vrot.slane %v2058_v22, %v2016_v14 }
 0x1f2   :  { %2067 = vst.msk [vmem:[%s3677_s4] sm:$0x3] %vm2028_vm0, %v2065_v23 }

// kernel: encoder_cnn_forward.15
= control target key start
LH: loop header
LB: loop body
LE: loop exit
PB: predicated region body
PF: predicated region fallthrough
CT: control target
= control target key end

     0   :  { %s82_s0 = inlined_call_operand.vmem [shape: f32[16,128], index: 0, kind: input, shape index: {}]   ;;  %s83_s1 = inlined_call_operand.vmem [shape: f32[1,128], index: 1, kind: input, shape index: {}]   ;;  %s84_s2 = inlined_call_operand.vmem [shape: f32[1,128], index: 2, kind: input, shape index: {}]   ;;  %s85_s3 = inlined_call_operand.vmem [shape: f32[16,128], index: 3, kind: output, shape index: {}]  }
   0x1   :  { %v14_v0 = vld [vmem:[%s82_s0] sm:$0xff]  ;;  %v15_v4 = vld [vmem:[%s82_s0 + $0x8] sm:$0xff] }
   0x2   :  { %v42_v1 = vld [vmem:[%s83_s1] ss:$0 sm:$0xff] }
   0x3   :  { %v43_v2 = vld [vmem:[%s84_s2] ss:$0 sm:$0xff]  ;;  %v23_v3 = vmul.f32 %v42_v1, %v14_v0  ;;  %v24_v5 = vmul.f32 %v42_v1, %v15_v4 }
   0x5   :  { %v32_v6 = vadd.f32 %v43_v2, %v23_v3  ;;  %v33_v7 = vadd.f32 %v43_v2, %v24_v5 }
   0x7   :  { %v34_v8 = vmax.f32 %v32_v6, 0.0  ;;  %v35_v9 = vmax.f32 %v33_v7, 0.0 }
   0x9   :  { %36 = vst [vmem:[%s85_s3] sm:$0xff] %v34_v8  ;;  %37 = vst [vmem:[%s85_s3 + $0x8] sm:$0xff] %v35_v9 }

// kernel: encoder_cnn_forward.14
= control target key start
LH: loop header
LB: loop body
LE: loop exit
PB: predicated region body
PF: predicated region fallthrough
CT: control target
= control target key end

     0   :  { %s4740_s1 = inlined_call_operand.vmem [shape: bf16[4096,128], index: 1, kind: input, shape index: {}]   ;;  %s4741_s0 = inlined_call_operand.vmem [shape: bf16[16,4096], index: 0, kind: input, shape index: {}]   ;;  %s4742_s2 = inlined_call_operand.vmem [shape: f32[16,128], index: 2, kind: output, shape index: {0}]   ;;  %s4743_s3 = inlined_call_operand.vmem [shape: f32[1,1,128], index: 3, kind: output, shape index: {1}]   ;;  %s4744_s4 = inlined_call_operand.vmem [shape: f32[1,1,128], index: 4, kind: output, shape index: {2}]  }
   0x1   :  { %v3583_v0 = vld [vmem:[%s4740_s1 + $0x40] sm:$0xff]   ;;  %v3587_v4 = vld [vmem:[%s4740_s1 + $0x48] sm:$0xff]   ;;  %v3591_v8 = vld [vmem:[%s4740_s1 + $0x50] sm:$0xff]  }
   0x2   :  { %v3584_v1 = vld [vmem:[%s4740_s1 + $0xc0] sm:$0xff]   ;;  %3231 = vmatprep.subr.bf16.mxu0 %v3583_v0  ;;  %v3588_v5 = vld [vmem:[%s4740_s1 + $0xc8] sm:$0xff]   ;;  %v3592_v9 = vld [vmem:[%s4740_s1 + $0xd0] sm:$0xff]  }
   0x3   :  { %v3585_v2 = vld [vmem:[%s4740_s1] sm:$0xff]   ;;  %3253 = vmatprep.subr.bf16.mxu1 %v3584_v1  ;;  %v3589_v6 = vld [vmem:[%s4740_s1 + $0x8] sm:$0xff]   ;;  %v3593_v10 = vld [vmem:[%s4740_s1 + $0x10] sm:$0xff]  }
   0x4   :  { %v3586_v3 = vld [vmem:[%s4740_s1 + $0x80] sm:$0xff]   ;;  %3232 = vmatpush3.bf16.msra.mxu0 %v3585_v2  ;;  %v3590_v7 = vld [vmem:[%s4740_s1 + $0x88] sm:$0xff]   ;;  %v3594_v11 = vld [vmem:[%s4740_s1 + $0x90] sm:$0xff]  }
   0x5   :  { %3254 = vmatpush3.bf16.msra.mxu1 %v3586_v3  ;;  %3233 = vmatprep.subr.bf16.mxu0 %v3587_v4  ;;  %v3595_v12 = vld [vmem:[%s4740_s1 + $0x58] sm:$0xff]   ;;  %v3599_v16 = vld [vmem:[%s4740_s1 + $0x60] sm:$0xff]   ;;  %v3603_v20 = vld [vmem:[%s4740_s1 + $0x68] sm:$0xff]  }
   0x6   :  { %3255 = vmatprep.subr.bf16.mxu1 %v3588_v5  ;;  %v3596_v13 = vld [vmem:[%s4740_s1 + $0xd8] sm:$0xff]   ;;  %v3600_v17 = vld [vmem:[%s4740_s1 + $0xe0] sm:$0xff]   ;;  %v3604_v21 = vld [vmem:[%s4740_s1 + $0xe8] sm:$0xff]  }
   0x7   :  { %v3597_v14 = vld [vmem:[%s4740_s1 + $0x18] sm:$0xff]   ;;  %v3601_v18 = vld [vmem:[%s4740_s1 + $0x20] sm:$0xff]   ;;  %v3605_v22 = vld [vmem:[%s4740_s1 + $0x28] sm:$0xff]  }
   0x8   :  { %3234 = vmatpush3.bf16.msra.mxu0 %v3589_v6  ;;  %v3598_v15 = vld [vmem:[%s4740_s1 + $0x98] sm:$0xff]   ;;  %v3602_v19 = vld [vmem:[%s4740_s1 + $0xa0] sm:$0xff]   ;;  %v3606_v23 = vld [vmem:[%s4740_s1 + $0xa8] sm:$0xff]  }
   0x9   :  { %3256 = vmatpush3.bf16.msra.mxu1 %v3590_v7  ;;  %3235 = vmatprep.subr.bf16.mxu0 %v3591_v8  ;;  %v3607_v24 = vld [vmem:[%s4740_s1 + $0x70] sm:$0xff]   ;;  %v3611_v28 = vld [vmem:[%s4740_s1 + $0x78] sm:$0xff]   ;;  %v15_v32 = vld [vmem:[%s4741_s0] sm:$0xff] }
   0xa   :  { %3257 = vmatprep.subr.bf16.mxu1 %v3592_v9  ;;  %v3608_v25 = vld [vmem:[%s4740_s1 + $0xf0] sm:$0xff]   ;;  %v3612_v29 = vld [vmem:[%s4740_s1 + $0xf8] sm:$0xff]   ;;  %v31_v33 = vld [vmem:[%s4741_s0 + $0x80] sm:$0xff] }
   0xb   :  { %v3609_v26 = vld [vmem:[%s4740_s1 + $0x30] sm:$0xff]   ;;  %v3613_v30 = vld [vmem:[%s4740_s1 + $0x38] sm:$0xff]   ;;  %v16_v34 = vld [vmem:[%s4741_s0 + $0x8] sm:$0xff]  ;;  %v2943_v35 = vcombine.low %v15_v32, %v31_v33  ;;  %v2944_v36 = vcombine.high %v15_v32, %v31_v33 }
   0xc   :  { %3236 = vmatpush3.bf16.msra.mxu0 %v3593_v10  ;;  %v3610_v27 = vld [vmem:[%s4740_s1 + $0xb0] sm:$0xff]   ;;  %v3614_v31 = vld [vmem:[%s4740_s1 + $0xb8] sm:$0xff]   ;;  %v32_v37 = vld [vmem:[%s4741_s0 + $0x88] sm:$0xff] }
   0xd   :  { %3258 = vmatpush3.bf16.msra.mxu1 %v3594_v11  ;;  %3237 = vmatprep.subr.bf16.mxu0 %v3595_v12  ;;  %v2945_v38 = vcombine.low %v16_v34, %v32_v37  ;;  %v2946_v39 = vcombine.high %v16_v34, %v32_v37  ;;  %v3615_v40 = vld [vmem:[%s4740_s1 + $0x140] sm:$0xff]   ;;  %v3619_v44 = vld [vmem:[%s4740_s1 + $0x148] sm:$0xff]   ;;  %v3623_v48 = vld [vmem:[%s4740_s1 + $0x150] sm:$0xff]  }
   0xe   :  { %3259 = vmatprep.subr.bf16.mxu1 %v3596_v13  ;;  %2287 = vmatprep.mubr.bf16.mxu0 %v2944_v36  ;;  %v3616_v41 = vld [vmem:[%s4740_s1 + $0x1c0] sm:$0xff]   ;;  %v3620_v45 = vld [vmem:[%s4740_s1 + $0x1c8] sm:$0xff]   ;;  %v3624_v49 = vld [vmem:[%s4740_s1 + $0x1d0] sm:$0xff]  }
   0xf   :  { %2328 = vmatprep.mubr.bf16.mxu1 %v2946_v39  ;;  %v3617_v42 = vld [vmem:[%s4740_s1 + $0x100] sm:$0xff]   ;;  %v3621_v46 = vld [vmem:[%s4740_s1 + $0x108] sm:$0xff]   ;;  %v3625_v50 = vld [vmem:[%s4740_s1 + $0x110] sm:$0xff]  }
  0x10   :  { %3238 = vmatpush3.bf16.msra.mxu0 %v3597_v14  ;;  %v3618_v43 = vld [vmem:[%s4740_s1 + $0x180] sm:$0xff]   ;;  %v3622_v47 = vld [vmem:[%s4740_s1 + $0x188] sm:$0xff]   ;;  %v3626_v51 = vld [vmem:[%s4740_s1 + $0x190] sm:$0xff]  }
  0x11   :  { %3260 = vmatpush3.bf16.msra.mxu1 %v3598_v15  ;;  %3239 = vmatprep.subr.bf16.mxu0 %v3599_v16  ;;  %v3627_v52 = vld [vmem:[%s4740_s1 + $0x158] sm:$0xff]   ;;  %v3631_v56 = vld [vmem:[%s4740_s1 + $0x160] sm:$0xff]   ;;  %v3635_v60 = vld [vmem:[%s4740_s1 + $0x168] sm:$0xff]  }
  0x12   :  { %3261 = vmatprep.subr.bf16.mxu1 %v3600_v17  ;;  %v3628_v53 = vld [vmem:[%s4740_s1 + $0x1d8] sm:$0xff]   ;;  %v3632_v57 = vld [vmem:[%s4740_s1 + $0x1e0] sm:$0xff]   ;;  %v3636_v61 = vld [vmem:[%s4740_s1 + $0x1e8] sm:$0xff]  }
  0x13   :  { %v3629_v54 = vld [vmem:[%s4740_s1 + $0x118] sm:$0xff]   ;;  %v3633_v58 = vld [vmem:[%s4740_s1 + $0x120] sm:$0xff]   ;;  %v3637_v62 = vld [vmem:[%s4740_s1 + $0x128] sm:$0xff]  }
  0x14   :  { %3240 = vmatpush3.bf16.msra.mxu0 %v3601_v18  ;;  %v3630_v55 = vld [vmem:[%s4740_s1 + $0x198] sm:$0xff]   ;;  %v3634_v59 = vld [vmem:[%s4740_s1 + $0x1a0] sm:$0xff]   ;;  %v3638_v63 = vld [vmem:[%s4740_s1 + $0x1a8] sm:$0xff]  }
  0x15   :  { %3262 = vmatpush3.bf16.msra.mxu1 %v3602_v19  ;;  %3241 = vmatprep.subr.bf16.mxu0 %v3603_v20  ;;  %v3639_v0 = vld [vmem:[%s4740_s1 + $0x170] sm:$0xff]   ;;  %v3643_v4 = vld [vmem:[%s4740_s1 + $0x178] sm:$0xff]   ;;  %v3647_v16 = vld [vmem:[%s4740_s1 + $0x240] sm:$0xff]  }
  0x16   :  { %3263 = vmatprep.subr.bf16.mxu1 %v3604_v21  ;;  %v3640_v1 = vld [vmem:[%s4740_s1 + $0x1f0] sm:$0xff]   ;;  %v3644_v5 = vld [vmem:[%s4740_s1 + $0x1f8] sm:$0xff]   ;;  %v3648_v17 = vld [vmem:[%s4740_s1 + $0x2c0] sm:$0xff]  }
  0x17   :  { %v3641_v2 = vld [vmem:[%s4740_s1 + $0x130] sm:$0xff]   ;;  %v3645_v6 = vld [vmem:[%s4740_s1 + $0x138] sm:$0xff]   ;;  %v3649_v18 = vld [vmem:[%s4740_s1 + $0x200] sm:$0xff]  }
  0x18   :  { %3242 = vmatpush3.bf16.msra.mxu0 %v3605_v22  ;;  %v3642_v3 = vld [vmem:[%s4740_s1 + $0x1b0] sm:$0xff]   ;;  %v3646_v7 = vld [vmem:[%s4740_s1 + $0x1b8] sm:$0xff]   ;;  %v3650_v19 = vld [vmem:[%s4740_s1 + $0x280] sm:$0xff]  }
  0x19   :  { %3264 = vmatpush3.bf16.msra.mxu1 %v3606_v23  ;;  %3243 = vmatprep.subr.bf16.mxu0 %v3607_v24  ;;  %v17_v8 = vld [vmem:[%s4741_s0 + $0x10] sm:$0xff]  ;;  %v18_v12 = vld [vmem:[%s4741_s0 + $0x18] sm:$0xff]  ;;  %v3651_v20 = vld [vmem:[%s4740_s1 + $0x248] sm:$0xff]  }
  0x1a   :  { %3265 = vmatprep.subr.bf16.mxu1 %v3608_v25  ;;  %v33_v9 = vld [vmem:[%s4741_s0 + $0x90] sm:$0xff]  ;;  %v34_v13 = vld [vmem:[%s4741_s0 + $0x98] sm:$0xff]  ;;  %v3652_v21 = vld [vmem:[%s4740_s1 + $0x2c8] sm:$0xff]  }
  0x1b   :  { %v2947_v10 = vcombine.low %v17_v8, %v33_v9  ;;  %v2948_v11 = vcombine.high %v17_v8, %v33_v9  ;;  %v2949_v14 = vcombine.low %v18_v12, %v34_v13  ;;  %v2950_v15 = vcombine.high %v18_v12, %v34_v13  ;;  %v3653_v22 = vld [vmem:[%s4740_s1 + $0x208] sm:$0xff]   ;;  %v3655_v24 = vld [vmem:[%s4740_s1 + $0x250] sm:$0xff]   ;;  %v3663_v32 = vld [vmem:[%s4740_s1 + $0x260] sm:$0xff]  }
  0x1c   :  { %3244 = vmatpush3.bf16.msra.mxu0 %v3609_v26  ;;  %v3654_v23 = vld [vmem:[%s4740_s1 + $0x288] sm:$0xff]   ;;  %v3656_v25 = vld [vmem:[%s4740_s1 + $0x2d0] sm:$0xff]   ;;  %v3664_v33 = vld [vmem:[%s4740_s1 + $0x2e0] sm:$0xff]  }
  0x1d   :  { %3266 = vmatpush3.bf16.msra.mxu1 %v3610_v27  ;;  %3245 = vmatprep.subr.bf16.mxu0 %v3611_v28  ;;  %v3657_v26 = vld [vmem:[%s4740_s1 + $0x210] sm:$0xff]   ;;  %v3659_v28 = vld [vmem:[%s4740_s1 + $0x258] sm:$0xff]   ;;  %v3665_v34 = vld [vmem:[%s4740_s1 + $0x220] sm:$0xff]  }
  0x1e   :  { %3267 = vmatprep.subr.bf16.mxu1 %v3612_v29  ;;  %v3658_v27 = vld [vmem:[%s4740_s1 + $0x290] sm:$0xff]   ;;  %v3660_v29 = vld [vmem:[%s4740_s1 + $0x2d8] sm:$0xff]   ;;  %v3667_v36 = vld [vmem:[%s4740_s1 + $0x268] sm:$0xff]  }
  0x1f   :  { %v3668_v37 = vld [vmem:[%s4740_s1 + $0x2e8] sm:$0xff]   ;;  %v3695_v8 = vld [vmem:[%s4740_s1 + $0x360] sm:$0xff]  }
  0x20   :  { %3246 = vmatpush3.bf16.msra.mxu0 %v3613_v30  ;;  %v3661_v30 = vld [vmem:[%s4740_s1 + $0x218] sm:$0xff]   ;;  %v3670_v39 = vld [vmem:[%s4740_s1 + $0x2a8] sm:$0xff]   ;;  %v3696_v9 = vld [vmem:[%s4740_s1 + $0x3e0] sm:$0xff]  }
  0x21   :  { %3268 = vmatpush3.bf16.msra.mxu1 %v3614_v31  ;;  %3275 = vmatprep.subr.bf16.mxu0 %v3615_v40  ;;  %v3662_v31 = vld [vmem:[%s4740_s1 + $0x298] sm:$0xff]   ;;  %v3671_v40 = vld [vmem:[%s4740_s1 + $0x270] sm:$0xff]   ;;  %v3699_v12 = vld [vmem:[%s4740_s1 + $0x368] sm:$0xff]  }
  0x22   :  { %3297 = vmatprep.subr.bf16.mxu1 %v3616_v41  ;;  %v3672_v41 = vld [vmem:[%s4740_s1 + $0x2f0] sm:$0xff]   ;;  %v3700_v13 = vld [vmem:[%s4740_s1 + $0x3e8] sm:$0xff]  }
  0x23   :  { %2288 = vmatmul.mubr.bf16.vlgmr.msra.gmra.mrb[0].mxu0 %v2943_v35  ;;  %v3666_v35 = vld [vmem:[%s4740_s1 + $0x2a0] sm:$0xff]  }
  0x24   :  { %2329 = vmatmul.mubr.bf16.vlgmr.msra.gmra.mrb[0].mxu1 %v2945_v38  ;;  %3276 = vmatpush3.bf16.msra.mxu0 %v3617_v42  ;;  %v3669_v38 = vld [vmem:[%s4740_s1 + $0x228] sm:$0xff]   ;;  %v3673_v42 = vld [vmem:[%s4740_s1 + $0x230] sm:$0xff]  }
  0x25   :  { %3298 = vmatpush3.bf16.msra.mxu1 %v3618_v43  ;;  %3277 = vmatprep.subr.bf16.mxu0 %v3619_v44  ;;  %v3674_v43 = vld [vmem:[%s4740_s1 + $0x2b0] sm:$0xff]   ;;  %v3675_v44 = vld [vmem:[%s4740_s1 + $0x278] sm:$0xff]  }
  0x26   :  { %3299 = vmatprep.subr.bf16.mxu1 %v3620_v45  ;;  %2369 = vmatprep.mubr.bf16.mxu0 %v2948_v11  ;;  %v3676_v45 = vld [vmem:[%s4740_s1 + $0x2f8] sm:$0xff]   ;;  %v3698_v11 = vld [vmem:[%s4740_s1 + $0x3a0] sm:$0xff]  }
  0x27   :  { %2410 = vmatprep.mubr.bf16.mxu1 %v2950_v15  ;;  %v3702_v15 = vld [vmem:[%s4740_s1 + $0x3a8] sm:$0xff]  }
  0x28   :  { %3278 = vmatpush3.bf16.msra.mxu0 %v3621_v46  ;;  %v3677_v46 = vld [vmem:[%s4740_s1 + $0x238] sm:$0xff]  }
  0x29   :  { %3300 = vmatpush3.bf16.msra.mxu1 %v3622_v47  ;;  %3279 = vmatprep.subr.bf16.mxu0 %v3623_v48  ;;  %v3678_v47 = vld [vmem:[%s4740_s1 + $0x2b8] sm:$0xff]   ;;  %v19_v48 = vld [vmem:[%s4741_s0 + $0x20] sm:$0xff] }
  0x2a   :  { %3301 = vmatprep.subr.bf16.mxu1 %v3624_v49  ;;  %v35_v49 = vld [vmem:[%s4741_s0 + $0xa0] sm:$0xff] }
  0x2c   :  { %3280 = vmatpush3.bf16.msra.mxu0 %v3625_v50  ;;  %v20_v50 = vld [vmem:[%s4741_s0 + $0x28] sm:$0xff] }
  0x2d   :  { %3302 = vmatpush3.bf16.msra.mxu1 %v3626_v51  ;;  %3281 = vmatprep.subr.bf16.mxu0 %v3627_v52  ;;  %v36_v51 = vld [vmem:[%s4741_s0 + $0xa8] sm:$0xff]  ;;  %v2951_v52 = vcombine.low %v19_v48, %v35_v49 }
  0x2e   :  { %3303 = vmatprep.subr.bf16.mxu1 %v3628_v53  ;;  %v2952_v53 = vcombine.high %v19_v48, %v35_v49  ;;  %v3727_v48 = vld [vmem:[%s4740_s1 + $0x460] sm:$0xff]  }
  0x2f   :  { %v3728_v49 = vld [vmem:[%s4740_s1 + $0x4e0] sm:$0xff]  }
  0x30   :  { %3282 = vmatpush3.bf16.msra.mxu0 %v3629_v54  ;;  %v2953_v54 = vcombine.low %v20_v50, %v36_v51 }
  0x31   :  { %3304 = vmatpush3.bf16.msra.mxu1 %v3630_v55  ;;  %3283 = vmatprep.subr.bf16.mxu0 %v3631_v56  ;;  %v2954_v55 = vcombine.high %v20_v50, %v36_v51  ;;  %v3679_v56 = vld [vmem:[%s4740_s1 + $0x340] sm:$0xff]  }
  0x32   :  { %3305 = vmatprep.subr.bf16.mxu1 %v3632_v57  ;;  %v3680_v57 = vld [vmem:[%s4740_s1 + $0x3c0] sm:$0xff]  }
  0x33   :  { %v3729_v50 = vld [vmem:[%s4740_s1 + $0x420] sm:$0xff]  }
  0x34   :  { %3284 = vmatpush3.bf16.msra.mxu0 %v3633_v58  ;;  %v3681_v58 = vld [vmem:[%s4740_s1 + $0x300] sm:$0xff]  }
  0x35   :  { %3306 = vmatpush3.bf16.msra.mxu1 %v3634_v59  ;;  %3285 = vmatprep.subr.bf16.mxu0 %v3635_v60  ;;  %v3682_v59 = vld [vmem:[%s4740_s1 + $0x380] sm:$0xff]   ;;  %v3683_v60 = vld [vmem:[%s4740_s1 + $0x348] sm:$0xff]  }
  0x36   :  { %3307 = vmatprep.subr.bf16.mxu1 %v3636_v61  ;;  %v3684_v61 = vld [vmem:[%s4740_s1 + $0x3c8] sm:$0xff]   ;;  %v3730_v51 = vld [vmem:[%s4740_s1 + $0x4a0] sm:$0xff]  }
  0x38   :  { %3286 = vmatpush3.bf16.msra.mxu0 %v3637_v62  ;;  %v3685_v62 = vld [vmem:[%s4740_s1 + $0x308] sm:$0xff]  }
  0x39   :  { %3308 = vmatpush3.bf16.msra.mxu1 %v3638_v63  ;;  %3287 = vmatprep.subr.bf16.mxu0 %v3639_v0  ;;  %v3686_v63 = vld [vmem:[%s4740_s1 + $0x388] sm:$0xff]   ;;  %v3687_v0 = vld [vmem:[%s4740_s1 + $0x350] sm:$0xff]  }
  0x3a   :  { %3309 = vmatprep.subr.bf16.mxu1 %v3640_v1  ;;  %v3688_v1 = vld [vmem:[%s4740_s1 + $0x3d0] sm:$0xff]  }
  0x3c   :  { %3288 = vmatpush3.bf16.msra.mxu0 %v3641_v2  ;;  %v3689_v2 = vld [vmem:[%s4740_s1 + $0x310] sm:$0xff]  }
  0x3d   :  { %3310 = vmatpush3.bf16.msra.mxu1 %v3642_v3  ;;  %3289 = vmatprep.subr.bf16.mxu0 %v3643_v4  ;;  %v3690_v3 = vld [vmem:[%s4740_s1 + $0x390] sm:$0xff]   ;;  %v3691_v4 = vld [vmem:[%s4740_s1 + $0x358] sm:$0xff]  }
  0x3e   :  { %3311 = vmatprep.subr.bf16.mxu1 %v3644_v5  ;;  %v3692_v5 = vld [vmem:[%s4740_s1 + $0x3d8] sm:$0xff]  }
  0x40   :  { %3290 = vmatpush3.bf16.msra.mxu0 %v3645_v6  ;;  %v3693_v6 = vld [vmem:[%s4740_s1 + $0x318] sm:$0xff]  }
  0x41   :  { %3312 = vmatpush3.bf16.msra.mxu1 %v3646_v7  ;;  %3319 = vmatprep.subr.bf16.mxu0 %v3647_v16  ;;  %v3694_v7 = vld [vmem:[%s4740_s1 + $0x398] sm:$0xff]   ;;  %v3703_v16 = vld [vmem:[%s4740_s1 + $0x370] sm:$0xff]  }
  0x42   :  { %3341 = vmatprep.subr.bf16.mxu1 %v3648_v17  ;;  %v3704_v17 = vld [vmem:[%s4740_s1 + $0x3f0] sm:$0xff]  }
  0x43   :  { %2370 = vmatmul.mubr.bf16.vlgmr.msra.gmra.mrb[4].mxu0 %v2947_v10  ;;  %v3697_v10 = vld [vmem:[%s4740_s1 + $0x320] sm:$0xff]  }
  0x44   :  { %2411 = vmatmul.mubr.bf16.vlgmr.msra.gmra.mrb[4].mxu1 %v2949_v14  ;;  %3320 = vmatpush3.bf16.msra.mxu0 %v3649_v18  ;;  %v3701_v14 = vld [vmem:[%s4740_s1 + $0x328] sm:$0xff]   ;;  %v3705_v18 = vld [vmem:[%s4740_s1 + $0x330] sm:$0xff]  }
  0x45   :  { %3342 = vmatpush3.bf16.msra.mxu1 %v3650_v19  ;;  %3321 = vmatprep.subr.bf16.mxu0 %v3651_v20  ;;  %v3706_v19 = vld [vmem:[%s4740_s1 + $0x3b0] sm:$0xff]   ;;  %v3707_v20 = vld [vmem:[%s4740_s1 + $0x378] sm:$0xff]  }
  0x46   :  { %3343 = vmatprep.subr.bf16.mxu1 %v3652_v21  ;;  %2451 = vmatprep.mubr.bf16.mxu0 %v2952_v53  ;;  %v3708_v21 = vld [vmem:[%s4740_s1 + $0x3f8] sm:$0xff]   ;;  %v3732_v53 = vld [vmem:[%s4740_s1 + $0x4e8] sm:$0xff]  }
  0x47   :  { %2492 = vmatprep.mubr.bf16.mxu1 %v2954_v55  ;;  %v3734_v55 = vld [vmem:[%s4740_s1 + $0x4a8] sm:$0xff]  }
  0x48   :  { %3322 = vmatpush3.bf16.msra.mxu0 %v3653_v22  ;;  %v3709_v22 = vld [vmem:[%s4740_s1 + $0x338] sm:$0xff]  }
  0x49   :  { %3344 = vmatpush3.bf16.msra.mxu1 %v3654_v23  ;;  %3323 = vmatprep.subr.bf16.mxu0 %v3655_v24  ;;  %v3710_v23 = vld [vmem:[%s4740_s1 + $0x3b8] sm:$0xff]   ;;  %v21_v24 = vld [vmem:[%s4741_s0 + $0x30] sm:$0xff] }
  0x4a   :  { %3345 = vmatprep.subr.bf16.mxu1 %v3656_v25  ;;  %v37_v25 = vld [vmem:[%s4741_s0 + $0xb0] sm:$0xff] }
  0x4c   :  { %3324 = vmatpush3.bf16.msra.mxu0 %v3657_v26  ;;  %v22_v26 = vld [vmem:[%s4741_s0 + $0x38] sm:$0xff] }
  0x4d   :  { %3346 = vmatpush3.bf16.msra.mxu1 %v3658_v27  ;;  %3325 = vmatprep.subr.bf16.mxu0 %v3659_v28  ;;  %v2955_v27 = vcombine.low %v21_v24, %v37_v25  ;;  %v2956_v28 = vcombine.high %v21_v24, %v37_v25  ;;  %v3759_v24 = vld [vmem:[%s4740_s1 + $0x560] sm:$0xff]  }
  0x4e   :  { %3347 = vmatprep.subr.bf16.mxu1 %v3660_v29  ;;  %v38_v29 = vld [vmem:[%s4741_s0 + $0xb8] sm:$0xff]  ;;  %v3760_v25 = vld [vmem:[%s4740_s1 + $0x5e0] sm:$0xff]  }
  0x50   :  { %3326 = vmatpush3.bf16.msra.mxu0 %v3661_v30  ;;  %v2957_v30 = vcombine.low %v22_v26, %v38_v29 }
  0x51   :  { %3348 = vmatpush3.bf16.msra.mxu1 %v3662_v31  ;;  %3327 = vmatprep.subr.bf16.mxu0 %v3663_v32  ;;  %v2958_v31 = vcombine.high %v22_v26, %v38_v29  ;;  %v3711_v32 = vld [vmem:[%s4740_s1 + $0x440] sm:$0xff]   ;;  %v3764_v29 = vld [vmem:[%s4740_s1 + $0x5e8] sm:$0xff]  }
  0x52   :  { %3349 = vmatprep.subr.bf16.mxu1 %v3664_v33  ;;  %v3712_v33 = vld [vmem:[%s4740_s1 + $0x4c0] sm:$0xff]  }
  0x53   :  { %v3761_v26 = vld [vmem:[%s4740_s1 + $0x520] sm:$0xff]  }
  0x54   :  { %3328 = vmatpush3.bf16.msra.mxu0 %v3665_v34  ;;  %v3713_v34 = vld [vmem:[%s4740_s1 + $0x400] sm:$0xff]  }
  0x55   :  { %3350 = vmatpush3.bf16.msra.mxu1 %v3666_v35  ;;  %3329 = vmatprep.subr.bf16.mxu0 %v3667_v36  ;;  %v3714_v35 = vld [vmem:[%s4740_s1 + $0x480] sm:$0xff]   ;;  %v3715_v36 = vld [vmem:[%s4740_s1 + $0x448] sm:$0xff]  }
  0x56   :  { %3351 = vmatprep.subr.bf16.mxu1 %v3668_v37  ;;  %v3716_v37 = vld [vmem:[%s4740_s1 + $0x4c8] sm:$0xff]  }
  0x58   :  { %3330 = vmatpush3.bf16.msra.mxu0 %v3669_v38  ;;  %v3717_v38 = vld [vmem:[%s4740_s1 + $0x408] sm:$0xff]  }
  0x59   :  { %3352 = vmatpush3.bf16.msra.mxu1 %v3670_v39  ;;  %3331 = vmatprep.subr.bf16.mxu0 %v3671_v40  ;;  %v3718_v39 = vld [vmem:[%s4740_s1 + $0x488] sm:$0xff]   ;;  %v3719_v40 = vld [vmem:[%s4740_s1 + $0x450] sm:$0xff]  }
  0x5a   :  { %3353 = vmatprep.subr.bf16.mxu1 %v3672_v41  ;;  %v3720_v41 = vld [vmem:[%s4740_s1 + $0x4d0] sm:$0xff]  }
  0x5c   :  { %3332 = vmatpush3.bf16.msra.mxu0 %v3673_v42  ;;  %v3721_v42 = vld [vmem:[%s4740_s1 + $0x410] sm:$0xff]  }
  0x5d   :  { %3354 = vmatpush3.bf16.msra.mxu1 %v3674_v43  ;;  %3333 = vmatprep.subr.bf16.mxu0 %v3675_v44  ;;  %v3722_v43 = vld [vmem:[%s4740_s1 + $0x490] sm:$0xff]   ;;  %v3723_v44 = vld [vmem:[%s4740_s1 + $0x458] sm:$0xff]  }
  0x5e   :  { %3355 = vmatprep.subr.bf16.mxu1 %v3676_v45  ;;  %v3724_v45 = vld [vmem:[%s4740_s1 + $0x4d8] sm:$0xff]  }
  0x60   :  { %3334 = vmatpush3.bf16.msra.mxu0 %v3677_v46  ;;  %v3725_v46 = vld [vmem:[%s4740_s1 + $0x418] sm:$0xff]  }
  0x61   :  { %3356 = vmatpush3.bf16.msra.mxu1 %v3678_v47  ;;  %3363 = vmatprep.subr.bf16.mxu0 %v3679_v56  ;;  %v3726_v47 = vld [vmem:[%s4740_s1 + $0x498] sm:$0xff]   ;;  %v3735_v56 = vld [vmem:[%s4740_s1 + $0x470] sm:$0xff]  }
  0x62   :  { %3385 = vmatprep.subr.bf16.mxu1 %v3680_v57  ;;  %v3736_v57 = vld [vmem:[%s4740_s1 + $0x4f0] sm:$0xff]  }
  0x63   :  { %2452 = vmatmul.mubr.bf16.vlgmr.msra.gmra.mrb[8].mxu0 %v2951_v52  ;;  %v3731_v52 = vld [vmem:[%s4740_s1 + $0x468] sm:$0xff]  }
  0x64   :  { %2493 = vmatmul.mubr.bf16.vlgmr.msra.gmra.mrb[8].mxu1 %v2953_v54  ;;  %3364 = vmatpush3.bf16.msra.mxu0 %v3681_v58  ;;  %v3733_v54 = vld [vmem:[%s4740_s1 + $0x428] sm:$0xff]   ;;  %v3737_v58 = vld [vmem:[%s4740_s1 + $0x430] sm:$0xff]  }
  0x65   :  { %3386 = vmatpush3.bf16.msra.mxu1 %v3682_v59  ;;  %3365 = vmatprep.subr.bf16.mxu0 %v3683_v60  ;;  %v3738_v59 = vld [vmem:[%s4740_s1 + $0x4b0] sm:$0xff]   ;;  %v3739_v60 = vld [vmem:[%s4740_s1 + $0x478] sm:$0xff]  }
  0x66   :  { %3387 = vmatprep.subr.bf16.mxu1 %v3684_v61  ;;  %2533 = vmatprep.mubr.bf16.mxu0 %v2956_v28  ;;  %v3740_v61 = vld [vmem:[%s4740_s1 + $0x4f8] sm:$0xff]   ;;  %v3763_v28 = vld [vmem:[%s4740_s1 + $0x568] sm:$0xff]  }
  0x67   :  { %2574 = vmatprep.mubr.bf16.mxu1 %v2958_v31  ;;  %v3766_v31 = vld [vmem:[%s4740_s1 + $0x5a8] sm:$0xff]  }
  0x68   :  { %3366 = vmatpush3.bf16.msra.mxu0 %v3685_v62  ;;  %v3741_v62 = vld [vmem:[%s4740_s1 + $0x438] sm:$0xff]  }
  0x69   :  { %3388 = vmatpush3.bf16.msra.mxu1 %v3686_v63  ;;  %3367 = vmatprep.subr.bf16.mxu0 %v3687_v0  ;;  %v3742_v63 = vld [vmem:[%s4740_s1 + $0x4b8] sm:$0xff]   ;;  %v23_v0 = vld [vmem:[%s4741_s0 + $0x40] sm:$0xff] }
  0x6a   :  { %3389 = vmatprep.subr.bf16.mxu1 %v3688_v1  ;;  %v39_v1 = vld [vmem:[%s4741_s0 + $0xc0] sm:$0xff] }
  0x6c   :  { %3368 = vmatpush3.bf16.msra.mxu0 %v3689_v2  ;;  %v2959_v2 = vcombine.low %v23_v0, %v39_v1 }
  0x6d   :  { %3390 = vmatpush3.bf16.msra.mxu1 %v3690_v3  ;;  %3369 = vmatprep.subr.bf16.mxu0 %v3691_v4  ;;  %v2960_v3 = vcombine.high %v23_v0, %v39_v1  ;;  %v24_v4 = vld [vmem:[%s4741_s0 + $0x48] sm:$0xff]  ;;  %v3791_v0 = vld [vmem:[%s4740_s1 + $0x660] sm:$0xff]  }
  0x6e   :  { %3391 = vmatprep.subr.bf16.mxu1 %v3692_v5  ;;  %v40_v5 = vld [vmem:[%s4741_s0 + $0xc8] sm:$0xff]  ;;  %v3792_v1 = vld [vmem:[%s4740_s1 + $0x6e0] sm:$0xff]  }
  0x70   :  { %3370 = vmatpush3.bf16.msra.mxu0 %v3693_v6  ;;  %v2961_v6 = vcombine.low %v24_v4, %v40_v5 }
  0x71   :  { %3392 = vmatpush3.bf16.msra.mxu1 %v3694_v7  ;;  %3371 = vmatprep.subr.bf16.mxu0 %v3695_v8  ;;  %v2962_v7 = vcombine.high %v24_v4, %v40_v5  ;;  %v3743_v8 = vld [vmem:[%s4740_s1 + $0x540] sm:$0xff]   ;;  %v3795_v4 = vld [vmem:[%s4740_s1 + $0x668] sm:$0xff]  }
  0x72   :  { %3393 = vmatprep.subr.bf16.mxu1 %v3696_v9  ;;  %v3744_v9 = vld [vmem:[%s4740_s1 + $0x5c0] sm:$0xff]   ;;  %v3796_v5 = vld [vmem:[%s4740_s1 + $0x6e8] sm:$0xff]  }
  0x74   :  { %3372 = vmatpush3.bf16.msra.mxu0 %v3697_v10  ;;  %v3745_v10 = vld [vmem:[%s4740_s1 + $0x500] sm:$0xff]  }
  0x75   :  { %3394 = vmatpush3.bf16.msra.mxu1 %v3698_v11  ;;  %3373 = vmatprep.subr.bf16.mxu0 %v3699_v12  ;;  %v3746_v11 = vld [vmem:[%s4740_s1 + $0x580] sm:$0xff]   ;;  %v3747_v12 = vld [vmem:[%s4740_s1 + $0x548] sm:$0xff]  }
  0x76   :  { %3395 = vmatprep.subr.bf16.mxu1 %v3700_v13  ;;  %v3748_v13 = vld [vmem:[%s4740_s1 + $0x5c8] sm:$0xff]  }
  0x78   :  { %3374 = vmatpush3.bf16.msra.mxu0 %v3701_v14  ;;  %v3749_v14 = vld [vmem:[%s4740_s1 + $0x508] sm:$0xff]  }
  0x79   :  { %3396 = vmatpush3.bf16.msra.mxu1 %v3702_v15  ;;  %3375 = vmatprep.subr.bf16.mxu0 %v3703_v16  ;;  %v3750_v15 = vld [vmem:[%s4740_s1 + $0x588] sm:$0xff]   ;;  %v3751_v16 = vld [vmem:[%s4740_s1 + $0x550] sm:$0xff]  }
  0x7a   :  { %3397 = vmatprep.subr.bf16.mxu1 %v3704_v17  ;;  %v3752_v17 = vld [vmem:[%s4740_s1 + $0x5d0] sm:$0xff]  }
  0x7c   :  { %3376 = vmatpush3.bf16.msra.mxu0 %v3705_v18  ;;  %v3753_v18 = vld [vmem:[%s4740_s1 + $0x510] sm:$0xff]  }
  0x7d   :  { %3398 = vmatpush3.bf16.msra.mxu1 %v3706_v19  ;;  %3377 = vmatprep.subr.bf16.mxu0 %v3707_v20  ;;  %v3754_v19 = vld [vmem:[%s4740_s1 + $0x590] sm:$0xff]   ;;  %v3755_v20 = vld [vmem:[%s4740_s1 + $0x558] sm:$0xff]  }
  0x7e   :  { %3399 = vmatprep.subr.bf16.mxu1 %v3708_v21  ;;  %v3756_v21 = vld [vmem:[%s4740_s1 + $0x5d8] sm:$0xff]  }
  0x80   :  { %3378 = vmatpush3.bf16.msra.mxu0 %v3709_v22  ;;  %v3757_v22 = vld [vmem:[%s4740_s1 + $0x518] sm:$0xff]  }
  0x81   :  { %3400 = vmatpush3.bf16.msra.mxu1 %v3710_v23  ;;  %3407 = vmatprep.subr.bf16.mxu0 %v3711_v32  ;;  %v3758_v23 = vld [vmem:[%s4740_s1 + $0x598] sm:$0xff]   ;;  %v3767_v32 = vld [vmem:[%s4740_s1 + $0x570] sm:$0xff]  }
  0x82   :  { %3429 = vmatprep.subr.bf16.mxu1 %v3712_v33  ;;  %v3768_v33 = vld [vmem:[%s4740_s1 + $0x5f0] sm:$0xff]  }
  0x83   :  { %2534 = vmatmul.mubr.bf16.vlgmr.msra.gmra.mrb[12].mxu0 %v2955_v27  ;;  %v3762_v27 = vld [vmem:[%s4740_s1 + $0x5a0] sm:$0xff]  }
  0x84   :  { %2575 = vmatmul.mubr.bf16.vlgmr.msra.gmra.mrb[12].mxu1 %v2957_v30  ;;  %3408 = vmatpush3.bf16.msra.mxu0 %v3713_v34  ;;  %v3765_v30 = vld [vmem:[%s4740_s1 + $0x528] sm:$0xff]   ;;  %v3769_v34 = vld [vmem:[%s4740_s1 + $0x530] sm:$0xff]  }
  0x85   :  { %3430 = vmatpush3.bf16.msra.mxu1 %v3714_v35  ;;  %3409 = vmatprep.subr.bf16.mxu0 %v3715_v36  ;;  %v3770_v35 = vld [vmem:[%s4740_s1 + $0x5b0] sm:$0xff]   ;;  %v3771_v36 = vld [vmem:[%s4740_s1 + $0x578] sm:$0xff]  }
  0x86   :  { %3431 = vmatprep.subr.bf16.mxu1 %v3716_v37  ;;  %2615 = vmatprep.mubr.bf16.mxu0 %v2960_v3  ;;  %v3772_v37 = vld [vmem:[%s4740_s1 + $0x5f8] sm:$0xff]   ;;  %v3794_v3 = vld [vmem:[%s4740_s1 + $0x6a0] sm:$0xff]  }
  0x87   :  { %2656 = vmatprep.mubr.bf16.mxu1 %v2962_v7  ;;  %v3798_v7 = vld [vmem:[%s4740_s1 + $0x6a8] sm:$0xff]  }
  0x88   :  { %3410 = vmatpush3.bf16.msra.mxu0 %v3717_v38  ;;  %v3773_v38 = vld [vmem:[%s4740_s1 + $0x538] sm:$0xff]  }
  0x89   :  { %3432 = vmatpush3.bf16.msra.mxu1 %v3718_v39  ;;  %3411 = vmatprep.subr.bf16.mxu0 %v3719_v40  ;;  %v3774_v39 = vld [vmem:[%s4740_s1 + $0x5b8] sm:$0xff]   ;;  %v25_v40 = vld [vmem:[%s4741_s0 + $0x50] sm:$0xff] }
  0x8a   :  { %3433 = vmatprep.subr.bf16.mxu1 %v3720_v41  ;;  %v41_v41 = vld [vmem:[%s4741_s0 + $0xd0] sm:$0xff] }
  0x8c   :  { %3412 = vmatpush3.bf16.msra.mxu0 %v3721_v42  ;;  %v26_v42 = vld [vmem:[%s4741_s0 + $0x58] sm:$0xff] }
  0x8d   :  { %3434 = vmatpush3.bf16.msra.mxu1 %v3722_v43  ;;  %3413 = vmatprep.subr.bf16.mxu0 %v3723_v44  ;;  %v42_v43 = vld [vmem:[%s4741_s0 + $0xd8] sm:$0xff]  ;;  %v2963_v44 = vcombine.low %v25_v40, %v41_v41 }
  0x8e   :  { %3435 = vmatprep.subr.bf16.mxu1 %v3724_v45  ;;  %v2964_v45 = vcombine.high %v25_v40, %v41_v41  ;;  %v3822_v41 = vld [vmem:[%s4740_s1 + $0x798] sm:$0xff]  }
  0x90   :  { %3414 = vmatpush3.bf16.msra.mxu0 %v3725_v46  ;;  %v2965_v46 = vcombine.low %v26_v42, %v42_v43 }
  0x91   :  { %3436 = vmatpush3.bf16.msra.mxu1 %v3726_v47  ;;  %3415 = vmatprep.subr.bf16.mxu0 %v3727_v48  ;;  %v2966_v47 = vcombine.high %v26_v42, %v42_v43  ;;  %v3775_v48 = vld [vmem:[%s4740_s1 + $0x640] sm:$0xff]  }
  0x92   :  { %3437 = vmatprep.subr.bf16.mxu1 %v3728_v49  ;;  %v3776_v49 = vld [vmem:[%s4740_s1 + $0x6c0] sm:$0xff]  }
  0x93   :  { %v3823_v43 = vld [vmem:[%s4740_s1 + $0x760] sm:$0xff]  }
  0x94   :  { %3416 = vmatpush3.bf16.msra.mxu0 %v3729_v50  ;;  %v3777_v50 = vld [vmem:[%s4740_s1 + $0x600] sm:$0xff]  }
  0x95   :  { %3438 = vmatpush3.bf16.msra.mxu1 %v3730_v51  ;;  %3417 = vmatprep.subr.bf16.mxu0 %v3731_v52  ;;  %v3778_v51 = vld [vmem:[%s4740_s1 + $0x680] sm:$0xff]   ;;  %v3779_v52 = vld [vmem:[%s4740_s1 + $0x648] sm:$0xff]  }
  0x96   :  { %3439 = vmatprep.subr.bf16.mxu1 %v3732_v53  ;;  %v3780_v53 = vld [vmem:[%s4740_s1 + $0x6c8] sm:$0xff]  }
  0x98   :  { %3418 = vmatpush3.bf16.msra.mxu0 %v3733_v54  ;;  %v3781_v54 = vld [vmem:[%s4740_s1 + $0x608] sm:$0xff]  }
  0x99   :  { %3440 = vmatpush3.bf16.msra.mxu1 %v3734_v55  ;;  %3419 = vmatprep.subr.bf16.mxu0 %v3735_v56  ;;  %v3782_v55 = vld [vmem:[%s4740_s1 + $0x688] sm:$0xff]   ;;  %v3783_v56 = vld [vmem:[%s4740_s1 + $0x650] sm:$0xff]  }
  0x9a   :  { %3441 = vmatprep.subr.bf16.mxu1 %v3736_v57  ;;  %v3784_v57 = vld [vmem:[%s4740_s1 + $0x6d0] sm:$0xff]  }
  0x9c   :  { %3420 = vmatpush3.bf16.msra.mxu0 %v3737_v58  ;;  %v3785_v58 = vld [vmem:[%s4740_s1 + $0x610] sm:$0xff]  }
  0x9d   :  { %3442 = vmatpush3.bf16.msra.mxu1 %v3738_v59  ;;  %3421 = vmatprep.subr.bf16.mxu0 %v3739_v60  ;;  %v3786_v59 = vld [vmem:[%s4740_s1 + $0x690] sm:$0xff]   ;;  %v3787_v60 = vld [vmem:[%s4740_s1 + $0x658] sm:$0xff]  }
  0x9e   :  { %3443 = vmatprep.subr.bf16.mxu1 %v3740_v61  ;;  %v3788_v61 = vld [vmem:[%s4740_s1 + $0x6d8] sm:$0xff]  }
  0xa0   :  { %3422 = vmatpush3.bf16.msra.mxu0 %v3741_v62  ;;  %v3789_v62 = vld [vmem:[%s4740_s1 + $0x618] sm:$0xff]  }
  0xa1   :  { %3444 = vmatpush3.bf16.msra.mxu1 %v3742_v63  ;;  %3451 = vmatprep.subr.bf16.mxu0 %v3743_v8  ;;  %v3790_v63 = vld [vmem:[%s4740_s1 + $0x698] sm:$0xff]   ;;  %v3799_v8 = vld [vmem:[%s4740_s1 + $0x670] sm:$0xff]  }
  0xa2   :  { %3473 = vmatprep.subr.bf16.mxu1 %v3744_v9  ;;  %v3800_v9 = vld [vmem:[%s4740_s1 + $0x6f0] sm:$0xff]  }
  0xa3   :  { %2616 = vmatmul.mubr.bf16.vlgmr.msra.gmra.mrb[16].mxu0 %v2959_v2  ;;  %v3793_v2 = vld [vmem:[%s4740_s1 + $0x620] sm:$0xff]  }
  0xa4   :  { %2657 = vmatmul.mubr.bf16.vlgmr.msra.gmra.mrb[16].mxu1 %v2961_v6  ;;  %3452 = vmatpush3.bf16.msra.mxu0 %v3745_v10  ;;  %v3797_v6 = vld [vmem:[%s4740_s1 + $0x628] sm:$0xff]   ;;  %v3801_v10 = vld [vmem:[%s4740_s1 + $0x630] sm:$0xff]  }
  0xa5   :  { %3474 = vmatpush3.bf16.msra.mxu1 %v3746_v11  ;;  %3453 = vmatprep.subr.bf16.mxu0 %v3747_v12  ;;  %v3802_v11 = vld [vmem:[%s4740_s1 + $0x6b0] sm:$0xff]   ;;  %v3803_v12 = vld [vmem:[%s4740_s1 + $0x678] sm:$0xff]  }
  0xa6   :  { %3475 = vmatprep.subr.bf16.mxu1 %v3748_v13  ;;  %2697 = vmatprep.mubr.bf16.mxu0 %v2964_v45  ;;  %v3804_v13 = vld [vmem:[%s4740_s1 + $0x6f8] sm:$0xff]  }
  0xa7   :  { %2738 = vmatprep.mubr.bf16.mxu1 %v2966_v47 }
  0xa8   :  { %3454 = vmatpush3.bf16.msra.mxu0 %v3749_v14  ;;  %v3805_v14 = vld [vmem:[%s4740_s1 + $0x638] sm:$0xff]  }
  0xa9   :  { %3476 = vmatpush3.bf16.msra.mxu1 %v3750_v15  ;;  %3455 = vmatprep.subr.bf16.mxu0 %v3751_v16  ;;  %v3806_v15 = vld [vmem:[%s4740_s1 + $0x6b8] sm:$0xff]   ;;  %v27_v16 = vld [vmem:[%s4741_s0 + $0x60] sm:$0xff] }
  0xaa   :  { %3477 = vmatprep.subr.bf16.mxu1 %v3752_v17  ;;  %v43_v17 = vld [vmem:[%s4741_s0 + $0xe0] sm:$0xff] }
  0xac   :  { %3456 = vmatpush3.bf16.msra.mxu0 %v3753_v18  ;;  %v28_v18 = vld [vmem:[%s4741_s0 + $0x68] sm:$0xff] }
  0xad   :  { %3478 = vmatpush3.bf16.msra.mxu1 %v3754_v19  ;;  %3457 = vmatprep.subr.bf16.mxu0 %v3755_v20  ;;  %v2967_v19 = vcombine.low %v27_v16, %v43_v17  ;;  %v2968_v20 = vcombine.high %v27_v16, %v43_v17 }
  0xae   :  { %3479 = vmatprep.subr.bf16.mxu1 %v3756_v21  ;;  %v44_v21 = vld [vmem:[%s4741_s0 + $0xe8] sm:$0xff] }
  0xb0   :  { %3458 = vmatpush3.bf16.msra.mxu0 %v3757_v22  ;;  %v2969_v22 = vcombine.low %v28_v18, %v44_v21 }
  0xb1   :  { %3480 = vmatpush3.bf16.msra.mxu1 %v3758_v23  ;;  %3459 = vmatprep.subr.bf16.mxu0 %v3759_v24  ;;  %v2970_v23 = vcombine.high %v28_v18, %v44_v21  ;;  %v3807_v24 = vld [vmem:[%s4740_s1 + $0x740] sm:$0xff]  }
  0xb2   :  { %3481 = vmatprep.subr.bf16.mxu1 %v3760_v25  ;;  %v3808_v25 = vld [vmem:[%s4740_s1 + $0x7c0] sm:$0xff]  }
  0xb4   :  { %3460 = vmatpush3.bf16.msra.mxu0 %v3761_v26  ;;  %v3809_v26 = vld [vmem:[%s4740_s1 + $0x700] sm:$0xff]  }
  0xb5   :  { %3482 = vmatpush3.bf16.msra.mxu1 %v3762_v27  ;;  %3461 = vmatprep.subr.bf16.mxu0 %v3763_v28  ;;  %v3810_v27 = vld [vmem:[%s4740_s1 + $0x780] sm:$0xff]   ;;  %v3811_v28 = vld [vmem:[%s4740_s1 + $0x748] sm:$0xff]  }
  0xb6   :  { %3483 = vmatprep.subr.bf16.mxu1 %v3764_v29  ;;  %v3812_v29 = vld [vmem:[%s4740_s1 + $0x7c8] sm:$0xff]  }
  0xb8   :  { %3462 = vmatpush3.bf16.msra.mxu0 %v3765_v30  ;;  %v3813_v30 = vld [vmem:[%s4740_s1 + $0x708] sm:$0xff]  }
  0xb9   :  { %3484 = vmatpush3.bf16.msra.mxu1 %v3766_v31  ;;  %3463 = vmatprep.subr.bf16.mxu0 %v3767_v32  ;;  %v3814_v31 = vld [vmem:[%s4740_s1 + $0x788] sm:$0xff]   ;;  %v3815_v32 = vld [vmem:[%s4740_s1 + $0x750] sm:$0xff]  }
  0xba   :  { %3485 = vmatprep.subr.bf16.mxu1 %v3768_v33  ;;  %v3816_v33 = vld [vmem:[%s4740_s1 + $0x7d0] sm:$0xff]  }
  0xbc   :  { %3464 = vmatpush3.bf16.msra.mxu0 %v3769_v34  ;;  %v3817_v34 = vld [vmem:[%s4740_s1 + $0x710] sm:$0xff]  }
  0xbd   :  { %3486 = vmatpush3.bf16.msra.mxu1 %v3770_v35  ;;  %3465 = vmatprep.subr.bf16.mxu0 %v3771_v36  ;;  %v3818_v35 = vld [vmem:[%s4740_s1 + $0x790] sm:$0xff]   ;;  %v3819_v36 = vld [vmem:[%s4740_s1 + $0x758] sm:$0xff]  }
  0xbe   :  { %3487 = vmatprep.subr.bf16.mxu1 %v3772_v37  ;;  %v3820_v37 = vld [vmem:[%s4740_s1 + $0x7d8] sm:$0xff]  }
  0xc0   :  { %3466 = vmatpush3.bf16.msra.mxu0 %v3773_v38 }
  0xc1   :  { %3488 = vmatpush3.bf16.msra.mxu1 %v3774_v39  ;;  %3495 = vmatprep.subr.bf16.mxu0 %v3775_v48  ;;  %v3821_v39 = vld [vmem:[%s4740_s1 + $0x718] sm:$0xff]  }
  0xc2   :  { %3517 = vmatprep.subr.bf16.mxu1 %v3776_v49  ;;  %v3825_v49 = vld [vmem:[%s4740_s1 + $0x720] sm:$0xff]  }
  0xc3   :  { %2698 = vmatmul.mubr.bf16.vlgmr.msra.gmra.mrb[20].mxu0 %v2963_v44 }
  0xc4   :  { %2739 = vmatmul.mubr.bf16.vlgmr.msra.gmra.mrb[20].mxu1 %v2965_v46  ;;  %3496 = vmatpush3.bf16.msra.mxu0 %v3777_v50  ;;  %v3824_v46 = vld [vmem:[%s4740_s1 + $0x7e0] sm:$0xff]  }
  0xc5   :  { %3518 = vmatpush3.bf16.msra.mxu1 %v3778_v51  ;;  %3497 = vmatprep.subr.bf16.mxu0 %v3779_v52  ;;  %v3826_v51 = vld [vmem:[%s4740_s1 + $0x7a0] sm:$0xff]  }
  0xc6   :  { %3519 = vmatprep.subr.bf16.mxu1 %v3780_v53  ;;  %2779 = vmatprep.mubr.bf16.mxu0 %v2968_v20 }
  0xc7   :  { %2820 = vmatprep.mubr.bf16.mxu1 %v2970_v23 }
  0xc8   :  { %3498 = vmatpush3.bf16.msra.mxu0 %v3781_v54  ;;  %v3827_v54 = vld [vmem:[%s4740_s1 + $0x768] sm:$0xff]  }
  0xc9   :  { %3520 = vmatpush3.bf16.msra.mxu1 %v3782_v55  ;;  %3499 = vmatprep.subr.bf16.mxu0 %v3783_v56 }
  0xca   :  { %3521 = vmatprep.subr.bf16.mxu1 %v3784_v57  ;;  %v3828_v57 = vld [vmem:[%s4740_s1 + $0x7e8] sm:$0xff]  }
  0xcc   :  { %3500 = vmatpush3.bf16.msra.mxu0 %v3785_v58 }
  0xcd   :  { %3522 = vmatpush3.bf16.msra.mxu1 %v3786_v59  ;;  %3501 = vmatprep.subr.bf16.mxu0 %v3787_v60  ;;  %v3829_v59 = vld [vmem:[%s4740_s1 + $0x728] sm:$0xff]  }
  0xce   :  { %3523 = vmatprep.subr.bf16.mxu1 %v3788_v61  ;;  %v3830_v60 = vld [vmem:[%s4740_s1 + $0x7a8] sm:$0xff]  }
  0xd0   :  { %3502 = vmatpush3.bf16.msra.mxu0 %v3789_v62  ;;  %v3831_v62 = vld [vmem:[%s4740_s1 + $0x770] sm:$0xff]  }
  0xd1   :  { %3524 = vmatpush3.bf16.msra.mxu1 %v3790_v63  ;;  %3503 = vmatprep.subr.bf16.mxu0 %v3791_v0  ;;  %v3832_v63 = vld [vmem:[%s4740_s1 + $0x7f0] sm:$0xff]  }
  0xd2   :  { %3525 = vmatprep.subr.bf16.mxu1 %v3792_v1  ;;  %v3833_v0 = vld [vmem:[%s4740_s1 + $0x730] sm:$0xff]  }
  0xd3   :  { %v3834_v1 = vld [vmem:[%s4740_s1 + $0x7b0] sm:$0xff]  }
  0xd4   :  { %3504 = vmatpush3.bf16.msra.mxu0 %v3793_v2  ;;  %v3835_v2 = vld [vmem:[%s4740_s1 + $0x778] sm:$0xff]  }
  0xd5   :  { %3526 = vmatpush3.bf16.msra.mxu1 %v3794_v3  ;;  %3505 = vmatprep.subr.bf16.mxu0 %v3795_v4  ;;  %v3836_v3 = vld [vmem:[%s4740_s1 + $0x7f8] sm:$0xff]  }
  0xd6   :  { %3527 = vmatprep.subr.bf16.mxu1 %v3796_v5  ;;  %v3837_v4 = vld [vmem:[%s4740_s1 + $0x738] sm:$0xff]  }
  0xd7   :  { %v3838_v5 = vld [vmem:[%s4740_s1 + $0x7b8] sm:$0xff]  }
  0xd8   :  { %3506 = vmatpush3.bf16.msra.mxu0 %v3797_v6  ;;  %v29_v6 = vld [vmem:[%s4741_s0 + $0x70] sm:$0xff] }
  0xd9   :  { %3528 = vmatpush3.bf16.msra.mxu1 %v3798_v7  ;;  %3507 = vmatprep.subr.bf16.mxu0 %v3799_v8  ;;  %v45_v7 = vld [vmem:[%s4741_s0 + $0xf0] sm:$0xff] }
  0xda   :  { %3529 = vmatprep.subr.bf16.mxu1 %v3800_v9  ;;  %v2971_v8 = vcombine.low %v29_v6, %v45_v7  ;;  %v2972_v9 = vcombine.high %v29_v6, %v45_v7 }
  0xdc   :  { %3508 = vmatpush3.bf16.msra.mxu0 %v3801_v10  ;;  %v30_v10 = vld [vmem:[%s4741_s0 + $0x78] sm:$0xff] }
  0xdd   :  { %3530 = vmatpush3.bf16.msra.mxu1 %v3802_v11  ;;  %3509 = vmatprep.subr.bf16.mxu0 %v3803_v12  ;;  %v46_v11 = vld [vmem:[%s4741_s0 + $0xf8] sm:$0xff] }
  0xde   :  { %3531 = vmatprep.subr.bf16.mxu1 %v3804_v13  ;;  %v2973_v12 = vcombine.low %v30_v10, %v46_v11  ;;  %v2974_v13 = vcombine.high %v30_v10, %v46_v11 }
  0xe0   :  { %3510 = vmatpush3.bf16.msra.mxu0 %v3805_v14 }
  0xe1   :  { %3532 = vmatpush3.bf16.msra.mxu1 %v3806_v15  ;;  %3539 = vmatprep.subr.bf16.mxu0 %v3807_v24 }
  0xe2   :  { %3561 = vmatprep.subr.bf16.mxu1 %v3808_v25 }
  0xe3   :  { %2780 = vmatmul.mubr.bf16.vlgmr.msra.gmra.mrb[24].mxu0 %v2967_v19 }
  0xe4   :  { %2821 = vmatmul.mubr.bf16.vlgmr.msra.gmra.mrb[24].mxu1 %v2969_v22  ;;  %3540 = vmatpush3.bf16.msra.mxu0 %v3809_v26 }
  0xe5   :  { %3562 = vmatpush3.bf16.msra.mxu1 %v3810_v27  ;;  %3541 = vmatprep.subr.bf16.mxu0 %v3811_v28 }
  0xe6   :  { %3563 = vmatprep.subr.bf16.mxu1 %v3812_v29  ;;  %2861 = vmatprep.mubr.bf16.mxu0 %v2972_v9 }
  0xe7   :  { %2902 = vmatprep.mubr.bf16.mxu1 %v2974_v13 }
  0xe8   :  { %3542 = vmatpush3.bf16.msra.mxu0 %v3813_v30 }
  0xe9   :  { %3564 = vmatpush3.bf16.msra.mxu1 %v3814_v31  ;;  %3543 = vmatprep.subr.bf16.mxu0 %v3815_v32 }
  0xea   :  { %3565 = vmatprep.subr.bf16.mxu1 %v3816_v33 }
  0xec   :  { %3544 = vmatpush3.bf16.msra.mxu0 %v3817_v34 }
  0xed   :  { %3566 = vmatpush3.bf16.msra.mxu1 %v3818_v35  ;;  %3545 = vmatprep.subr.bf16.mxu0 %v3819_v36 }
  0xee   :  { %3567 = vmatprep.subr.bf16.mxu1 %v3820_v37 }
  0xf0   :  { %3546 = vmatpush3.bf16.msra.mxu0 %v3821_v39 }
  0xf1   :  { %3568 = vmatpush3.bf16.msra.mxu1 %v3822_v41  ;;  %3547 = vmatprep.subr.bf16.mxu0 %v3823_v43 }
  0xf2   :  { %3569 = vmatprep.subr.bf16.mxu1 %v3824_v46 }
  0xf4   :  { %3548 = vmatpush3.bf16.msra.mxu0 %v3825_v49 }
  0xf5   :  { %3570 = vmatpush3.bf16.msra.mxu1 %v3826_v51  ;;  %3549 = vmatprep.subr.bf16.mxu0 %v3827_v54 }
  0xf6   :  { %v3247_v38 = vpop.f32.mrb[0].mxu0  ;;  %3571 = vmatprep.subr.bf16.mxu1 %v3828_v57 }
  0xf7   :  { %v3269_v40 = vpop.f32.mrb[0].mxu1  ;;  %v3248_v42 = vpop.f32.mrb[1].mxu0 }
  0xf8   :  { %v3249_v44 = vadd.f32 %v3248_v42, %v3247_v38  ;;  %v3270_v45 = vpop.f32.mrb[1].mxu1  ;;  %v3250_v48 = vpop.f32.mrb[2].mxu0  ;;  %3550 = vmatpush3.bf16.msra.mxu0 %v3829_v59 }
  0xf9   :  { %v3271_v47 = vadd.f32 %v3270_v45, %v3269_v40  ;;  %v3272_v50 = vpop.f32.mrb[2].mxu1  ;;  %v3251_v53 = vpop.f32.mrb[3].mxu0  ;;  %3572 = vmatpush3.bf16.msra.mxu1 %v3830_v60  ;;  %3551 = vmatprep.subr.bf16.mxu0 %v3831_v62 }
  0xfa   :  { %v3252_v55 = vadd.f32 %v3251_v53, %v3250_v48  ;;  %v3273_v56 = vpop.f32.mrb[3].mxu1  ;;  %3573 = vmatprep.subr.bf16.mxu1 %v3832_v63 }
  0xfb   :  { %v2331_v52 = vadd.f32 %v3271_v47, %v3249_v44  ;;  %v3274_v58 = vadd.f32 %v3273_v56, %v3272_v50 }
  0xfc   :  { %3552 = vmatpush3.bf16.msra.mxu0 %v3833_v0 }
  0xfd   :  { %v2334_v61 = vadd.f32 %v3274_v58, %v3252_v55  ;;  %3574 = vmatpush3.bf16.msra.mxu1 %v3834_v1  ;;  %3553 = vmatprep.subr.bf16.mxu0 %v3835_v2 }
  0xfe   :  { %3575 = vmatprep.subr.bf16.mxu1 %v3836_v3 }
 0x100   :  { %3554 = vmatpush3.bf16.msra.mxu0 %v3837_v4 }
 0x101   :  { %3576 = vmatpush3.bf16.msra.mxu1 %v3838_v5 }
 0x103   :  { %2862 = vmatmul.mubr.bf16.vlgmr.msra.gmra.mrb[28].mxu0 %v2971_v8 }
 0x104   :  { %2903 = vmatmul.mubr.bf16.vlgmr.msra.gmra.mrb[28].mxu1 %v2973_v12 }
 0x116   :  { %v3291_v14 = vpop.f32.mrb[4].mxu0 }
 0x117   :  { %v3313_v15 = vpop.f32.mrb[4].mxu1  ;;  %v3292_v16 = vpop.f32.mrb[5].mxu0 }
 0x118   :  { %v3293_v17 = vadd.f32 %v3292_v16, %v3291_v14  ;;  %v3314_v18 = vpop.f32.mrb[5].mxu1  ;;  %v3294_v19 = vpop.f32.mrb[6].mxu0 }
 0x119   :  { %v3315_v20 = vadd.f32 %v3314_v18, %v3313_v15  ;;  %v3316_v21 = vpop.f32.mrb[6].mxu1  ;;  %v3295_v22 = vpop.f32.mrb[7].mxu0 }
 0x11a   :  { %v2372_v23 = vadd.f32 %v3293_v17, %v2331_v52  ;;  %v3296_v24 = vadd.f32 %v3295_v22, %v3294_v19  ;;  %v3317_v25 = vpop.f32.mrb[7].mxu1 }
 0x11b   :  { %v3318_v26 = vadd.f32 %v3317_v25, %v3316_v21 }
 0x11c   :  { %v2413_v27 = vadd.f32 %v3315_v20, %v2372_v23  ;;  %v2375_v28 = vadd.f32 %v3296_v24, %v2334_v61 }
 0x11e   :  { %v2416_v29 = vadd.f32 %v3318_v26, %v2375_v28 }
 0x136   :  { %v3335_v30 = vpop.f32.mrb[8].mxu0 }
 0x137   :  { %v3357_v31 = vpop.f32.mrb[8].mxu1  ;;  %v3336_v32 = vpop.f32.mrb[9].mxu0 }
 0x138   :  { %v3358_v33 = vpop.f32.mrb[9].mxu1  ;;  %v3337_v34 = vadd.f32 %v3336_v32, %v3335_v30  ;;  %v3338_v36 = vpop.f32.mrb[10].mxu0 }
 0x139   :  { %v3359_v35 = vadd.f32 %v3358_v33, %v3357_v31  ;;  %v3360_v37 = vpop.f32.mrb[10].mxu1  ;;  %v3339_v38 = vpop.f32.mrb[11].mxu0 }
 0x13a   :  { %v3361_v39 = vpop.f32.mrb[11].mxu1  ;;  %v2454_v40 = vadd.f32 %v3337_v34, %v2413_v27  ;;  %v3340_v41 = vadd.f32 %v3339_v38, %v3338_v36 }
 0x13b   :  { %v3362_v42 = vadd.f32 %v3361_v39, %v3360_v37 }
 0x13c   :  { %v2495_v43 = vadd.f32 %v3359_v35, %v2454_v40  ;;  %v2457_v44 = vadd.f32 %v3340_v41, %v2416_v29 }
 0x13e   :  { %v2498_v45 = vadd.f32 %v3362_v42, %v2457_v44 }
 0x156   :  { %v3379_v46 = vpop.f32.mrb[12].mxu0 }
 0x157   :  { %v3401_v47 = vpop.f32.mrb[12].mxu1  ;;  %v3380_v48 = vpop.f32.mrb[13].mxu0 }
 0x158   :  { %v3381_v49 = vadd.f32 %v3380_v48, %v3379_v46  ;;  %v3402_v50 = vpop.f32.mrb[13].mxu1  ;;  %v3382_v51 = vpop.f32.mrb[14].mxu0 }
 0x159   :  { %v3403_v52 = vadd.f32 %v3402_v50, %v3401_v47  ;;  %v3404_v53 = vpop.f32.mrb[14].mxu1  ;;  %v3383_v54 = vpop.f32.mrb[15].mxu0 }
 0x15a   :  { %v2536_v55 = vadd.f32 %v3381_v49, %v2495_v43  ;;  %v3384_v56 = vadd.f32 %v3383_v54, %v3382_v51  ;;  %v3405_v57 = vpop.f32.mrb[15].mxu1 }
 0x15b   :  { %v3406_v58 = vadd.f32 %v3405_v57, %v3404_v53 }
 0x15c   :  { %v2577_v59 = vadd.f32 %v3403_v52, %v2536_v55  ;;  %v2539_v60 = vadd.f32 %v3384_v56, %v2498_v45 }
 0x15e   :  { %v2580_v61 = vadd.f32 %v3406_v58, %v2539_v60 }
 0x176   :  { %v3423_v62 = vpop.f32.mrb[16].mxu0 }
 0x177   :  { %v3445_v63 = vpop.f32.mrb[16].mxu1  ;;  %v3424_v0 = vpop.f32.mrb[17].mxu0 }
 0x178   :  { %v3425_v1 = vadd.f32 %v3424_v0, %v3423_v62  ;;  %v3446_v2 = vpop.f32.mrb[17].mxu1  ;;  %v3426_v3 = vpop.f32.mrb[18].mxu0 }
 0x179   :  { %v3447_v4 = vadd.f32 %v3446_v2, %v3445_v63  ;;  %v3448_v5 = vpop.f32.mrb[18].mxu1  ;;  %v3427_v6 = vpop.f32.mrb[19].mxu0 }
 0x17a   :  { %v2618_v7 = vadd.f32 %v3425_v1, %v2577_v59  ;;  %v3428_v8 = vadd.f32 %v3427_v6, %v3426_v3  ;;  %v3449_v9 = vpop.f32.mrb[19].mxu1 }
 0x17b   :  { %v3450_v10 = vadd.f32 %v3449_v9, %v3448_v5 }
 0x17c   :  { %v2659_v11 = vadd.f32 %v3447_v4, %v2618_v7  ;;  %v2621_v12 = vadd.f32 %v3428_v8, %v2580_v61 }
 0x17e   :  { %v2662_v13 = vadd.f32 %v3450_v10, %v2621_v12 }
 0x196   :  { %v3467_v14 = vpop.f32.mrb[20].mxu0 }
 0x197   :  { %v3489_v15 = vpop.f32.mrb[20].mxu1  ;;  %v3468_v16 = vpop.f32.mrb[21].mxu0 }
 0x198   :  { %v3490_v17 = vpop.f32.mrb[21].mxu1  ;;  %v3469_v18 = vadd.f32 %v3468_v16, %v3467_v14  ;;  %v3470_v20 = vpop.f32.mrb[22].mxu0 }
 0x199   :  { %v3491_v19 = vadd.f32 %v3490_v17, %v3489_v15  ;;  %v3492_v21 = vpop.f32.mrb[22].mxu1  ;;  %v3471_v22 = vpop.f32.mrb[23].mxu0 }
 0x19a   :  { %v3493_v23 = vpop.f32.mrb[23].mxu1  ;;  %v2700_v24 = vadd.f32 %v3469_v18, %v2659_v11  ;;  %v3472_v25 = vadd.f32 %v3471_v22, %v3470_v20 }
 0x19b   :  { %v3494_v26 = vadd.f32 %v3493_v23, %v3492_v21 }
 0x19c   :  { %v2741_v27 = vadd.f32 %v3491_v19, %v2700_v24  ;;  %v2703_v28 = vadd.f32 %v3472_v25, %v2662_v13 }
 0x19e   :  { %v2744_v29 = vadd.f32 %v3494_v26, %v2703_v28 }
 0x1b6   :  { %v3511_v30 = vpop.f32.mrb[24].mxu0 }
 0x1b7   :  { %v3533_v31 = vpop.f32.mrb[24].mxu1  ;;  %v3512_v32 = vpop.f32.mrb[25].mxu0 }
 0x1b8   :  { %v3513_v33 = vadd.f32 %v3512_v32, %v3511_v30  ;;  %v3534_v34 = vpop.f32.mrb[25].mxu1  ;;  %v3514_v35 = vpop.f32.mrb[26].mxu0 }
 0x1b9   :  { %v3535_v36 = vadd.f32 %v3534_v34, %v3533_v31  ;;  %v3536_v37 = vpop.f32.mrb[26].mxu1  ;;  %v3515_v38 = vpop.f32.mrb[27].mxu0 }
 0x1ba   :  { %v2782_v39 = vadd.f32 %v3513_v33, %v2741_v27  ;;  %v3516_v40 = vadd.f32 %v3515_v38, %v3514_v35  ;;  %v3537_v41 = vpop.f32.mrb[27].mxu1 }
 0x1bb   :  { %v3538_v42 = vadd.f32 %v3537_v41, %v3536_v37 }
 0x1bc   :  { %v2823_v43 = vadd.f32 %v3535_v36, %v2782_v39  ;;  %v2785_v44 = vadd.f32 %v3516_v40, %v2744_v29 }
 0x1be   :  { %v2826_v45 = vadd.f32 %v3538_v42, %v2785_v44 }
 0x1d6   :  { %v3555_v46 = vpop.f32.mrb[28].mxu0 }
 0x1d7   :  { %v3577_v47 = vpop.f32.mrb[28].mxu1  ;;  %v3556_v48 = vpop.f32.mrb[29].mxu0 }
 0x1d8   :  { %v3557_v49 = vadd.f32 %v3556_v48, %v3555_v46  ;;  %v3578_v50 = vpop.f32.mrb[29].mxu1  ;;  %v3558_v51 = vpop.f32.mrb[30].mxu0 }
 0x1d9   :  { %v3579_v52 = vadd.f32 %v3578_v50, %v3577_v47  ;;  %v3580_v53 = vpop.f32.mrb[30].mxu1  ;;  %v3559_v54 = vpop.f32.mrb[31].mxu0 }
 0x1da   :  { %v2864_v55 = vadd.f32 %v3557_v49, %v2823_v43  ;;  %v3560_v56 = vadd.f32 %v3559_v54, %v3558_v51  ;;  %v3581_v57 = vpop.f32.mrb[31].mxu1 }
 0x1db   :  { %v3582_v58 = vadd.f32 %v3581_v57, %v3580_v53 }
 0x1dc   :  { %v2905_v59 = vadd.f32 %v3579_v52, %v2864_v55  ;;  %v2867_v60 = vadd.f32 %v3560_v56, %v2826_v45 }
 0x1de   :  { %2911 = vst [vmem:[%s4742_s2] sm:$0xff] %v2905_v59  ;;  %v2908_v61 = vadd.f32 %v3582_v58, %v2867_v60  ;;  %v2921_v62 = vmul.f32 %v2905_v59, %v2905_v59 }
 0x1e0   :  { %2912 = vst [vmem:[%s4742_s2 + $0x8] sm:$0xff] %v2908_v61  ;;  %v2913_v63 = vadd.f32 %v2908_v61, %v2905_v59  ;;  %v2922_v0 = vmul.f32 %v2908_v61, %v2908_v61 }
 0x1e2   :  { %v2914_v1 = vrot.slane %v2913_v63, 4  ;;  %v2923_v2 = vadd.f32 %v2922_v0, %v2921_v62 }
 0x1e4   :  { %v2915_v3 = vadd.f32 %v2914_v1, %v2913_v63  ;;  %v2924_v4 = vrot.slane %v2923_v2, 4 }
 0x1e6   :  { %v2916_v5 = vrot.slane %v2915_v3, 2  ;;  %v2925_v6 = vadd.f32 %v2924_v4, %v2923_v2 }
 0x1e8   :  { %v2917_v7 = vadd.f32 %v2916_v5, %v2915_v3  ;;  %v2926_v8 = vrot.slane %v2925_v6, 2 }
 0x1ea   :  { %v2918_v9 = vrot.slane %v2917_v7, 1  ;;  %v2927_v10 = vadd.f32 %v2926_v8, %v2925_v6 }
 0x1ec   :  { %v2919_v11 = vadd.f32 %v2918_v9, %v2917_v7  ;;  %v2928_v12 = vrot.slane %v2927_v10, 1 }
 0x1ee   :  { %2920 = vst [vmem:[%s4743_s3] sm:$0x1] %v2919_v11  ;;  %v2929_v13 = vadd.f32 %v2928_v12, %v2927_v10 }
 0x1f0   :  { %2930 = vst [vmem:[%s4744_s4] sm:$0x1] %v2929_v13 }

</bundles_post_ra>
